<compile_context>
chip_gen: v7x
topology: tpu7x:2x2x1
jax: 0.10.0
libtpu: 0.0.40
codegen_flags: <defaults>
</compile_context>

<pallas_src>
import functools

import jax
import jax.numpy as jnp
from jax.experimental import pallas as pl
from jax.experimental.pallas import tpu as pltpu


# ----------------------------------------------------------------------------
# Fused conv + BN + ReLU + 2x2 max-pool
# ----------------------------------------------------------------------------
def conv_bn_relu_pool_kernel(x_ref, w_ref, scale_ref, shift_ref, o_ref):
    """One frame.

    x_ref:  (1, 4, 9*Cin, Ho*Wo)  pool-phase-separated im2col patches (bf16)
    w_ref:  (Cout, 9*Cin)         conv weight (bf16)
    scale/shift: (Cout, 1)        folded BN affine (f32)
    o_ref:  (1, Cout, Ho*Wo)      pooled activation (bf16), NCHW-flattenable
    """
    w = w_ref[...]
    scale = scale_ref[...]
    shift = shift_ref[...]
    acc = None
    for p in range(4):                        # 4 pool phases, static unroll
        y = jnp.dot(w, x_ref[0, p], preferred_element_type=jnp.float32)
        y = jnp.maximum(y * scale + shift, 0.0)
        acc = y if acc is None else jnp.maximum(acc, y)
    o_ref[0] = acc.astype(o_ref.dtype)


def conv_bn_relu_pool(patches, w, scale, shift):
    """patches: (N, 4, K, S); w: (Cout, K) -> (N, Cout, S) bf16."""
    N, _, K, S = patches.shape
    Cout = w.shape[0]
    return pl.pallas_call(
        conv_bn_relu_pool_kernel,
        out_shape=jax.ShapeDtypeStruct((N, Cout, S), jnp.bfloat16),
        grid_spec=pltpu.PrefetchScalarGridSpec(
            num_scalar_prefetch=0,
            grid=(N,),
            in_specs=[
                pl.BlockSpec((1, 4, K, S), lambda n: (n, 0, 0, 0)),
                pl.BlockSpec((Cout, K), lambda n: (0, 0)),
                pl.BlockSpec((Cout, 1), lambda n: (0, 0)),
                pl.BlockSpec((Cout, 1), lambda n: (0, 0)),
            ],
            out_specs=pl.BlockSpec((1, Cout, S), lambda n: (n, 0, 0)),
        ),
        compiler_params=pltpu.CompilerParams(
            dimension_semantics=("parallel",),
        ),
    )(patches, w, scale, shift)


# ----------------------------------------------------------------------------
# K-tiled matmul + bias (LSTM layer-0 input projection)
# ----------------------------------------------------------------------------
def matmul_bias_kernel(x_ref, w_ref, b_ref, o_ref, acc_ref):
    k = pl.program_id(1)

    @pl.when(k == 0)
    def _():
        acc_ref[...] = jnp.zeros_like(acc_ref)

    acc_ref[...] += jnp.dot(x_ref[...], w_ref[...],
                            preferred_element_type=jnp.float32)

    @pl.when(k == pl.num_programs(1) - 1)
    def _():
        o_ref[...] = (acc_ref[...] + b_ref[...]).astype(o_ref.dtype)


def _pick_k_tile(K, max_tile=4096):
    if K <= max_tile:
        return K
    for cand in range(max_tile, 0, -128):
        if cand % 128 == 0 and K % cand == 0:
            return cand
    return K                                  # fallback: single K block


def matmul_bias(x, w, b, *, out_dtype=jnp.float32):
    M, K = x.shape
    K2, N = w.shape
    assert K == K2
    k_tile = _pick_k_tile(K)
    return pl.pallas_call(
        matmul_bias_kernel,
        out_shape=jax.ShapeDtypeStruct((M, N), out_dtype),
        grid_spec=pltpu.PrefetchScalarGridSpec(
            num_scalar_prefetch=0,
            grid=(1, K // k_tile),
            in_specs=[
                pl.BlockSpec((M, k_tile), lambda i, k: (i, k)),
                pl.BlockSpec((k_tile, N), lambda i, k: (k, 0)),
                pl.BlockSpec((1, N), lambda i, k: (0, 0)),
            ],
            out_specs=pl.BlockSpec((M, N), lambda i, k: (i, 0)),
            scratch_shapes=[pltpu.VMEM((M, N), jnp.float32)],
        ),
        compiler_params=pltpu.CompilerParams(
            dimension_semantics=("parallel", "arbitrary"),
        ),
    )(x, w, b)


# ----------------------------------------------------------------------------
# LSTM recurrence kernels (h, c live in VMEM scratch across the T grid)
# ----------------------------------------------------------------------------
def _lstm_gate_math(gates, c_prev, hidden):
    """PyTorch gate order i, f, g, o.  Full-width EUP sigmoid/tanh, slice after."""
    sig = jax.nn.sigmoid(gates)
    th = jnp.tanh(gates)
    i = sig[:, 0 * hidden:1 * hidden]
    f = sig[:, 1 * hidden:2 * hidden]
    g = th[:, 2 * hidden:3 * hidden]
    o = sig[:, 3 * hidden:4 * hidden]
    c = f * c_prev + i * g
    h = o * jnp.tanh(c)
    return h, c


def lstm_seq_gx_kernel(gx_ref, whh_ref, hseq_ref, h_scr, c_scr, *, hidden):
    """First layer (input projection already hoisted), full hidden sequence out."""
    t = pl.program_id(0)

    @pl.when(t == 0)
    def _():
        h_scr[...] = jnp.zeros_like(h_scr)
        c_scr[...] = jnp.zeros_like(c_scr)

    gates = gx_ref[0] + jnp.dot(h_scr[...], whh_ref[...],
                                preferred_element_type=jnp.float32)
    h, c = _lstm_gate_math(gates, c_scr[...], hidden)
    h_scr[...] = h
    c_scr[...] = c
    hseq_ref[0] = h.astype(hseq_ref.dtype)


def lstm_seq_gx(gates_x, whh, hidden):
    """gates_x: (T, B, 4H) f32 (= x@W_ih + b) -> hidden sequence (T, B, H) bf16."""
    T, B, _ = gates_x.shape
    return pl.pallas_call(
        functools.partial(lstm_seq_gx_kernel, hidden=hidden),
        out_shape=jax.ShapeDtypeStruct((T, B, hidden), jnp.bfloat16),
        grid_spec=pltpu.PrefetchScalarGridSpec(
            num_scalar_prefetch=0,
            grid=(T,),
            in_specs=[
                pl.BlockSpec((1, B, 4 * hidden), lambda t: (t, 0, 0)),
                pl.BlockSpec((hidden, 4 * hidden), lambda t: (0, 0)),
            ],
            out_specs=pl.BlockSpec((1, B, hidden), lambda t: (t, 0, 0)),
            scratch_shapes=[pltpu.VMEM((B, hidden), jnp.float32),
                            pltpu.VMEM((B, hidden), jnp.float32)],
        ),
        compiler_params=pltpu.CompilerParams(
            dimension_semantics=("arbitrary",),
        ),
    )(gates_x, whh)


def lstm_seq_h_kernel(x_ref, wih_ref, whh_ref, b_ref, hseq_ref,
                      h_scr, c_scr, *, hidden):
    """Middle layer: input projection fused into the recurrence."""
    t = pl.program_id(0)

    @pl.when(t == 0)
    def _():
        h_scr[...] = jnp.zeros_like(h_scr)
        c_scr[...] = jnp.zeros_like(c_scr)

    gates = (jnp.dot(x_ref[0], wih_ref[...], preferred_element_type=jnp.float32)
             + jnp.dot(h_scr[...], whh_ref[...], preferred_element_type=jnp.float32)
             + b_ref[...])
    h, c = _lstm_gate_math(gates, c_scr[...], hidden)
    h_scr[...] = h
    c_scr[...] = c
    hseq_ref[0] = h.astype(hseq_ref.dtype)


def lstm_seq_h(x_seq, wih, whh, b, hidden):
    """x_seq: (T, B, H) bf16 (previous layer's hidden seq) -> (T, B, H) bf16."""
    T, B, D = x_seq.shape
    return pl.pallas_call(
        functools.partial(lstm_seq_h_kernel, hidden=hidden),
        out_shape=jax.ShapeDtypeStruct((T, B, hidden), jnp.bfloat16),
        grid_spec=pltpu.PrefetchScalarGridSpec(
            num_scalar_prefetch=0,
            grid=(T,),
            in_specs=[
                pl.BlockSpec((1, B, D), lambda t: (t, 0, 0)),
                pl.BlockSpec((D, 4 * hidden), lambda t: (0, 0)),
                pl.BlockSpec((hidden, 4 * hidden), lambda t: (0, 0)),
                pl.BlockSpec((1, 4 * hidden), lambda t: (0, 0)),
            ],
            out_specs=pl.BlockSpec((1, B, hidden), lambda t: (t, 0, 0)),
            scratch_shapes=[pltpu.VMEM((B, hidden), jnp.float32),
                            pltpu.VMEM((B, hidden), jnp.float32)],
        ),
        compiler_params=pltpu.CompilerParams(
            dimension_semantics=("arbitrary",),
        ),
    )(x_seq, wih, whh, b)


def lstm_fc_gx_kernel(gx_ref, whh_ref, wfc_ref, bfc_ref, out_ref,
                      h_scr, c_scr, *, hidden):
    """Single-layer LSTM: only final hidden state matters; FC fused in epilogue."""
    t = pl.program_id(0)

    @pl.when(t == 0)
    def _():
        h_scr[...] = jnp.zeros_like(h_scr)
        c_scr[...] = jnp.zeros_like(c_scr)

    gates = gx_ref[0] + jnp.dot(h_scr[...], whh_ref[...],
                                preferred_element_type=jnp.float32)
    h, c = _lstm_gate_math(gates, c_scr[...], hidden)
    h_scr[...] = h
    c_scr[...] = c

    @pl.when(t == pl.num_programs(0) - 1)
    def _():
        out_ref[...] = (jnp.dot(h, wfc_ref[...],
                                preferred_element_type=jnp.float32)
                        + bfc_ref[...]).astype(out_ref.dtype)


def lstm_fc_gx(gates_x, whh, w_fc, b_fc, hidden, num_classes):
    T, B, _ = gates_x.shape
    return pl.pallas_call(
        functools.partial(lstm_fc_gx_kernel, hidden=hidden),
        out_shape=jax.ShapeDtypeStruct((B, num_classes), jnp.float32),
        grid_spec=pltpu.PrefetchScalarGridSpec(
            num_scalar_prefetch=0,
            grid=(T,),
            in_specs=[
                pl.BlockSpec((1, B, 4 * hidden), lambda t: (t, 0, 0)),
                pl.BlockSpec((hidden, 4 * hidden), lambda t: (0, 0)),
                pl.BlockSpec((hidden, num_classes), lambda t: (0, 0)),
                pl.BlockSpec((1, num_classes), lambda t: (0, 0)),
            ],
            out_specs=pl.BlockSpec((B, num_classes), lambda t: (0, 0)),
            scratch_shapes=[pltpu.VMEM((B, hidden), jnp.float32),
                            pltpu.VMEM((B, hidden), jnp.float32)],
        ),
        compiler_params=pltpu.CompilerParams(
            dimension_semantics=("arbitrary",),
        ),
    )(gates_x, whh, w_fc, b_fc)


def lstm_fc_h_kernel(x_ref, wih_ref, whh_ref, b_ref, wfc_ref, bfc_ref, out_ref,
                     h_scr, c_scr, *, hidden):
    """Last layer (>=1): fused input projection + FC head on the final step."""
    t = pl.program_id(0)

    @pl.when(t == 0)
    def _():
        h_scr[...] = jnp.zeros_like(h_scr)
        c_scr[...] = jnp.zeros_like(c_scr)

    gates = (jnp.dot(x_ref[0], wih_ref[...], preferred_element_type=jnp.float32)
             + jnp.dot(h_scr[...], whh_ref[...], preferred_element_type=jnp.float32)
             + b_ref[...])
    h, c = _lstm_gate_math(gates, c_scr[...], hidden)
    h_scr[...] = h
    c_scr[...] = c

    @pl.when(t == pl.num_programs(0) - 1)
    def _():
        out_ref[...] = (jnp.dot(h, wfc_ref[...],
                                preferred_element_type=jnp.float32)
                        + bfc_ref[...]).astype(out_ref.dtype)


def lstm_fc_h(x_seq, wih, whh, b, w_fc, b_fc, hidden, num_classes):
    T, B, D = x_seq.shape
    return pl.pallas_call(
        functools.partial(lstm_fc_h_kernel, hidden=hidden),
        out_shape=jax.ShapeDtypeStruct((B, num_classes), jnp.float32),
        grid_spec=pltpu.PrefetchScalarGridSpec(
            num_scalar_prefetch=0,
            grid=(T,),
            in_specs=[
                pl.BlockSpec((1, B, D), lambda t: (t, 0, 0)),
                pl.BlockSpec((D, 4 * hidden), lambda t: (0, 0)),
                pl.BlockSpec((hidden, 4 * hidden), lambda t: (0, 0)),
                pl.BlockSpec((1, 4 * hidden), lambda t: (0, 0)),
                pl.BlockSpec((hidden, num_classes), lambda t: (0, 0)),
                pl.BlockSpec((1, num_classes), lambda t: (0, 0)),
            ],
            out_specs=pl.BlockSpec((B, num_classes), lambda t: (0, 0)),
            scratch_shapes=[pltpu.VMEM((B, hidden), jnp.float32),
                            pltpu.VMEM((B, hidden), jnp.float32)],
        ),
        compiler_params=pltpu.CompilerParams(
            dimension_semantics=("arbitrary",),
        ),
    )(x_seq, wih, whh, b, w_fc, b_fc)


# ----------------------------------------------------------------------------
# JAX glue: patch extraction, parameter init, full forward
# ----------------------------------------------------------------------------
def conv_pool_inputs(x_nchw):
    """(N, C, H, W) -> (N, 4, 9*C, Ho*Wo) pool-phase-separated 3x3/pad1 patches.

    Phase p = (ph, pw) holds the im2col patches of conv output positions
    (2h'+ph, 2w'+pw), so max over the phase axis == MaxPool2d(2, 2).
    Row index of the patch axis is cin*9 + kh*3 + kw, matching a PyTorch
    (Cout, Cin, 3, 3) weight flattened to (Cout, Cin*9).
    """
    N, C, H, W = x_nchw.shape
    Ho, Wo = H // 2, W // 2
    xp = jnp.pad(x_nchw, ((0, 0), (0, 0), (1, 1), (1, 1)))
    cols = []
    for dh in range(3):
        for dw in range(3):
            cols.append(xp[:, :, dh:dh + H, dw:dw + W])
    pat = jnp.stack(cols, axis=2).reshape(N, C * 9, H, W)
    phases = []
    for ph in range(2):
        for pw in range(2):
            phases.append(pat[:, :, ph::2, pw::2].reshape(N, C * 9, Ho * Wo))
    return jnp.stack(phases, axis=1)          # (N, 4, 9C, Ho*Wo)


def fold_bn(conv_bias, gamma, beta, mean, var, eps=1e-5):
    scale = gamma / jnp.sqrt(var + eps)
    shift = beta + (conv_bias - mean) * scale
    return scale.reshape(-1, 1), shift.reshape(-1, 1)


def init_params(key, hidden_dim, num_layers, num_classes):
    flattened_size = 64 * 20 * 15                           # hard-coded in the module
    ks = list(jax.random.split(key, 8 + 3 * num_layers))
    p = {}
    # conv1: PyTorch weight (32, 3, 3, 3) -> (Cout, Cin*9)
    p["w1"] = (jax.random.normal(ks[0], (32, 27), jnp.float32) * 0.05
               ).astype(jnp.bfloat16)
    b1 = jax.random.normal(ks[1], (32,), jnp.float32) * 0.05
    p["scale1"], p["shift1"] = fold_bn(b1, jnp.ones(32), jnp.zeros(32),
                                       jnp.zeros(32), jnp.ones(32))
    # conv2: PyTorch weight (64, 32, 3, 3) -> (Cout, Cin*9)
    p["w2"] = (jax.random.normal(ks[2], (64, 288), jnp.float32) * 0.05
               ).astype(jnp.bfloat16)
    b2 = jax.random.normal(ks[3], (64,), jnp.float32) * 0.05
    p["scale2"], p["shift2"] = fold_bn(b2, jnp.ones(64), jnp.zeros(64),
                                       jnp.zeros(64), jnp.ones(64))
    # LSTM: W_ih stored transposed (D, 4H) bf16, W_hh (H, 4H) f32, bias = b_ih + b_hh
    p["lstm"] = []
    for layer in range(num_layers):
        d_in = flattened_size if layer == 0 else hidden_dim
        kw = ks[4 + 3 * layer: 7 + 3 * layer]
        wih = (jax.random.normal(kw[0], (d_in, 4 * hidden_dim), jnp.float32) * 0.01
               ).astype(jnp.bfloat16)
        whh = jax.random.normal(kw[1], (hidden_dim, 4 * hidden_dim), jnp.float32) * 0.1
        b = jax.random.normal(kw[2], (1, 4 * hidden_dim), jnp.float32) * 0.1
        p["lstm"].append((wih, whh, b))
    p["w_fc"] = jax.random.normal(ks[-2], (hidden_dim, num_classes), jnp.float32) * 0.1
    p["b_fc"] = jax.random.normal(ks[-1], (1, num_classes), jnp.float32) * 0.1
    return p


def forward(x, params, hidden_dim, num_classes):
    """x: (B, T, 3, 80, 60) float32 (PyTorch NCHW per frame)."""
    B, T, C, H, W = x.shape
    frames = x.reshape(B * T, C, H, W).astype(jnp.bfloat16)

    # conv1 + bn1 + relu + pool (single fused kernel, lane-dense NCHW output)
    p1 = conv_pool_inputs(frames)                           # (BT, 4, 27, 1200)
    y1 = conv_bn_relu_pool(p1, params["w1"], params["scale1"], params["shift1"])
    y1 = y1.reshape(B * T, 32, H // 2, W // 2)              # (BT, 32, 40, 30)

    # conv2 + bn2 + relu + pool
    p2 = conv_pool_inputs(y1)                               # (BT, 4, 288, 300)
    y2 = conv_bn_relu_pool(p2, params["w2"], params["scale2"], params["shift2"])
    # output is (BT, 64, 300) == NCHW -> flatten matches PyTorch frame.view(B, -1)
    feat_dim = 64 * (H // 4) * (W // 4)
    feats = y2.reshape(B * T, feat_dim)                     # bf16, rows = b*T + t

    num_layers = len(params["lstm"])

    # Layer 0: hoist x @ W_ih + b out of the recurrence (one K-tiled matmul).
    wih0, whh0, b0 = params["lstm"][0]
    gx = matmul_bias(feats, wih0, b0)                       # (B*T, 4H) f32
    gx = gx.reshape(B, T, 4 * hidden_dim).transpose(1, 0, 2)   # (T, B, 4H)
    if num_layers == 1:
        return lstm_fc_gx(gx, whh0, params["w_fc"], params["b_fc"],
                          hidden_dim, num_classes)

    h_seq = lstm_seq_gx(gx, whh0, hidden_dim)               # (T, B, H) bf16

    # Middle layers: input projection fused into the recurrence.
    for li in range(1, num_layers - 1):
        wih, whh, b = params["lstm"][li]
        h_seq = lstm_seq_h(h_seq, wih, whh, b, hidden_dim)

    # Last layer: only final hidden state; FC head fused in epilogue.
    wih, whh, b = params["lstm"][-1]
    return lstm_fc_h(h_seq, wih, whh, b, params["w_fc"], params["b_fc"],
                     hidden_dim, num_classes)               # (B, num_classes) f32


if __name__ == "__main__":
    B, T = 2, 4
    H_img, W_img = 80, 60       # two 2x2 pools -> 20x15 -> flattened 64*20*15
    hidden_dim, num_layers, num_classes = 32, 2, 5

    key = jax.random.PRNGKey(0)
    k_x, k_p = jax.random.split(key)
    x = jax.random.normal(k_x, (B, T, 3, H_img, W_img), jnp.float32)
    params = init_params(k_p, hidden_dim, num_layers, num_classes)

    fwd = jax.jit(functools.partial(forward, hidden_dim=hidden_dim,
                                    num_classes=num_classes))
    out = jax.block_until_ready(fwd(x, params))
    assert out.shape == (B, num_classes)
    assert bool(jnp.all(jnp.isfinite(out)))
    print("KERNEL_OK")
</pallas_src>

<mosaic_0001>
module attributes {stable_mosaic.version = 11 : i64} {
  func.func @conv_bn_relu_pool_kernel(%arg0: i32, %arg1: memref<1x4x27x1200xbf16, #tpu.memory_space<vmem>>, %arg2: memref<32x27xbf16, #tpu.memory_space<vmem>>, %arg3: memref<32x1xf32, #tpu.memory_space<vmem>>, %arg4: memref<32x1xf32, #tpu.memory_space<vmem>>, %arg5: memref<1x32x1200xbf16, #tpu.memory_space<vmem>>) attributes {dimension_semantics = [#tpu.dimension_semantics<parallel>], iteration_bounds = array<i64: 8>, scalar_prefetch = 0 : i64, scratch_operands = 0 : i64, tpu.core_type = #tpu.core_type<tc>, window_params = [{transform_indices = @transform_0, window_bounds = array<i64: 1, 4, 27, 1200>}, {pipeline_mode = #tpu.pipeline_mode<synchronous>, transform_indices = @transform_1, window_bounds = array<i64: 32, 27>}, {pipeline_mode = #tpu.pipeline_mode<synchronous>, transform_indices = @transform_2, window_bounds = array<i64: 32, 1>}, {pipeline_mode = #tpu.pipeline_mode<synchronous>, transform_indices = @transform_3, window_bounds = array<i64: 32, 1>}, {transform_indices = @transform_4, window_bounds = array<i64: 1, 32, 1200>}]} {
    %c0 = arith.constant 0 : index
    %c0_0 = arith.constant 0 : index
    %0 = vector.load %arg2[%c0, %c0_0] : memref<32x27xbf16, #tpu.memory_space<vmem>>, vector<32x27xbf16>
    %c0_1 = arith.constant 0 : index
    %c0_2 = arith.constant 0 : index
    %1 = vector.load %arg3[%c0_1, %c0_2] : memref<32x1xf32, #tpu.memory_space<vmem>>, vector<32x1xf32>
    %c0_3 = arith.constant 0 : index
    %c0_4 = arith.constant 0 : index
    %2 = vector.load %arg4[%c0_3, %c0_4] : memref<32x1xf32, #tpu.memory_space<vmem>>, vector<32x1xf32>
    %c0_5 = arith.constant 0 : index
    %c0_6 = arith.constant 0 : index
    %c0_7 = arith.constant 0 : index
    %c0_8 = arith.constant 0 : index
    %3 = vector.load %arg1[%c0_5, %c0_6, %c0_7, %c0_8] : memref<1x4x27x1200xbf16, #tpu.memory_space<vmem>>, vector<1x1x27x1200xbf16>
    %4 = vector.shape_cast %3 : vector<1x1x27x1200xbf16> to vector<27x1200xbf16>
    %cst = arith.constant dense<0.000000e+00> : vector<32x1200xf32>
    %5 = tpu.matmul %0, %4, %cst {dimension_numbers = #tpu.dot_dimension_numbers<[1], [0], [0], [1], [0, 0, 1, 1], [], []>} : vector<32x27xbf16>, vector<27x1200xbf16>, vector<32x1200xf32> -> vector<32x1200xf32>
    %6 = vector.broadcast %1 : vector<32x1xf32> to vector<32x1200xf32>
    %7 = arith.mulf %5, %6 : vector<32x1200xf32>
    %8 = vector.broadcast %2 : vector<32x1xf32> to vector<32x1200xf32>
    %9 = arith.addf %7, %8 : vector<32x1200xf32>
    %cst_9 = arith.constant 0.000000e+00 : f32
    %10 = vector.broadcast %cst_9 : f32 to vector<32x1200xf32>
    %11 = arith.maximumf %9, %10 : vector<32x1200xf32>
    %c0_10 = arith.constant 0 : index
    %c1 = arith.constant 1 : index
    %c0_11 = arith.constant 0 : index
    %c0_12 = arith.constant 0 : index
    %12 = vector.load %arg1[%c0_10, %c1, %c0_11, %c0_12] : memref<1x4x27x1200xbf16, #tpu.memory_space<vmem>>, vector<1x1x27x1200xbf16>
    %13 = vector.shape_cast %12 : vector<1x1x27x1200xbf16> to vector<27x1200xbf16>
    %cst_13 = arith.constant dense<0.000000e+00> : vector<32x1200xf32>
    %14 = tpu.matmul %0, %13, %cst_13 {dimension_numbers = #tpu.dot_dimension_numbers<[1], [0], [0], [1], [0, 0, 1, 1], [], []>} : vector<32x27xbf16>, vector<27x1200xbf16>, vector<32x1200xf32> -> vector<32x1200xf32>
    %15 = vector.broadcast %1 : vector<32x1xf32> to vector<32x1200xf32>
    %16 = arith.mulf %14, %15 : vector<32x1200xf32>
    %17 = vector.broadcast %2 : vector<32x1xf32> to vector<32x1200xf32>
    %18 = arith.addf %16, %17 : vector<32x1200xf32>
    %cst_14 = arith.constant 0.000000e+00 : f32
    %19 = vector.broadcast %cst_14 : f32 to vector<32x1200xf32>
    %20 = arith.maximumf %18, %19 : vector<32x1200xf32>
    %21 = arith.maximumf %11, %20 : vector<32x1200xf32>
    %c0_15 = arith.constant 0 : index
    %c2 = arith.constant 2 : index
    %c0_16 = arith.constant 0 : index
    %c0_17 = arith.constant 0 : index
    %22 = vector.load %arg1[%c0_15, %c2, %c0_16, %c0_17] : memref<1x4x27x1200xbf16, #tpu.memory_space<vmem>>, vector<1x1x27x1200xbf16>
    %23 = vector.shape_cast %22 : vector<1x1x27x1200xbf16> to vector<27x1200xbf16>
    %cst_18 = arith.constant dense<0.000000e+00> : vector<32x1200xf32>
    %24 = tpu.matmul %0, %23, %cst_18 {dimension_numbers = #tpu.dot_dimension_numbers<[1], [0], [0], [1], [0, 0, 1, 1], [], []>} : vector<32x27xbf16>, vector<27x1200xbf16>, vector<32x1200xf32> -> vector<32x1200xf32>
    %25 = vector.broadcast %1 : vector<32x1xf32> to vector<32x1200xf32>
    %26 = arith.mulf %24, %25 : vector<32x1200xf32>
    %27 = vector.broadcast %2 : vector<32x1xf32> to vector<32x1200xf32>
    %28 = arith.addf %26, %27 : vector<32x1200xf32>
    %cst_19 = arith.constant 0.000000e+00 : f32
    %29 = vector.broadcast %cst_19 : f32 to vector<32x1200xf32>
    %30 = arith.maximumf %28, %29 : vector<32x1200xf32>
    %31 = arith.maximumf %21, %30 : vector<32x1200xf32>
    %c0_20 = arith.constant 0 : index
    %c3 = arith.constant 3 : index
    %c0_21 = arith.constant 0 : index
    %c0_22 = arith.constant 0 : index
    %32 = vector.load %arg1[%c0_20, %c3, %c0_21, %c0_22] : memref<1x4x27x1200xbf16, #tpu.memory_space<vmem>>, vector<1x1x27x1200xbf16>
    %33 = vector.shape_cast %32 : vector<1x1x27x1200xbf16> to vector<27x1200xbf16>
    %cst_23 = arith.constant dense<0.000000e+00> : vector<32x1200xf32>
    %34 = tpu.matmul %0, %33, %cst_23 {dimension_numbers = #tpu.dot_dimension_numbers<[1], [0], [0], [1], [0, 0, 1, 1], [], []>} : vector<32x27xbf16>, vector<27x1200xbf16>, vector<32x1200xf32> -> vector<32x1200xf32>
    %35 = vector.broadcast %1 : vector<32x1xf32> to vector<32x1200xf32>
    %36 = arith.mulf %34, %35 : vector<32x1200xf32>
    %37 = vector.broadcast %2 : vector<32x1xf32> to vector<32x1200xf32>
    %38 = arith.addf %36, %37 : vector<32x1200xf32>
    %cst_24 = arith.constant 0.000000e+00 : f32
    %39 = vector.broadcast %cst_24 : f32 to vector<32x1200xf32>
    %40 = arith.maximumf %38, %39 : vector<32x1200xf32>
    %41 = arith.maximumf %31, %40 : vector<32x1200xf32>
    %42 = arith.truncf %41 : vector<32x1200xf32> to vector<32x1200xbf16>
    %c0_25 = arith.constant 0 : index
    %c0_26 = arith.constant 0 : index
    %c0_27 = arith.constant 0 : index
    %43 = vector.load %arg5[%c0_25, %c0_26, %c0_27] : memref<1x32x1200xbf16, #tpu.memory_space<vmem>>, vector<1x32x1200xbf16>
    %44 = vector.shape_cast %43 : vector<1x32x1200xbf16> to vector<32x1200xbf16>
    %45 = vector.shape_cast %42 : vector<32x1200xbf16> to vector<1x32x1200xbf16>
    tpu.vector_store %arg5[%c0_25, %c0_26, %c0_27], %45 {strides = array<i32>} : memref<1x32x1200xbf16, #tpu.memory_space<vmem>>, vector<1x32x1200xbf16>,
    return
  }
  func.func @transform_0(%arg0: i32) -> (i32, i32, i32, i32) {
    %c0_i32 = arith.constant 0 : i32
    %c0_i32_0 = arith.constant 0 : i32
    %c0_i32_1 = arith.constant 0 : i32
    %c0_i32_2 = arith.constant 0 : i32
    return %arg0, %c0_i32, %c0_i32_0, %c0_i32_1 : i32, i32, i32, i32
  }
  func.func @transform_1(%arg0: i32) -> (i32, i32) {
    %c0_i32 = arith.constant 0 : i32
    %c0_i32_0 = arith.constant 0 : i32
    %c0_i32_1 = arith.constant 0 : i32
    return %c0_i32, %c0_i32_0 : i32, i32
  }
  func.func @transform_2(%arg0: i32) -> (i32, i32) {
    %c0_i32 = arith.constant 0 : i32
    %c0_i32_0 = arith.constant 0 : i32
    %c0_i32_1 = arith.constant 0 : i32
    return %c0_i32, %c0_i32_0 : i32, i32
  }
  func.func @transform_3(%arg0: i32) -> (i32, i32) {
    %c0_i32 = arith.constant 0 : i32
    %c0_i32_0 = arith.constant 0 : i32
    %c0_i32_1 = arith.constant 0 : i32
    return %c0_i32, %c0_i32_0 : i32, i32
  }
  func.func @transform_4(%arg0: i32) -> (i32, i32, i32) {
    %c0_i32 = arith.constant 0 : i32
    %c0_i32_0 = arith.constant 0 : i32
    %c0_i32_1 = arith.constant 0 : i32
    return %arg0, %c0_i32, %c0_i32_0 : i32, i32, i32
  }
}

module attributes {stable_mosaic.version = 11 : i64} {
  func.func @conv_bn_relu_pool_kernel(%arg0: i32, %arg1: memref<1x4x288x300xbf16, #tpu.memory_space<vmem>>, %arg2: memref<64x288xbf16, #tpu.memory_space<vmem>>, %arg3: memref<64x1xf32, #tpu.memory_space<vmem>>, %arg4: memref<64x1xf32, #tpu.memory_space<vmem>>, %arg5: memref<1x64x300xbf16, #tpu.memory_space<vmem>>) attributes {dimension_semantics = [#tpu.dimension_semantics<parallel>], iteration_bounds = array<i64: 8>, scalar_prefetch = 0 : i64, scratch_operands = 0 : i64, tpu.core_type = #tpu.core_type<tc>, window_params = [{transform_indices = @transform_0, window_bounds = array<i64: 1, 4, 288, 300>}, {pipeline_mode = #tpu.pipeline_mode<synchronous>, transform_indices = @transform_1, window_bounds = array<i64: 64, 288>}, {pipeline_mode = #tpu.pipeline_mode<synchronous>, transform_indices = @transform_2, window_bounds = array<i64: 64, 1>}, {pipeline_mode = #tpu.pipeline_mode<synchronous>, transform_indices = @transform_3, window_bounds = array<i64: 64, 1>}, {transform_indices = @transform_4, window_bounds = array<i64: 1, 64, 300>}]} {
    %c0 = arith.constant 0 : index
    %c0_0 = arith.constant 0 : index
    %0 = vector.load %arg2[%c0, %c0_0] : memref<64x288xbf16, #tpu.memory_space<vmem>>, vector<64x288xbf16>
    %c0_1 = arith.constant 0 : index
    %c0_2 = arith.constant 0 : index
    %1 = vector.load %arg3[%c0_1, %c0_2] : memref<64x1xf32, #tpu.memory_space<vmem>>, vector<64x1xf32>
    %c0_3 = arith.constant 0 : index
    %c0_4 = arith.constant 0 : index
    %2 = vector.load %arg4[%c0_3, %c0_4] : memref<64x1xf32, #tpu.memory_space<vmem>>, vector<64x1xf32>
    %c0_5 = arith.constant 0 : index
    %c0_6 = arith.constant 0 : index
    %c0_7 = arith.constant 0 : index
    %c0_8 = arith.constant 0 : index
    %3 = vector.load %arg1[%c0_5, %c0_6, %c0_7, %c0_8] : memref<1x4x288x300xbf16, #tpu.memory_space<vmem>>, vector<1x1x288x300xbf16>
    %4 = vector.shape_cast %3 : vector<1x1x288x300xbf16> to vector<288x300xbf16>
    %cst = arith.constant dense<0.000000e+00> : vector<64x300xf32>
    %5 = tpu.matmul %0, %4, %cst {dimension_numbers = #tpu.dot_dimension_numbers<[1], [0], [0], [1], [0, 0, 1, 1], [], []>} : vector<64x288xbf16>, vector<288x300xbf16>, vector<64x300xf32> -> vector<64x300xf32>
    %6 = vector.broadcast %1 : vector<64x1xf32> to vector<64x300xf32>
    %7 = arith.mulf %5, %6 : vector<64x300xf32>
    %8 = vector.broadcast %2 : vector<64x1xf32> to vector<64x300xf32>
    %9 = arith.addf %7, %8 : vector<64x300xf32>
    %cst_9 = arith.constant 0.000000e+00 : f32
    %10 = vector.broadcast %cst_9 : f32 to vector<64x300xf32>
    %11 = arith.maximumf %9, %10 : vector<64x300xf32>
    %c0_10 = arith.constant 0 : index
    %c1 = arith.constant 1 : index
    %c0_11 = arith.constant 0 : index
    %c0_12 = arith.constant 0 : index
    %12 = vector.load %arg1[%c0_10, %c1, %c0_11, %c0_12] : memref<1x4x288x300xbf16, #tpu.memory_space<vmem>>, vector<1x1x288x300xbf16>
    %13 = vector.shape_cast %12 : vector<1x1x288x300xbf16> to vector<288x300xbf16>
    %cst_13 = arith.constant dense<0.000000e+00> : vector<64x300xf32>
    %14 = tpu.matmul %0, %13, %cst_13 {dimension_numbers = #tpu.dot_dimension_numbers<[1], [0], [0], [1], [0, 0, 1, 1], [], []>} : vector<64x288xbf16>, vector<288x300xbf16>, vector<64x300xf32> -> vector<64x300xf32>
    %15 = vector.broadcast %1 : vector<64x1xf32> to vector<64x300xf32>
    %16 = arith.mulf %14, %15 : vector<64x300xf32>
    %17 = vector.broadcast %2 : vector<64x1xf32> to vector<64x300xf32>
    %18 = arith.addf %16, %17 : vector<64x300xf32>
    %cst_14 = arith.constant 0.000000e+00 : f32
    %19 = vector.broadcast %cst_14 : f32 to vector<64x300xf32>
    %20 = arith.maximumf %18, %19 : vector<64x300xf32>
    %21 = arith.maximumf %11, %20 : vector<64x300xf32>
    %c0_15 = arith.constant 0 : index
    %c2 = arith.constant 2 : index
    %c0_16 = arith.constant 0 : index
    %c0_17 = arith.constant 0 : index
    %22 = vector.load %arg1[%c0_15, %c2, %c0_16, %c0_17] : memref<1x4x288x300xbf16, #tpu.memory_space<vmem>>, vector<1x1x288x300xbf16>
    %23 = vector.shape_cast %22 : vector<1x1x288x300xbf16> to vector<288x300xbf16>
    %cst_18 = arith.constant dense<0.000000e+00> : vector<64x300xf32>
    %24 = tpu.matmul %0, %23, %cst_18 {dimension_numbers = #tpu.dot_dimension_numbers<[1], [0], [0], [1], [0, 0, 1, 1], [], []>} : vector<64x288xbf16>, vector<288x300xbf16>, vector<64x300xf32> -> vector<64x300xf32>
    %25 = vector.broadcast %1 : vector<64x1xf32> to vector<64x300xf32>
    %26 = arith.mulf %24, %25 : vector<64x300xf32>
    %27 = vector.broadcast %2 : vector<64x1xf32> to vector<64x300xf32>
    %28 = arith.addf %26, %27 : vector<64x300xf32>
    %cst_19 = arith.constant 0.000000e+00 : f32
    %29 = vector.broadcast %cst_19 : f32 to vector<64x300xf32>
    %30 = arith.maximumf %28, %29 : vector<64x300xf32>
    %31 = arith.maximumf %21, %30 : vector<64x300xf32>
    %c0_20 = arith.constant 0 : index
    %c3 = arith.constant 3 : index
    %c0_21 = arith.constant 0 : index
    %c0_22 = arith.constant 0 : index
    %32 = vector.load %arg1[%c0_20, %c3, %c0_21, %c0_22] : memref<1x4x288x300xbf16, #tpu.memory_space<vmem>>, vector<1x1x288x300xbf16>
    %33 = vector.shape_cast %32 : vector<1x1x288x300xbf16> to vector<288x300xbf16>
    %cst_23 = arith.constant dense<0.000000e+00> : vector<64x300xf32>
    %34 = tpu.matmul %0, %33, %cst_23 {dimension_numbers = #tpu.dot_dimension_numbers<[1], [0], [0], [1], [0, 0, 1, 1], [], []>} : vector<64x288xbf16>, vector<288x300xbf16>, vector<64x300xf32> -> vector<64x300xf32>
    %35 = vector.broadcast %1 : vector<64x1xf32> to vector<64x300xf32>
    %36 = arith.mulf %34, %35 : vector<64x300xf32>
    %37 = vector.broadcast %2 : vector<64x1xf32> to vector<64x300xf32>
    %38 = arith.addf %36, %37 : vector<64x300xf32>
    %cst_24 = arith.constant 0.000000e+00 : f32
    %39 = vector.broadcast %cst_24 : f32 to vector<64x300xf32>
    %40 = arith.maximumf %38, %39 : vector<64x300xf32>
    %41 = arith.maximumf %31, %40 : vector<64x300xf32>
    %42 = arith.truncf %41 : vector<64x300xf32> to vector<64x300xbf16>
    %c0_25 = arith.constant 0 : index
    %c0_26 = arith.constant 0 : index
    %c0_27 = arith.constant 0 : index
    %43 = vector.load %arg5[%c0_25, %c0_26, %c0_27] : memref<1x64x300xbf16, #tpu.memory_space<vmem>>, vector<1x64x300xbf16>
    %44 = vector.shape_cast %43 : vector<1x64x300xbf16> to vector<64x300xbf16>
    %45 = vector.shape_cast %42 : vector<64x300xbf16> to vector<1x64x300xbf16>
    tpu.vector_store %arg5[%c0_25, %c0_26, %c0_27], %45 {strides = array<i32>} : memref<1x64x300xbf16, #tpu.memory_space<vmem>>, vector<1x64x300xbf16>,
    return
  }
  func.func @transform_0(%arg0: i32) -> (i32, i32, i32, i32) {
    %c0_i32 = arith.constant 0 : i32
    %c0_i32_0 = arith.constant 0 : i32
    %c0_i32_1 = arith.constant 0 : i32
    %c0_i32_2 = arith.constant 0 : i32
    return %arg0, %c0_i32, %c0_i32_0, %c0_i32_1 : i32, i32, i32, i32
  }
  func.func @transform_1(%arg0: i32) -> (i32, i32) {
    %c0_i32 = arith.constant 0 : i32
    %c0_i32_0 = arith.constant 0 : i32
    %c0_i32_1 = arith.constant 0 : i32
    return %c0_i32, %c0_i32_0 : i32, i32
  }
  func.func @transform_2(%arg0: i32) -> (i32, i32) {
    %c0_i32 = arith.constant 0 : i32
    %c0_i32_0 = arith.constant 0 : i32
    %c0_i32_1 = arith.constant 0 : i32
    return %c0_i32, %c0_i32_0 : i32, i32
  }
  func.func @transform_3(%arg0: i32) -> (i32, i32) {
    %c0_i32 = arith.constant 0 : i32
    %c0_i32_0 = arith.constant 0 : i32
    %c0_i32_1 = arith.constant 0 : i32
    return %c0_i32, %c0_i32_0 : i32, i32
  }
  func.func @transform_4(%arg0: i32) -> (i32, i32, i32) {
    %c0_i32 = arith.constant 0 : i32
    %c0_i32_0 = arith.constant 0 : i32
    %c0_i32_1 = arith.constant 0 : i32
    return %arg0, %c0_i32, %c0_i32_0 : i32, i32, i32
  }
}

module attributes {stable_mosaic.version = 11 : i64} {
  func.func @matmul_bias_kernel(%arg0: i32, %arg1: i32, %arg2: memref<8x3840xbf16, #tpu.memory_space<vmem>>, %arg3: memref<3840x128xbf16, #tpu.memory_space<vmem>>, %arg4: memref<1x128xf32, #tpu.memory_space<vmem>>, %arg5: memref<8x128xf32, #tpu.memory_space<vmem>>, %arg6: memref<8x128xf32, #tpu.memory_space<vmem>>) attributes {dimension_semantics = [#tpu.dimension_semantics<parallel>, #tpu.dimension_semantics<arbitrary>], iteration_bounds = array<i64: 1, 5>, scalar_prefetch = 0 : i64, scratch_operands = 1 : i64, tpu.core_type = #tpu.core_type<tc>, window_params = [{transform_indices = @transform_0, window_bounds = array<i64: 8, 3840>}, {transform_indices = @transform_1, window_bounds = array<i64: 3840, 128>}, {pipeline_mode = #tpu.pipeline_mode<synchronous>, transform_indices = @transform_2, window_bounds = array<i64: 1, 128>}, {transform_indices = @transform_3, window_bounds = array<i64: 8, 128>}]} {
    %c0_i32 = arith.constant 0 : i32
    %0 = arith.cmpi eq, %arg1, %c0_i32 : i32
    %1 = arith.extui %0 : i1 to i32
    %c0_i32_0 = arith.constant 0 : i32
    %2 = arith.cmpi ne, %1, %c0_i32_0 : i32
    scf.if %2 {
      %cst_9 = arith.constant 0.000000e+00 : f32
      %12 = vector.broadcast %cst_9 : f32 to vector<8x128xf32>
      %c0_10 = arith.constant 0 : index
      %c0_11 = arith.constant 0 : index
      %13 = vector.load %arg6[%c0_10, %c0_11] : memref<8x128xf32, #tpu.memory_space<vmem>>, vector<8x128xf32>
      tpu.vector_store %arg6[%c0_10, %c0_11], %12 {strides = array<i32>} : memref<8x128xf32, #tpu.memory_space<vmem>>, vector<8x128xf32>,
    } else {
    }
    %c0 = arith.constant 0 : index
    %c0_1 = arith.constant 0 : index
    %3 = vector.load %arg6[%c0, %c0_1] : memref<8x128xf32, #tpu.memory_space<vmem>>, vector<8x128xf32>
    %c0_2 = arith.constant 0 : index
    %c0_3 = arith.constant 0 : index
    %4 = vector.load %arg2[%c0_2, %c0_3] : memref<8x3840xbf16, #tpu.memory_space<vmem>>, vector<8x3840xbf16>
    %c0_4 = arith.constant 0 : index
    %c0_5 = arith.constant 0 : index
    %5 = vector.load %arg3[%c0_4, %c0_5] : memref<3840x128xbf16, #tpu.memory_space<vmem>>, vector<3840x128xbf16>
    %cst = arith.constant dense<0.000000e+00> : vector<8x128xf32>
    %6 = tpu.matmul %4, %5, %cst {dimension_numbers = #tpu.dot_dimension_numbers<[1], [0], [0], [1], [0, 0, 1, 1], [], []>} : vector<8x3840xbf16>, vector<3840x128xbf16>, vector<8x128xf32> -> vector<8x128xf32>
    %7 = arith.addf %3, %6 : vector<8x128xf32>
    %c0_6 = arith.constant 0 : index
    %c0_7 = arith.constant 0 : index
    %8 = vector.load %arg6[%c0_6, %c0_7] : memref<8x128xf32, #tpu.memory_space<vmem>>, vector<8x128xf32>
    tpu.vector_store %arg6[%c0_6, %c0_7], %7 {strides = array<i32>} : memref<8x128xf32, #tpu.memory_space<vmem>>, vector<8x128xf32>,
    %c4_i32 = arith.constant 4 : i32
    %9 = arith.cmpi eq, %arg1, %c4_i32 : i32
    %10 = arith.extui %9 : i1 to i32
    %c0_i32_8 = arith.constant 0 : i32
    %11 = arith.cmpi ne, %10, %c0_i32_8 : i32
    scf.if %11 {
      %c0_9 = arith.constant 0 : index
      %c0_10 = arith.constant 0 : index
      %12 = vector.load %arg6[%c0_9, %c0_10] : memref<8x128xf32, #tpu.memory_space<vmem>>, vector<8x128xf32>
      %c0_11 = arith.constant 0 : index
      %c0_12 = arith.constant 0 : index
      %13 = vector.load %arg4[%c0_11, %c0_12] : memref<1x128xf32, #tpu.memory_space<vmem>>, vector<1x128xf32>
      %14 = vector.broadcast %13 : vector<1x128xf32> to vector<8x128xf32>
      %15 = arith.addf %12, %14 : vector<8x128xf32>
      %c0_13 = arith.constant 0 : index
      %c0_14 = arith.constant 0 : index
      %16 = vector.load %arg5[%c0_13, %c0_14] : memref<8x128xf32, #tpu.memory_space<vmem>>, vector<8x128xf32>
      tpu.vector_store %arg5[%c0_13, %c0_14], %15 {strides = array<i32>} : memref<8x128xf32, #tpu.memory_space<vmem>>, vector<8x128xf32>,
    } else {
    }
    return
  }
  func.func @transform_0(%arg0: i32, %arg1: i32) -> (i32, i32) {
    %c0_i32 = arith.constant 0 : i32
    return %arg0, %arg1 : i32, i32
  }
  func.func @transform_1(%arg0: i32, %arg1: i32) -> (i32, i32) {
    %c0_i32 = arith.constant 0 : i32
    %c0_i32_0 = arith.constant 0 : i32
    return %arg1, %c0_i32 : i32, i32
  }
  func.func @transform_2(%arg0: i32, %arg1: i32) -> (i32, i32) {
    %c0_i32 = arith.constant 0 : i32
    %c0_i32_0 = arith.constant 0 : i32
    %c0_i32_1 = arith.constant 0 : i32
    return %c0_i32, %c0_i32_0 : i32, i32
  }
  func.func @transform_3(%arg0: i32, %arg1: i32) -> (i32, i32) {
    %c0_i32 = arith.constant 0 : i32
    %c0_i32_0 = arith.constant 0 : i32
    return %arg0, %c0_i32 : i32, i32
  }
}

module attributes {stable_mosaic.version = 11 : i64} {
  func.func @lstm_seq_gx_kernel(%arg0: i32, %arg1: memref<1x2x128xf32, #tpu.memory_space<vmem>>, %arg2: memref<32x128xf32, #tpu.memory_space<vmem>>, %arg3: memref<1x2x32xbf16, #tpu.memory_space<vmem>>, %arg4: memref<2x32xf32, #tpu.memory_space<vmem>>, %arg5: memref<2x32xf32, #tpu.memory_space<vmem>>) attributes {dimension_semantics = [#tpu.dimension_semantics<arbitrary>], iteration_bounds = array<i64: 4>, scalar_prefetch = 0 : i64, scratch_operands = 2 : i64, tpu.core_type = #tpu.core_type<tc>, window_params = [{transform_indices = @transform_0, window_bounds = array<i64: 1, 2, 128>}, {pipeline_mode = #tpu.pipeline_mode<synchronous>, transform_indices = @transform_1, window_bounds = array<i64: 32, 128>}, {transform_indices = @transform_2, window_bounds = array<i64: 1, 2, 32>}]} {
    %c0_i32 = arith.constant 0 : i32
    %0 = arith.cmpi eq, %arg0, %c0_i32 : i32
    %1 = arith.extui %0 : i1 to i32
    %c0_i32_0 = arith.constant 0 : i32
    %2 = arith.cmpi ne, %1, %c0_i32_0 : i32
    scf.if %2 {
      %cst_17 = arith.constant 0.000000e+00 : f32
      %31 = vector.broadcast %cst_17 : f32 to vector<2x32xf32>
      %c0_18 = arith.constant 0 : index
      %c0_19 = arith.constant 0 : index
      %32 = vector.load %arg4[%c0_18, %c0_19] : memref<2x32xf32, #tpu.memory_space<vmem>>, vector<2x32xf32>
      tpu.vector_store %arg4[%c0_18, %c0_19], %31 {strides = array<i32>} : memref<2x32xf32, #tpu.memory_space<vmem>>, vector<2x32xf32>,
      %cst_20 = arith.constant 0.000000e+00 : f32
      %33 = vector.broadcast %cst_20 : f32 to vector<2x32xf32>
      %c0_21 = arith.constant 0 : index
      %c0_22 = arith.constant 0 : index
      %34 = vector.load %arg5[%c0_21, %c0_22] : memref<2x32xf32, #tpu.memory_space<vmem>>, vector<2x32xf32>
      tpu.vector_store %arg5[%c0_21, %c0_22], %33 {strides = array<i32>} : memref<2x32xf32, #tpu.memory_space<vmem>>, vector<2x32xf32>,
    } else {
    }
    %c0 = arith.constant 0 : index
    %c0_1 = arith.constant 0 : index
    %c0_2 = arith.constant 0 : index
    %3 = vector.load %arg1[%c0, %c0_1, %c0_2] : memref<1x2x128xf32, #tpu.memory_space<vmem>>, vector<1x2x128xf32>
    %4 = vector.shape_cast %3 : vector<1x2x128xf32> to vector<2x128xf32>
    %c0_3 = arith.constant 0 : index
    %c0_4 = arith.constant 0 : index
    %5 = vector.load %arg4[%c0_3, %c0_4] : memref<2x32xf32, #tpu.memory_space<vmem>>, vector<2x32xf32>
    %c0_5 = arith.constant 0 : index
    %c0_6 = arith.constant 0 : index
    %6 = vector.load %arg2[%c0_5, %c0_6] : memref<32x128xf32, #tpu.memory_space<vmem>>, vector<32x128xf32>
    %cst = arith.constant dense<0.000000e+00> : vector<2x128xf32>
    %7 = tpu.matmul %5, %6, %cst {dimension_numbers = #tpu.dot_dimension_numbers<[1], [0], [0], [1], [0, 0, 1, 1], [], []>} : vector<2x32xf32>, vector<32x128xf32>, vector<2x128xf32> -> vector<2x128xf32>
    %8 = arith.addf %4, %7 : vector<2x128xf32>
    %c0_7 = arith.constant 0 : index
    %c0_8 = arith.constant 0 : index
    %9 = vector.load %arg5[%c0_7, %c0_8] : memref<2x32xf32, #tpu.memory_space<vmem>>, vector<2x32xf32>
    %10 = arith.negf %8 : vector<2x128xf32>
    %11 = math.exp %10 : vector<2x128xf32>
    %cst_9 = arith.constant 1.000000e+00 : f32
    %12 = vector.broadcast %cst_9 : f32 to vector<2x128xf32>
    %13 = arith.addf %12, %11 : vector<2x128xf32>
    %14 = arith.divf %12, %13 : vector<2x128xf32>
    %15 = math.tanh %8 : vector<2x128xf32>
    %16 = vector.extract_strided_slice %14 {offsets = [0, 0], sizes = [2, 32], strides = [1, 1]} : vector<2x128xf32> to vector<2x32xf32>
    %17 = vector.extract_strided_slice %14 {offsets = [0, 32], sizes = [2, 32], strides = [1, 1]} : vector<2x128xf32> to vector<2x32xf32>
    %18 = vector.extract_strided_slice %15 {offsets = [0, 64], sizes = [2, 32], strides = [1, 1]} : vector<2x128xf32> to vector<2x32xf32>
    %19 = vector.extract_strided_slice %14 {offsets = [0, 96], sizes = [2, 32], strides = [1, 1]} : vector<2x128xf32> to vector<2x32xf32>
    %20 = arith.mulf %17, %9 : vector<2x32xf32>
    %21 = arith.mulf %16, %18 : vector<2x32xf32>
    %22 = arith.addf %20, %21 : vector<2x32xf32>
    %23 = math.tanh %22 : vector<2x32xf32>
    %24 = arith.mulf %19, %23 : vector<2x32xf32>
    %c0_10 = arith.constant 0 : index
    %c0_11 = arith.constant 0 : index
    %25 = vector.load %arg4[%c0_10, %c0_11] : memref<2x32xf32, #tpu.memory_space<vmem>>, vector<2x32xf32>
    tpu.vector_store %arg4[%c0_10, %c0_11], %24 {strides = array<i32>} : memref<2x32xf32, #tpu.memory_space<vmem>>, vector<2x32xf32>,
    %c0_12 = arith.constant 0 : index
    %c0_13 = arith.constant 0 : index
    %26 = vector.load %arg5[%c0_12, %c0_13] : memref<2x32xf32, #tpu.memory_space<vmem>>, vector<2x32xf32>
    tpu.vector_store %arg5[%c0_12, %c0_13], %22 {strides = array<i32>} : memref<2x32xf32, #tpu.memory_space<vmem>>, vector<2x32xf32>,
    %27 = arith.truncf %24 : vector<2x32xf32> to vector<2x32xbf16>
    %c0_14 = arith.constant 0 : index
    %c0_15 = arith.constant 0 : index
    %c0_16 = arith.constant 0 : index
    %28 = vector.load %arg3[%c0_14, %c0_15, %c0_16] : memref<1x2x32xbf16, #tpu.memory_space<vmem>>, vector<1x2x32xbf16>
    %29 = vector.shape_cast %28 : vector<1x2x32xbf16> to vector<2x32xbf16>
    %30 = vector.shape_cast %27 : vector<2x32xbf16> to vector<1x2x32xbf16>
    tpu.vector_store %arg3[%c0_14, %c0_15, %c0_16], %30 {strides = array<i32>} : memref<1x2x32xbf16, #tpu.memory_space<vmem>>, vector<1x2x32xbf16>,
    return
  }
  func.func @transform_0(%arg0: i32) -> (i32, i32, i32) {
    %c0_i32 = arith.constant 0 : i32
    %c0_i32_0 = arith.constant 0 : i32
    %c0_i32_1 = arith.constant 0 : i32
    return %arg0, %c0_i32, %c0_i32_0 : i32, i32, i32
  }
  func.func @transform_1(%arg0: i32) -> (i32, i32) {
    %c0_i32 = arith.constant 0 : i32
    %c0_i32_0 = arith.constant 0 : i32
    %c0_i32_1 = arith.constant 0 : i32
    return %c0_i32, %c0_i32_0 : i32, i32
  }
  func.func @transform_2(%arg0: i32) -> (i32, i32, i32) {
    %c0_i32 = arith.constant 0 : i32
    %c0_i32_0 = arith.constant 0 : i32
    %c0_i32_1 = arith.constant 0 : i32
    return %arg0, %c0_i32, %c0_i32_0 : i32, i32, i32
  }
}

module attributes {stable_mosaic.version = 11 : i64} {
  func.func @lstm_fc_h_kernel(%arg0: i32, %arg1: memref<1x2x32xbf16, #tpu.memory_space<vmem>>, %arg2: memref<32x128xbf16, #tpu.memory_space<vmem>>, %arg3: memref<32x128xf32, #tpu.memory_space<vmem>>, %arg4: memref<1x128xf32, #tpu.memory_space<vmem>>, %arg5: memref<32x5xf32, #tpu.memory_space<vmem>>, %arg6: memref<1x5xf32, #tpu.memory_space<vmem>>, %arg7: memref<2x5xf32, #tpu.memory_space<vmem>>, %arg8: memref<2x32xf32, #tpu.memory_space<vmem>>, %arg9: memref<2x32xf32, #tpu.memory_space<vmem>>) attributes {dimension_semantics = [#tpu.dimension_semantics<arbitrary>], iteration_bounds = array<i64: 4>, scalar_prefetch = 0 : i64, scratch_operands = 2 : i64, tpu.core_type = #tpu.core_type<tc>, window_params = [{transform_indices = @transform_0, window_bounds = array<i64: 1, 2, 32>}, {pipeline_mode = #tpu.pipeline_mode<synchronous>, transform_indices = @transform_1, window_bounds = array<i64: 32, 128>}, {pipeline_mode = #tpu.pipeline_mode<synchronous>, transform_indices = @transform_2, window_bounds = array<i64: 32, 128>}, {pipeline_mode = #tpu.pipeline_mode<synchronous>, transform_indices = @transform_3, window_bounds = array<i64: 1, 128>}, {pipeline_mode = #tpu.pipeline_mode<synchronous>, transform_indices = @transform_4, window_bounds = array<i64: 32, 5>}, {pipeline_mode = #tpu.pipeline_mode<synchronous>, transform_indices = @transform_5, window_bounds = array<i64: 1, 5>}, {pipeline_mode = #tpu.pipeline_mode<synchronous>, transform_indices = @transform_6, window_bounds = array<i64: 2, 5>}]} {
    %c0_i32 = arith.constant 0 : i32
    %0 = arith.cmpi eq, %arg0, %c0_i32 : i32
    %1 = arith.extui %0 : i1 to i32
    %c0_i32_0 = arith.constant 0 : i32
    %2 = arith.cmpi ne, %1, %c0_i32_0 : i32
    scf.if %2 {
      %cst_20 = arith.constant 0.000000e+00 : f32
      %35 = vector.broadcast %cst_20 : f32 to vector<2x32xf32>
      %c0_21 = arith.constant 0 : index
      %c0_22 = arith.constant 0 : index
      %36 = vector.load %arg8[%c0_21, %c0_22] : memref<2x32xf32, #tpu.memory_space<vmem>>, vector<2x32xf32>
      tpu.vector_store %arg8[%c0_21, %c0_22], %35 {strides = array<i32>} : memref<2x32xf32, #tpu.memory_space<vmem>>, vector<2x32xf32>,
      %cst_23 = arith.constant 0.000000e+00 : f32
      %37 = vector.broadcast %cst_23 : f32 to vector<2x32xf32>
      %c0_24 = arith.constant 0 : index
      %c0_25 = arith.constant 0 : index
      %38 = vector.load %arg9[%c0_24, %c0_25] : memref<2x32xf32, #tpu.memory_space<vmem>>, vector<2x32xf32>
      tpu.vector_store %arg9[%c0_24, %c0_25], %37 {strides = array<i32>} : memref<2x32xf32, #tpu.memory_space<vmem>>, vector<2x32xf32>,
    } else {
    }
    %c0 = arith.constant 0 : index
    %c0_1 = arith.constant 0 : index
    %c0_2 = arith.constant 0 : index
    %3 = vector.load %arg1[%c0, %c0_1, %c0_2] : memref<1x2x32xbf16, #tpu.memory_space<vmem>>, vector<1x2x32xbf16>
    %4 = vector.shape_cast %3 : vector<1x2x32xbf16> to vector<2x32xbf16>
    %c0_3 = arith.constant 0 : index
    %c0_4 = arith.constant 0 : index
    %5 = vector.load %arg2[%c0_3, %c0_4] : memref<32x128xbf16, #tpu.memory_space<vmem>>, vector<32x128xbf16>
    %cst = arith.constant dense<0.000000e+00> : vector<2x128xf32>
    %6 = tpu.matmul %4, %5, %cst {dimension_numbers = #tpu.dot_dimension_numbers<[1], [0], [0], [1], [0, 0, 1, 1], [], []>} : vector<2x32xbf16>, vector<32x128xbf16>, vector<2x128xf32> -> vector<2x128xf32>
    %c0_5 = arith.constant 0 : index
    %c0_6 = arith.constant 0 : index
    %7 = vector.load %arg8[%c0_5, %c0_6] : memref<2x32xf32, #tpu.memory_space<vmem>>, vector<2x32xf32>
    %c0_7 = arith.constant 0 : index
    %c0_8 = arith.constant 0 : index
    %8 = vector.load %arg3[%c0_7, %c0_8] : memref<32x128xf32, #tpu.memory_space<vmem>>, vector<32x128xf32>
    %cst_9 = arith.constant dense<0.000000e+00> : vector<2x128xf32>
    %9 = tpu.matmul %7, %8, %cst_9 {dimension_numbers = #tpu.dot_dimension_numbers<[1], [0], [0], [1], [0, 0, 1, 1], [], []>} : vector<2x32xf32>, vector<32x128xf32>, vector<2x128xf32> -> vector<2x128xf32>
    %10 = arith.addf %6, %9 : vector<2x128xf32>
    %c0_10 = arith.constant 0 : index
    %c0_11 = arith.constant 0 : index
    %11 = vector.load %arg4[%c0_10, %c0_11] : memref<1x128xf32, #tpu.memory_space<vmem>>, vector<1x128xf32>
    %12 = vector.broadcast %11 : vector<1x128xf32> to vector<2x128xf32>
    %13 = arith.addf %10, %12 : vector<2x128xf32>
    %c0_12 = arith.constant 0 : index
    %c0_13 = arith.constant 0 : index
    %14 = vector.load %arg9[%c0_12, %c0_13] : memref<2x32xf32, #tpu.memory_space<vmem>>, vector<2x32xf32>
    %15 = arith.negf %13 : vector<2x128xf32>
    %16 = math.exp %15 : vector<2x128xf32>
    %cst_14 = arith.constant 1.000000e+00 : f32
    %17 = vector.broadcast %cst_14 : f32 to vector<2x128xf32>
    %18 = arith.addf %17, %16 : vector<2x128xf32>
    %19 = arith.divf %17, %18 : vector<2x128xf32>
    %20 = math.tanh %13 : vector<2x128xf32>
    %21 = vector.extract_strided_slice %19 {offsets = [0, 0], sizes = [2, 32], strides = [1, 1]} : vector<2x128xf32> to vector<2x32xf32>
    %22 = vector.extract_strided_slice %19 {offsets = [0, 32], sizes = [2, 32], strides = [1, 1]} : vector<2x128xf32> to vector<2x32xf32>
    %23 = vector.extract_strided_slice %20 {offsets = [0, 64], sizes = [2, 32], strides = [1, 1]} : vector<2x128xf32> to vector<2x32xf32>
    %24 = vector.extract_strided_slice %19 {offsets = [0, 96], sizes = [2, 32], strides = [1, 1]} : vector<2x128xf32> to vector<2x32xf32>
    %25 = arith.mulf %22, %14 : vector<2x32xf32>
    %26 = arith.mulf %21, %23 : vector<2x32xf32>
    %27 = arith.addf %25, %26 : vector<2x32xf32>
    %28 = math.tanh %27 : vector<2x32xf32>
    %29 = arith.mulf %24, %28 : vector<2x32xf32>
    %c0_15 = arith.constant 0 : index
    %c0_16 = arith.constant 0 : index
    %30 = vector.load %arg8[%c0_15, %c0_16] : memref<2x32xf32, #tpu.memory_space<vmem>>, vector<2x32xf32>
    tpu.vector_store %arg8[%c0_15, %c0_16], %29 {strides = array<i32>} : memref<2x32xf32, #tpu.memory_space<vmem>>, vector<2x32xf32>,
    %c0_17 = arith.constant 0 : index
    %c0_18 = arith.constant 0 : index
    %31 = vector.load %arg9[%c0_17, %c0_18] : memref<2x32xf32, #tpu.memory_space<vmem>>, vector<2x32xf32>
    tpu.vector_store %arg9[%c0_17, %c0_18], %27 {strides = array<i32>} : memref<2x32xf32, #tpu.memory_space<vmem>>, vector<2x32xf32>,
    %c3_i32 = arith.constant 3 : i32
    %32 = arith.cmpi eq, %arg0, %c3_i32 : i32
    %33 = arith.extui %32 : i1 to i32
    %c0_i32_19 = arith.constant 0 : i32
    %34 = arith.cmpi ne, %33, %c0_i32_19 : i32
    scf.if %34 {
      %c0_20 = arith.constant 0 : index
      %c0_21 = arith.constant 0 : index
      %35 = vector.load %arg5[%c0_20, %c0_21] : memref<32x5xf32, #tpu.memory_space<vmem>>, vector<32x5xf32>
      %cst_22 = arith.constant dense<0.000000e+00> : vector<2x5xf32>
      %36 = tpu.matmul %29, %35, %cst_22 {dimension_numbers = #tpu.dot_dimension_numbers<[1], [0], [0], [1], [0, 0, 1, 1], [], []>} : vector<2x32xf32>, vector<32x5xf32>, vector<2x5xf32> -> vector<2x5xf32>
      %c0_23 = arith.constant 0 : index
      %c0_24 = arith.constant 0 : index
      %37 = vector.load %arg6[%c0_23, %c0_24] : memref<1x5xf32, #tpu.memory_space<vmem>>, vector<1x5xf32>
      %38 = vector.broadcast %37 : vector<1x5xf32> to vector<2x5xf32>
      %39 = arith.addf %36, %38 : vector<2x5xf32>
      %c0_25 = arith.constant 0 : index
      %c0_26 = arith.constant 0 : index
      %40 = vector.load %arg7[%c0_25, %c0_26] : memref<2x5xf32, #tpu.memory_space<vmem>>, vector<2x5xf32>
      tpu.vector_store %arg7[%c0_25, %c0_26], %39 {strides = array<i32>} : memref<2x5xf32, #tpu.memory_space<vmem>>, vector<2x5xf32>,
    } else {
    }
    return
  }
  func.func @transform_0(%arg0: i32) -> (i32, i32, i32) {
    %c0_i32 = arith.constant 0 : i32
    %c0_i32_0 = arith.constant 0 : i32
    %c0_i32_1 = arith.constant 0 : i32
    return %arg0, %c0_i32, %c0_i32_0 : i32, i32, i32
  }
  func.func @transform_1(%arg0: i32) -> (i32, i32) {
    %c0_i32 = arith.constant 0 : i32
    %c0_i32_0 = arith.constant 0 : i32
    %c0_i32_1 = arith.constant 0 : i32
    return %c0_i32, %c0_i32_0 : i32, i32
  }
  func.func @transform_2(%arg0: i32) -> (i32, i32) {
    %c0_i32 = arith.constant 0 : i32
    %c0_i32_0 = arith.constant 0 : i32
    %c0_i32_1 = arith.constant 0 : i32
    return %c0_i32, %c0_i32_0 : i32, i32
  }
  func.func @transform_3(%arg0: i32) -> (i32, i32) {
    %c0_i32 = arith.constant 0 : i32
    %c0_i32_0 = arith.constant 0 : i32
    %c0_i32_1 = arith.constant 0 : i32
    return %c0_i32, %c0_i32_0 : i32, i32
  }
  func.func @transform_4(%arg0: i32) -> (i32, i32) {
    %c0_i32 = arith.constant 0 : i32
    %c0_i32_0 = arith.constant 0 : i32
    %c0_i32_1 = arith.constant 0 : i32
    return %c0_i32, %c0_i32_0 : i32, i32
  }
  func.func @transform_5(%arg0: i32) -> (i32, i32) {
    %c0_i32 = arith.constant 0 : i32
    %c0_i32_0 = arith.constant 0 : i32
    %c0_i32_1 = arith.constant 0 : i32
    return %c0_i32, %c0_i32_0 : i32, i32
  }
  func.func @transform_6(%arg0: i32) -> (i32, i32) {
    %c0_i32 = arith.constant 0 : i32
    %c0_i32_0 = arith.constant 0 : i32
    %c0_i32_1 = arith.constant 0 : i32
    return %c0_i32, %c0_i32_0 : i32, i32
  }
}

</mosaic_0001>

<bundles_post_ra>
// kernel: forward.5
= control target key start
LH: loop header
LB: loop body
LE: loop exit
PB: predicated region body
PF: predicated region fallthrough
CT: control target
= control target key end

     0   :  { %s3095_s15 = smov 0   ;;  %s4328_s0 = inlined_call_operand.vmem [shape: bf16[8,4,27,1200], index: 0, kind: input, shape index: {}]   ;;  %s4329_s1 = inlined_call_operand.vmem [shape: bf16[32,27], index: 1, kind: input, shape index: {}]   ;;  %s4330_s2 = inlined_call_operand.vmem [shape: f32[32,1], index: 2, kind: input, shape index: {}]   ;;  %s4331_s3 = inlined_call_operand.vmem [shape: f32[32,1], index: 3, kind: input, shape index: {}]   ;;  %s4332_s4 = inlined_call_operand.vmem [shape: bf16[8,32,1200], index: 4, kind: output, shape index: {}]  }
   0x1 LB: > { %s2693_s16 = sadd.s32 4294967295, %s3066_s15   ;;  %p2697_p0 = scmp.ge.s32.totalorder %s3066_s15, 1  ;;  %s3066_s15 = sphi %s3095_s15, %s14_s15  }
   0x2   : > { %p162_p1 = scmp.lt.s32.totalorder %s3066_s15, 9 }
   0x4   : > { %p163_p2 = pnand %p2697_p0, %p162_p1 }
   0x6   : > { %166 = sbr.rel (%p163_p2) target bundleno = 422 (0x1a6), region = 36 }
   0xd   : > { %p188_p3 = scmp.lt.s32.totalorder %s2693_s16, 7  ;;  %v3068_v0 = vmov 0   ;;  %vm338_vm0 = vcmask 1044480   ;;  %v203_v1 = vld [vmem:[%s4330_s2] sm:$0xff]  ;;  %v205_v2 = vld [vmem:[%s4330_s2 + $0x10] sm:$0xff]  ;;  %v204_v3 = vld [vmem:[%s4330_s2 + $0x8] sm:$0xff] }
   0xe   : > { %404 = vmatprep.mubr.bf16.mxu0 %v3068_v0  ;;  %457 = vmatprep.mubr.bf16.mxu1 %v3068_v0  ;;  %v206_v4 = vld [vmem:[%s4330_s2 + $0x18] sm:$0xff]  ;;  %vm339_vm1 = vcmask 1045504   ;;  %v3069_v5 = vmov 65535   ;;  %v207_v8 = vld [vmem:[%s4331_s3] sm:$0xff]  ;;  %v208_v9 = vld [vmem:[%s4331_s3 + $0x8] sm:$0xff]  ;;  %vm331_vm2 = vcmask 220160  }
   0xf   : > { %s4389_s16 = smov (!%p188_p3, %s2693_s16), 7  ;;  %2936 = vset.pattern.permute.xlu0 %v3068_v0  ;;  %2937 = vset.pattern.permute.xlu1 %v3068_v0  ;;  %v340_v6 = vsel %vm338_vm0, 4294967295, %v3069_v5  ;;  %v3148_v20 = vld [vmem:[%s4329_s1] sm:$0xff]   ;;  %v209_v22 = vld [vmem:[%s4331_s3 + $0x10] sm:$0xff]  ;;  %v210_v23 = vld [vmem:[%s4331_s3 + $0x18] sm:$0xff]  ;;  %vm2619_vm3 = vcmask 1043456  }
  0x10   : > { %s2924_s21 = smul.u32 640, %s4389_s16  ;;  %639 = vperm.xlu0 %2936, %v203_v1   ;;  %649 = vperm.xlu1 %2937, %v205_v2   ;;  %v3137_v13 = vsel %vm339_vm1, %v340_v6, 0  ;;  %v3181_v39 = vld [vmem:[%s4329_s1 + $0x8] sm:$0xff]   ;;  %vm2620_vm4 = vcmask 392196  }
  0x11   : > { %s2925_s17 = smul.u32 160, %s4389_s16  ;;  %vm4279_vm5 = vmor %vm2620_vm4, %vm2619_vm3 }
  0x12   : > { %s3125_s28 = scalar_lea.vmem %s4328_s0, %s2924_s21 }
  0x13   : > { %v2938_v7 = vld [vmem:[%s3125_s28 + $0x4] ss:$40 sps:$4 sm:$0xff]   ;;  %v2942_v11 = vld [vmem:[%s3125_s28] ss:$40 sps:$4 sm:$0xff]   ;;  %v2953_v21 = vld [vmem:[%s3125_s28 + $0x14] ss:$40 sps:$4 sm:$0xff]   ;;  %s4153_s19 = scalar_lea.vmem %s4332_s4, %s2925_s17 }
  0x14   : > { %v2940_v10 = vld [vmem:[%s3125_s28 + $0xc] ss:$40 sps:$4 sm:$0xff]   ;;  %644 = vperm.xlu0 %2936, %v204_v3   ;;  %654 = vperm.xlu1 %2937, %v206_v4   ;;  %v2943_v12 = vld [vmem:[%s3125_s28 + $0x8] ss:$40 sps:$4 sm:$0xff]   ;;  %v2954_v27 = vld [vmem:[%s3125_s28 + $0x18] ss:$40 sps:$4 sm:$0xff]  }
  0x15   : > { %372 = vmatprep.subr.bf16.mxu0 %v2938_v7  ;;  %425 = vmatprep.subr.bf16.mxu1 %v2940_v10  ;;  %v2944_v14 = vld [vmem:[%s3125_s28 + $0x54] ss:$40 sps:$4 sm:$0x3f]   ;;  %v2948_v17 = vld [vmem:[%s3125_s28 + $0x50] ss:$40 sps:$4 sm:$0x3f]  }
  0x16   : > { %373 = vmatpush1.bf16.msra.mxu0 %v2942_v11  ;;  %426 = vmatpush1.bf16.msra.mxu1 %v2943_v12  ;;  %v2946_v15 = vld [vmem:[%s3125_s28 + $0x5c] ss:$40 sps:$4 sm:$0x3f]   ;;  %v346_v16 = vand.u32 %v2944_v14, %v3137_v13  ;;  %v2949_v18 = vld [vmem:[%s3125_s28 + $0x58] ss:$40 sps:$4 sm:$0x3f]   ;;  %v343_v24 = vand.u32 %v2948_v17, %v3137_v13 }
  0x17   : > { %v352_v19 = vand.u32 %v2946_v15, %v3137_v13  ;;  %v349_v25 = vand.u32 %v2949_v18, %v3137_v13  ;;  %v2951_v26 = vld [vmem:[%s3125_s28 + $0x10] ss:$40 sps:$4 sm:$0xff]   ;;  %v2956_v28 = vld [vmem:[%s3125_s28 + $0x1c] ss:$40 sps:$4 sm:$0xff]   ;;  %v2964_v41 = vld [vmem:[%s3125_s28 + $0x20] ss:$40 sps:$4 sm:$0xff]  }
  0x18   : > { %699 = vperm.xlu0 %2936, %v207_v8   ;;  %704 = vperm.xlu1 %2937, %v208_v9   ;;  %v2958_v29 = vld [vmem:[%s3125_s28 + $0x60] ss:$40 sps:$4 sm:$0x3f]   ;;  %v2960_v30 = vld [vmem:[%s3125_s28 + $0x64] ss:$40 sps:$4 sm:$0x3f]  }
  0x19   : > { %374 = vmatprep.subr.bf16.mxu0 %v346_v16  ;;  %427 = vmatprep.subr.bf16.mxu1 %v352_v19  ;;  %v2961_v31 = vld [vmem:[%s3125_s28 + $0x68] ss:$40 sps:$4 sm:$0x3f]   ;;  %v358_v32 = vand.u32 %v2960_v30, %v3137_v13  ;;  %v2963_v33 = vld [vmem:[%s3125_s28 + $0x6c] ss:$40 sps:$4 sm:$0x3f]   ;;  %v355_v35 = vand.u32 %v2958_v29, %v3137_v13 }
  0x1a   : > { %375 = vmatpush1.bf16.msra.mxu0 %v343_v24  ;;  %428 = vmatpush1.bf16.msra.mxu1 %v349_v25  ;;  %v364_v34 = vand.u32 %v2963_v33, %v3137_v13  ;;  %v361_v36 = vand.u32 %v2961_v31, %v3137_v13  ;;  %v2966_v37 = vld [vmem:[%s3125_s28 + $0x24] ss:$40 sps:$4 sm:$0xff]   ;;  %v2972_v40 = vld [vmem:[%s3125_s28 + $0x74] ss:$40 sps:$4 sm:$0x3f]  }
  0x1b   : > { %478 = vmatprep.subr.bf16.mxu0 %v2953_v21  ;;  %531 = vmatprep.subr.bf16.mxu1 %v2956_v28  ;;  %v2969_v38 = vld [vmem:[%s3125_s28 + $0xa4] ss:$40 sps:$4 sm:$0xff]   ;;  %v2967_v42 = vld [vmem:[%s3125_s28 + $0xa0] ss:$40 sps:$4 sm:$0xff]   ;;  %v370_v46 = vand.u32 %v2972_v40, %v3137_v13  ;;  %v2981_v51 = vld [vmem:[%s3125_s28 + $0xb4] ss:$40 sps:$4 sm:$0xff]  }
  0x1c   : > { %709 = vperm.xlu0 %2936, %v209_v22   ;;  %714 = vperm.xlu1 %2937, %v210_v23   ;;  %v2975_v43 = vld [vmem:[%s3125_s28 + $0xf4] ss:$40 sps:$4 sm:$0x3f]   ;;  %v2970_v44 = vld [vmem:[%s3125_s28 + $0x70] ss:$40 sps:$4 sm:$0x3f]  }
  0x1d   : > { %2722 = vmatmul.mubr.msk.bf16.vlgmr.msra.gmra.mrb[0].mxu0 %vm331_vm2, %v3148_v20  ;;  %2724 = vmatmul.mubr.msk.bf16.vlgmr.msra.gmra.mrb[0].mxu1 %vm331_vm2, %v3148_v20  ;;  %v2973_v45 = vld [vmem:[%s3125_s28 + $0xf0] ss:$40 sps:$4 sm:$0x3f]   ;;  %v912_v47 = vand.u32 %v2975_v43, %v3137_v13  ;;  %v367_v48 = vand.u32 %v2970_v44, %v3137_v13  ;;  %v2978_v50 = vld [vmem:[%s3125_s28 + $0xac] ss:$40 sps:$4 sm:$0xff]  }
  0x1e   : > { %479 = vmatpush1.bf16.msra.mxu0 %v2951_v26  ;;  %532 = vmatpush1.bf16.msra.mxu1 %v2954_v27  ;;  %v909_v49 = vand.u32 %v2973_v45, %v3137_v13  ;;  %v3208_v52 = vld [vmem:[%s3125_s28 + $0x190] ss:$40 sps:$4 sm:$0x3f]   ;;  %v3211_v53 = vld [vmem:[%s3125_s28 + $0x194] ss:$40 sps:$4 sm:$0x3f]  }
  0x1f   : > { %414 = vmatprep.mubr.bf16.mxu0 %v3068_v0  ;;  %467 = vmatprep.mubr.bf16.mxu1 %v3068_v0  ;;  %v3214_v54 = vld [vmem:[%s3125_s28 + $0x198] ss:$40 sps:$4 sm:$0x3f]   ;;  %v3217_v55 = vld [vmem:[%s3125_s28 + $0x19c] ss:$40 sps:$4 sm:$0x3f]   ;;  %v1475_v56 = vand.u32 %v3208_v52, %v3137_v13  ;;  %v1478_v57 = vand.u32 %v3211_v53, %v3137_v13 }
  0x20   : > { %480 = vmatprep.subr.bf16.mxu0 %v358_v32  ;;  %533 = vmatprep.subr.bf16.mxu1 %v364_v34  ;;  %v1484_v58 = vand.u32 %v3217_v55, %v3137_v13  ;;  %v1481_v59 = vand.u32 %v3214_v54, %v3137_v13  ;;  %v2984_v60 = vld [vmem:[%s3125_s28 + $0xfc] ss:$40 sps:$4 sm:$0x3f]   ;;  %v3236_v62 = vld [vmem:[%s3125_s28 + $0x1a0] ss:$40 sps:$4 sm:$0x3f]  }
  0x21   : > { %v2987_v61 = vld [vmem:[%s3125_s28 + $0x104] ss:$40 sps:$4 sm:$0x3f]   ;;  %v2976_v1 = vld [vmem:[%s3125_s28 + $0xa8] ss:$40 sps:$4 sm:$0xff]   ;;  %v1487_v4 = vand.u32 %v3236_v62, %v3137_v13  ;;  %v918_v11 = vand.u32 %v2984_v60, %v3137_v13 }
  0x22   : > { %481 = vmatpush1.bf16.msra.mxu0 %v355_v35  ;;  %534 = vmatpush1.bf16.msra.mxu1 %v361_v36  ;;  %v3239_v63 = vld [vmem:[%s3125_s28 + $0x1a4] ss:$40 sps:$4 sm:$0x3f]   ;;  %v3243_v2 = vld [vmem:[%s3125_s28 + $0x1a8] ss:$40 sps:$4 sm:$0x3f]   ;;  %v924_v12 = vand.u32 %v2987_v61, %v3137_v13 }
  0x23   : > { %584 = vmatprep.subr.bf16.mxu0 %v2966_v37  ;;  %938 = vmatprep.subr.bf16.mxu1 %v2969_v38  ;;  %v3246_v3 = vld [vmem:[%s3125_s28 + $0x1ac] ss:$40 sps:$4 sm:$0x3f]   ;;  %v2979_v5 = vld [vmem:[%s3125_s28 + $0xb0] ss:$40 sps:$4 sm:$0xff]   ;;  %v1490_v7 = vand.u32 %v3239_v63, %v3137_v13  ;;  %v1493_v10 = vand.u32 %v3243_v2, %v3137_v13 }
  0x24   : > { %v2982_v6 = vld [vmem:[%s3125_s28 + $0xf8] ss:$40 sps:$4 sm:$0x3f]   ;;  %v1496_v9 = vand.u32 %v3246_v3, %v3137_v13  ;;  %v3265_v15 = vld [vmem:[%s3125_s28 + $0x1b4] ss:$40 sps:$4 sm:$0x3f]  }
  0x25   : > { %2723 = vmatmul.mubr.msk.bf16.gmra.mrb[4].mxu0 %vm331_vm2, %v3181_v39  ;;  %2725 = vmatmul.mubr.msk.bf16.gmra.mrb[4].mxu1 %vm331_vm2, %v3181_v39  ;;  %v2985_v8 = vld [vmem:[%s3125_s28 + $0x100] ss:$40 sps:$4 sm:$0x3f]   ;;  %v3262_v14 = vld [vmem:[%s3125_s28 + $0x1b0] ss:$40 sps:$4 sm:$0x3f]   ;;  %v915_v16 = vand.u32 %v2982_v6, %v3137_v13  ;;  %v1502_v19 = vand.u32 %v3265_v15, %v3137_v13 }
  0x26   : > { %510 = vmatprep.mubr.bf16.mxu0 %v3068_v0  ;;  %563 = vmatprep.mubr.bf16.mxu1 %v3068_v0  ;;  %v3273_v17 = vld [vmem:[%s3125_s28 + $0x230] ss:$40 sps:$4 sm:$0x3f]   ;;  %v921_v18 = vand.u32 %v2985_v8, %v3137_v13  ;;  %v3279_v21 = vld [vmem:[%s3125_s28 + $0x234] ss:$40 sps:$4 sm:$0x3f]   ;;  %v1499_v22 = vand.u32 %v3262_v14, %v3137_v13 }
  0x27   : > { %v2990_v23 = vld [vmem:[%s3125_s28 + $0xbc] ss:$40 sps:$4 sm:$0xff]   ;;  %v2041_v25 = vand.u32 %v3273_v17, %v3137_v13  ;;  %v2044_v26 = vand.u32 %v3279_v21, %v3137_v13  ;;  %v3292_v27 = vld [vmem:[%s3125_s28 + $0x238] ss:$40 sps:$4 sm:$0x3f]  }
  0x28   : > { %v2993_v24 = vld [vmem:[%s3125_s28 + $0xc4] ss:$40 sps:$4 sm:$0xff]   ;;  %v3298_v29 = vld [vmem:[%s3125_s28 + $0x240] ss:$40 sps:$4 sm:$0x3f]   ;;  %v2047_v31 = vand.u32 %v3292_v27, %v3137_v13 }
  0x29   : > { %v3295_v28 = vld [vmem:[%s3125_s28 + $0x23c] ss:$40 sps:$4 sm:$0x3f]   ;;  %v2053_v34 = vand.u32 %v3298_v29, %v3137_v13  ;;  %v2996_v35 = vld [vmem:[%s3125_s28 + $0x10c] ss:$40 sps:$4 sm:$0x3f]  }
  0x2a   : > { %v3301_v30 = vld [vmem:[%s3125_s28 + $0x244] ss:$40 sps:$4 sm:$0x3f]   ;;  %v2050_v32 = vand.u32 %v3295_v28, %v3137_v13  ;;  %v2999_v36 = vld [vmem:[%s3125_s28 + $0x114] ss:$40 sps:$4 sm:$0x3f]  }
  0x2b   : > { %v2056_v33 = vand.u32 %v3301_v30, %v3137_v13  ;;  %v3320_v37 = vld [vmem:[%s3125_s28 + $0x248] ss:$40 sps:$4 sm:$0x3f]   ;;  %v2988_v38 = vld [vmem:[%s3125_s28 + $0xb8] ss:$40 sps:$4 sm:$0xff]  }
  0x2c   : > { %v2991_v40 = vld [vmem:[%s3125_s28 + $0xc0] ss:$40 sps:$4 sm:$0xff]   ;;  %v3331_v43 = vld [vmem:[%s3125_s28 + $0x254] ss:$40 sps:$4 sm:$0x3f]   ;;  %v2059_v44 = vand.u32 %v3320_v37, %v3137_v13 }
  0x2d   : > { %2726 = vmatmul.mubr.msk.bf16.vlgmr.msra.gmra.mrb[8].mxu0 %vm331_vm2, %v3148_v20  ;;  %2728 = vmatmul.mubr.msk.bf16.vlgmr.msra.gmra.mrb[8].mxu1 %vm331_vm2, %v3148_v20  ;;  %v2994_v45 = vld [vmem:[%s3125_s28 + $0x108] ss:$40 sps:$4 sm:$0x3f]   ;;  %v3015_v53 = vld [vmem:[%s3125_s28 + $0x158] ss:$40 sps:$4 sm:$0xff]  }
  0x2e   : > { %585 = vmatpush1.bf16.msra.mxu0 %v2964_v41  ;;  %939 = vmatpush1.bf16.msra.mxu1 %v2967_v42  ;;  %v3325_v41 = vld [vmem:[%s3125_s28 + $0x24c] ss:$40 sps:$4 sm:$0x3f]   ;;  %v3328_v42 = vld [vmem:[%s3125_s28 + $0x250] ss:$40 sps:$4 sm:$0x3f]   ;;  %v927_v60 = vand.u32 %v2994_v45, %v3137_v13 }
  0x2f   : > { %520 = vmatprep.mubr.bf16.mxu0 %v3068_v0  ;;  %573 = vmatprep.mubr.bf16.mxu1 %v3068_v0  ;;  %v3000_v6 = vld [vmem:[%s3125_s28 + $0x140] ss:$40 sps:$4 sm:$0xff]   ;;  %v3012_v52 = vld [vmem:[%s3125_s28 + $0x150] ss:$40 sps:$4 sm:$0xff]   ;;  %v3026_v54 = vld [vmem:[%s3125_s28 + $0x164] ss:$40 sps:$4 sm:$0xff]  }
  0x30   : > { %586 = vmatprep.subr.bf16.mxu0 %v370_v46  ;;  %940 = vmatprep.subr.bf16.mxu1 %v912_v47  ;;  %v2997_v46 = vld [vmem:[%s3125_s28 + $0x110] ss:$40 sps:$4 sm:$0x3f]   ;;  %v2062_v47 = vand.u32 %v3325_v41, %v3137_v13  ;;  %v3029_v55 = vld [vmem:[%s3125_s28 + $0x1e4] ss:$40 sps:$4 sm:$0xff]  }
  0x31   : > { %v933_v61 = vand.u32 %v2997_v46, %v3137_v13  ;;  %v3003_v8 = vld [vmem:[%s3125_s28 + $0x148] ss:$40 sps:$4 sm:$0xff]   ;;  %v3050_v2 = vld [vmem:[%s3125_s28 + $0x1fc] ss:$40 sps:$4 sm:$0xff]  }
  0x32   : > { %587 = vmatpush1.bf16.msra.mxu0 %v367_v48  ;;  %941 = vmatpush1.bf16.msra.mxu1 %v909_v49  ;;  %v2068_v48 = vand.u32 %v3331_v43, %v3137_v13  ;;  %v2065_v49 = vand.u32 %v3328_v42, %v3137_v13  ;;  %v3036_v62 = vld [vmem:[%s3125_s28 + $0x1e8] ss:$40 sps:$4 sm:$0xff]   ;;  %v3053_v3 = vld [vmem:[%s3125_s28 + $0x204] ss:$40 sps:$4 sm:$0xff]  }
  0x33   : > { %991 = vmatprep.subr.bf16.mxu0 %v2978_v50  ;;  %1044 = vmatprep.subr.bf16.mxu1 %v2981_v51  ;;  %v930_v50 = vand.u32 %v2996_v35, %v3137_v13  ;;  %v936_v51 = vand.u32 %v2999_v36, %v3137_v13  ;;  %v3039_v63 = vld [vmem:[%s3125_s28 + $0x1f0] ss:$40 sps:$4 sm:$0xff]  }
  0x35   : > { %2727 = vmatmul.mubr.msk.bf16.gmra.mrb[12].mxu0 %vm331_vm2, %v3181_v39  ;;  %2729 = vmatmul.mubr.msk.bf16.gmra.mrb[12].mxu1 %vm331_vm2, %v3181_v39 }
  0x36   : > { %616 = vmatprep.mubr.bf16.mxu0 %v3068_v0  ;;  %970 = vmatprep.mubr.bf16.mxu1 %v3068_v0 }
  0x3d   : > { %2730 = vmatmul.mubr.msk.bf16.vlgmr.msra.gmra.mrb[16].mxu0 %vm331_vm2, %v3148_v20  ;;  %2772 = vmatmul.mubr.msk.bf16.vlgmr.msra.gmra.mrb[16].mxu1 %vm331_vm2, %v3148_v20 }
  0x3e   : > { %992 = vmatpush1.bf16.msra.mxu0 %v2976_v1  ;;  %1045 = vmatpush1.bf16.msra.mxu1 %v2979_v5  ;;  %v3002_v1 = vld [vmem:[%s3125_s28 + $0x144] ss:$40 sps:$4 sm:$0xff]  }
  0x3f   : > { %626 = vmatprep.mubr.bf16.mxu0 %v3068_v0  ;;  %980 = vmatprep.mubr.bf16.mxu1 %v3068_v0  ;;  %v3005_v5 = vld [vmem:[%s3125_s28 + $0x14c] ss:$40 sps:$4 sm:$0xff]  }
  0x40   : > { %993 = vmatprep.subr.bf16.mxu0 %v918_v11  ;;  %1046 = vmatprep.subr.bf16.mxu1 %v924_v12  ;;  %v3014_v11 = vld [vmem:[%s3125_s28 + $0x154] ss:$40 sps:$4 sm:$0xff]  }
  0x41   : > { %v3017_v12 = vld [vmem:[%s3125_s28 + $0x15c] ss:$40 sps:$4 sm:$0xff]  }
  0x42   : > { %994 = vmatpush1.bf16.msra.mxu0 %v915_v16  ;;  %1047 = vmatpush1.bf16.msra.mxu1 %v921_v18 }
  0x43   : > { %1097 = vmatprep.subr.bf16.mxu0 %v2990_v23  ;;  %1150 = vmatprep.subr.bf16.mxu1 %v2993_v24 }
  0x45   : > { %2731 = vmatmul.mubr.msk.bf16.gmra.mrb[20].mxu0 %vm331_vm2, %v3181_v39  ;;  %2773 = vmatmul.mubr.msk.bf16.gmra.mrb[20].mxu1 %vm331_vm2, %v3181_v39 }
  0x46   : > { %1023 = vmatprep.mubr.bf16.mxu0 %v3068_v0  ;;  %1076 = vmatprep.mubr.bf16.mxu1 %v3068_v0 }
  0x4d   : > { %2774 = vmatmul.mubr.msk.bf16.vlgmr.msra.gmra.mrb[24].mxu0 %vm331_vm2, %v3148_v20  ;;  %2776 = vmatmul.mubr.msk.bf16.vlgmr.msra.gmra.mrb[24].mxu1 %vm331_vm2, %v3148_v20 }
  0x4e   : > { %1098 = vmatpush1.bf16.msra.mxu0 %v2988_v38  ;;  %1151 = vmatpush1.bf16.msra.mxu1 %v2991_v40 }
  0x4f   : > { %1033 = vmatprep.mubr.bf16.mxu0 %v3068_v0  ;;  %1086 = vmatprep.mubr.bf16.mxu1 %v3068_v0 }
  0x50   : > { %1099 = vmatprep.subr.bf16.mxu0 %v930_v50  ;;  %1152 = vmatprep.subr.bf16.mxu1 %v936_v51 }
  0x52   : > { %1100 = vmatpush1.bf16.msra.mxu0 %v927_v60  ;;  %1153 = vmatpush1.bf16.msra.mxu1 %v933_v61 }
  0x53   : > { %1504 = vmatprep.subr.bf16.mxu0 %v3002_v1  ;;  %1557 = vmatprep.subr.bf16.mxu1 %v3005_v5 }
  0x55   : > { %2775 = vmatmul.mubr.msk.bf16.gmra.mrb[28].mxu0 %vm331_vm2, %v3181_v39  ;;  %2777 = vmatmul.mubr.msk.bf16.gmra.mrb[28].mxu1 %vm331_vm2, %v3181_v39 }
  0x56   : > { %1129 = vmatprep.mubr.bf16.mxu0 %v3068_v0  ;;  %1182 = vmatprep.mubr.bf16.mxu1 %v3068_v0 }
  0x5d   : > { %2778 = vmatmul.mubr.msk.bf16.vlgmr.msra.gmra.mrb[32].mxu0 %vm331_vm2, %v3148_v20  ;;  %2780 = vmatmul.mubr.msk.bf16.vlgmr.msra.gmra.mrb[32].mxu1 %vm331_vm2, %v3148_v20 }
  0x5e   : > { %1505 = vmatpush1.bf16.msra.mxu0 %v3000_v6  ;;  %1558 = vmatpush1.bf16.msra.mxu1 %v3003_v8 }
  0x5f   : > { %1139 = vmatprep.mubr.bf16.mxu0 %v3068_v0  ;;  %1192 = vmatprep.mubr.bf16.mxu1 %v3068_v0 }
  0x60   : > { %1506 = vmatprep.subr.bf16.mxu0 %v1478_v57  ;;  %1559 = vmatprep.subr.bf16.mxu1 %v1484_v58  ;;  %v3027_v57 = vld [vmem:[%s3125_s28 + $0x1e0] ss:$40 sps:$4 sm:$0xff]   ;;  %v3038_v58 = vld [vmem:[%s3125_s28 + $0x1ec] ss:$40 sps:$4 sm:$0xff]  }
  0x62   : > { %1507 = vmatpush1.bf16.msra.mxu0 %v1475_v56  ;;  %1560 = vmatpush1.bf16.msra.mxu1 %v1481_v59  ;;  %v3024_v56 = vld [vmem:[%s3125_s28 + $0x160] ss:$40 sps:$4 sm:$0xff]   ;;  %v3041_v59 = vld [vmem:[%s3125_s28 + $0x1f4] ss:$40 sps:$4 sm:$0xff]  }
  0x63   : > { %1610 = vmatprep.subr.bf16.mxu0 %v3014_v11  ;;  %1663 = vmatprep.subr.bf16.mxu1 %v3017_v12 }
  0x65   : > { %2779 = vmatmul.mubr.msk.bf16.gmra.mrb[36].mxu0 %vm331_vm2, %v3181_v39  ;;  %2781 = vmatmul.mubr.msk.bf16.gmra.mrb[36].mxu1 %vm331_vm2, %v3181_v39 }
  0x66   : > { %1536 = vmatprep.mubr.bf16.mxu0 %v3068_v0  ;;  %1589 = vmatprep.mubr.bf16.mxu1 %v3068_v0 }
  0x6d   : > { %2822 = vmatmul.mubr.msk.bf16.vlgmr.msra.gmra.mrb[40].mxu0 %vm331_vm2, %v3148_v20  ;;  %2824 = vmatmul.mubr.msk.bf16.vlgmr.msra.gmra.mrb[40].mxu1 %vm331_vm2, %v3148_v20 }
  0x6e   : > { %1611 = vmatpush1.bf16.msra.mxu0 %v3012_v52  ;;  %1664 = vmatpush1.bf16.msra.mxu1 %v3015_v53 }
  0x6f   : > { %1546 = vmatprep.mubr.bf16.mxu0 %v3068_v0  ;;  %1599 = vmatprep.mubr.bf16.mxu1 %v3068_v0 }
  0x70   : > { %1612 = vmatprep.subr.bf16.mxu0 %v1490_v7  ;;  %1665 = vmatprep.subr.bf16.mxu1 %v1496_v9  ;;  %v3051_v7 = vld [vmem:[%s3125_s28 + $0x200] ss:$40 sps:$4 sm:$0xff]  }
  0x72   : > { %1613 = vmatpush1.bf16.msra.mxu0 %v1487_v4  ;;  %1666 = vmatpush1.bf16.msra.mxu1 %v1493_v10  ;;  %v3048_v4 = vld [vmem:[%s3125_s28 + $0x1f8] ss:$40 sps:$4 sm:$0xff]  }
  0x73   : > { %1716 = vmatprep.subr.bf16.mxu0 %v3026_v54  ;;  %2070 = vmatprep.subr.bf16.mxu1 %v3029_v55 }
  0x75   : > { %2823 = vmatmul.mubr.msk.bf16.gmra.mrb[44].mxu0 %vm331_vm2, %v3181_v39  ;;  %2825 = vmatmul.mubr.msk.bf16.gmra.mrb[44].mxu1 %vm331_vm2, %v3181_v39 }
  0x76   : > { %1642 = vmatprep.mubr.bf16.mxu0 %v3068_v0  ;;  %1695 = vmatprep.mubr.bf16.mxu1 %v3068_v0 }
  0x7d   : > { %2826 = vmatmul.mubr.msk.bf16.vlgmr.msra.gmra.mrb[48].mxu0 %vm331_vm2, %v3148_v20  ;;  %2828 = vmatmul.mubr.msk.bf16.vlgmr.msra.gmra.mrb[48].mxu1 %vm331_vm2, %v3148_v20 }
  0x7e   : > { %1717 = vmatpush1.bf16.msra.mxu0 %v3024_v56  ;;  %2071 = vmatpush1.bf16.msra.mxu1 %v3027_v57 }
  0x7f   : > { %1652 = vmatprep.mubr.bf16.mxu0 %v3068_v0  ;;  %1705 = vmatprep.mubr.bf16.mxu1 %v3068_v0 }
  0x80   : > { %1718 = vmatprep.subr.bf16.mxu0 %v1502_v19  ;;  %2072 = vmatprep.subr.bf16.mxu1 %v2044_v26 }
  0x82   : > { %1719 = vmatpush1.bf16.msra.mxu0 %v1499_v22  ;;  %2073 = vmatpush1.bf16.msra.mxu1 %v2041_v25 }
  0x83   : > { %2123 = vmatprep.subr.bf16.mxu0 %v3038_v58  ;;  %2176 = vmatprep.subr.bf16.mxu1 %v3041_v59 }
  0x85   : > { %2827 = vmatmul.mubr.msk.bf16.gmra.mrb[52].mxu0 %vm331_vm2, %v3181_v39  ;;  %2829 = vmatmul.mubr.msk.bf16.gmra.mrb[52].mxu1 %vm331_vm2, %v3181_v39 }
  0x86   : > { %1748 = vmatprep.mubr.bf16.mxu0 %v3068_v0  ;;  %2102 = vmatprep.mubr.bf16.mxu1 %v3068_v0 }
  0x8d   : > { %2830 = vmatmul.mubr.msk.bf16.vlgmr.msra.gmra.mrb[56].mxu0 %vm331_vm2, %v3148_v20  ;;  %2872 = vmatmul.mubr.msk.bf16.vlgmr.msra.gmra.mrb[56].mxu1 %vm331_vm2, %v3148_v20 }
  0x8e   : > { %2124 = vmatpush1.bf16.msra.mxu0 %v3036_v62  ;;  %2177 = vmatpush1.bf16.msra.mxu1 %v3039_v63 }
  0x8f   : > { %1758 = vmatprep.mubr.bf16.mxu0 %v3068_v0  ;;  %2112 = vmatprep.mubr.bf16.mxu1 %v3068_v0  ;;  %v3509_v13 = vpop.permute.xlu0 %639  ;;  %v3511_v9 = vpop.permute.xlu1 %649 }
  0x90   : > { %2125 = vmatprep.subr.bf16.mxu0 %v2050_v32  ;;  %2178 = vmatprep.subr.bf16.mxu1 %v2056_v33 }
  0x92   : > { %2126 = vmatpush1.bf16.msra.mxu0 %v2047_v31  ;;  %2179 = vmatpush1.bf16.msra.mxu1 %v2053_v34 }
  0x93   : > { %2229 = vmatprep.subr.bf16.mxu0 %v3050_v2  ;;  %2282 = vmatprep.subr.bf16.mxu1 %v3053_v3  ;;  %v3513_v10 = vpop.permute.xlu0 %644  ;;  %v3515_v14 = vpop.permute.xlu1 %654 }
  0x95   : > { %2831 = vmatmul.mubr.msk.bf16.gmra.mrb[60].mxu0 %vm331_vm2, %v3181_v39  ;;  %2873 = vmatmul.mubr.msk.bf16.gmra.mrb[60].mxu1 %vm331_vm2, %v3181_v39 }
  0x96   : > { %2155 = vmatprep.mubr.bf16.mxu0 %v3068_v0  ;;  %2208 = vmatprep.mubr.bf16.mxu1 %v3068_v0 }
  0x97   : > { %v3517_v22 = vpop.permute.xlu0 %699  ;;  %v3519_v23 = vpop.permute.xlu1 %704 }
  0x9d   : > { %2874 = vmatmul.mubr.msk.bf16.vlgmr.msra.gmra.mrb[64].mxu0 %vm331_vm2, %v3148_v20  ;;  %2876 = vmatmul.mubr.msk.bf16.vlgmr.msra.gmra.mrb[64].mxu1 %vm331_vm2, %v3148_v20 }
  0x9e   : > { %2230 = vmatpush1.bf16.msra.mxu0 %v3048_v4  ;;  %2283 = vmatpush1.bf16.msra.mxu1 %v3051_v7 }
  0x9f   : > { %2165 = vmatprep.mubr.bf16.mxu0 %v3068_v0  ;;  %2218 = vmatprep.mubr.bf16.mxu1 %v3068_v0 }
  0xa0   : > { %2231 = vmatprep.subr.bf16.mxu0 %v2062_v47  ;;  %2284 = vmatprep.subr.bf16.mxu1 %v2068_v48  ;;  %v3541_v47 = vpop.permute.xlu1 %714 }
  0xa2   : > { %2232 = vmatpush1.bf16.msra.mxu0 %v2059_v44  ;;  %2285 = vmatpush1.bf16.msra.mxu1 %v2065_v49  ;;  %v3535_v44 = vpop.permute.xlu0 %709 }
  0xa5   : > { %2875 = vmatmul.mubr.msk.bf16.gmra.mrb[68].mxu0 %vm331_vm2, %v3181_v39  ;;  %2877 = vmatmul.mubr.msk.bf16.gmra.mrb[68].mxu1 %vm331_vm2, %v3181_v39 }
  0xa6   : > { %2261 = vmatprep.mubr.bf16.mxu0 %v3068_v0  ;;  %2314 = vmatprep.mubr.bf16.mxu1 %v3068_v0 }
  0xad   : > { %2878 = vmatmul.mubr.msk.bf16.vlgmr.msra.gmra.mrb[72].mxu0 %vm331_vm2, %v3148_v20  ;;  %2880 = vmatmul.mubr.msk.bf16.vlgmr.msra.gmra.mrb[72].mxu1 %vm331_vm2, %v3148_v20 }
  0xae   : > { %2271 = vmatprep.mubr.bf16.mxu0 %v3068_v0  ;;  %2324 = vmatprep.mubr.bf16.mxu1 %v3068_v0 }
  0xb5   : > { %2879 = vmatmul.mubr.msk.bf16.gmra.mrb[76].mxu0 %vm331_vm2, %v3181_v39  ;;  %2881 = vmatmul.mubr.msk.bf16.gmra.mrb[76].mxu1 %vm331_vm2, %v3181_v39 }
  0xf0   : > { %v406_v15 = vpop.f32.mrb[0].mxu0  ;;  %v459_v20 = vpop.f32.mrb[0].mxu1 }
  0xf1   : > { %v408_v16 = vpop.f32.mrb[1].mxu0  ;;  %v461_v17 = vpop.f32.mrb[1].mxu1  ;;  %v657_v25 = vmul.f32 %v3509_v13, %v406_v15  ;;  %v659_v28 = vmul.f32 %v3509_v13, %v459_v20 }
  0xf2   : > { %v410_v18 = vpop.f32.mrb[2].mxu0  ;;  %v463_v0 = vpop.f32.mrb[2].mxu1  ;;  %v658_v31 = vmul.f32 %v3509_v13, %v408_v16  ;;  %v660_v32 = vmul.f32 %v3509_v13, %v461_v17 }
  0xf3   : > { %v412_v19 = vpop.f32.mrb[3].mxu0  ;;  %v465_v21 = vpop.f32.mrb[3].mxu1  ;;  %v667_v35 = vmul.f32 %v3513_v10, %v410_v18  ;;  %v669_v36 = vmul.f32 %v3513_v10, %v463_v0  ;;  %v3532_v42 = vadd.f32 %v3517_v22, %v657_v25  ;;  %v3538_v45 = vadd.f32 %v3517_v22, %v659_v28 }
  0xf4   : > { %v668_v37 = vmul.f32 %v3513_v10, %v412_v19  ;;  %v670_v38 = vmul.f32 %v3513_v10, %v465_v21  ;;  %v3544_v48 = vadd.f32 %v3517_v22, %v658_v31  ;;  %v3547_v49 = vadd.f32 %v3517_v22, %v660_v32 }
  0xf5   : > { %v3550_v60 = vadd.f32 %v3519_v23, %v667_v35  ;;  %v3556_v1 = vadd.f32 %v3519_v23, %v669_v36  ;;  %v757_v12 = vmax.f32 %v3532_v42, 0.0 }
  0xf6   : > { %v3553_v61 = vadd.f32 %v3519_v23, %v668_v37  ;;  %v3559_v5 = vadd.f32 %v3519_v23, %v670_v38  ;;  %v758_v3 = vmax.f32 %v3544_v48, 0.0 }
  0xf7   : > { %v767_v15 = vmax.f32 %v3550_v60, 0.0 }
  0xf8   : > { %v416_v39 = vpop.f32.mrb[4].mxu0  ;;  %v469_v24 = vpop.f32.mrb[4].mxu1  ;;  %v768_v20 = vmax.f32 %v3553_v61, 0.0 }
  0xf9   : > { %v418_v26 = vpop.f32.mrb[5].mxu0  ;;  %v471_v27 = vpop.f32.mrb[5].mxu1  ;;  %v677_v40 = vmul.f32 %v3511_v9, %v416_v39  ;;  %v679_v41 = vmul.f32 %v3511_v9, %v469_v24 }
  0xfa   : > { %v420_v29 = vpop.f32.mrb[6].mxu0  ;;  %v473_v30 = vpop.f32.mrb[6].mxu1  ;;  %v678_v43 = vmul.f32 %v3511_v9, %v418_v26  ;;  %v680_v46 = vmul.f32 %v3511_v9, %v471_v27 }
  0xfb   : > { %v422_v33 = vpop.f32.mrb[7].mxu0  ;;  %v475_v34 = vpop.f32.mrb[7].mxu1  ;;  %v687_v6 = vmul.f32 %v3515_v14, %v420_v29  ;;  %v3564_v52 = vadd.f32 %v3535_v44, %v677_v40  ;;  %v3567_v53 = vadd.f32 %v3535_v44, %v679_v41  ;;  %v689_v54 = vmul.f32 %v3515_v14, %v473_v30 }
  0xfc   : > { %v688_v55 = vmul.f32 %v3515_v14, %v422_v33  ;;  %v3572_v58 = vadd.f32 %v3535_v44, %v678_v43  ;;  %v690_v62 = vmul.f32 %v3515_v14, %v475_v34  ;;  %v3579_v7 = vadd.f32 %v3535_v44, %v680_v46 }
  0xfd   : > { %v777_v0 = vmax.f32 %v3564_v52, 0.0  ;;  %v3588_v19 = vadd.f32 %v3541_v47, %v687_v6  ;;  %v3597_v26 = vadd.f32 %v3541_v47, %v689_v54 }
  0xfe   : > { %v3594_v25 = vadd.f32 %v3541_v47, %v688_v55  ;;  %v3603_v30 = vadd.f32 %v3541_v47, %v690_v62 }
 0x100   : > { %v512_v50 = vpop.f32.mrb[8].mxu0  ;;  %v565_v51 = vpop.f32.mrb[8].mxu1 }
 0x101   : > { %v514_v8 = vpop.f32.mrb[9].mxu0  ;;  %v567_v11 = vpop.f32.mrb[9].mxu1  ;;  %v661_v18 = vmul.f32 %v3509_v13, %v512_v50  ;;  %v663_v39 = vmul.f32 %v3509_v13, %v565_v51 }
 0x102   : > { %v516_v56 = vpop.f32.mrb[10].mxu0  ;;  %v569_v57 = vpop.f32.mrb[10].mxu1  ;;  %v662_v27 = vmul.f32 %v3509_v13, %v514_v8  ;;  %v664_v28 = vmul.f32 %v3509_v13, %v567_v11 }
 0x103   : > { %v518_v63 = vpop.f32.mrb[11].mxu0  ;;  %v571_v2 = vpop.f32.mrb[11].mxu1  ;;  %v671_v31 = vmul.f32 %v3513_v10, %v516_v56  ;;  %v673_v32 = vmul.f32 %v3513_v10, %v569_v57  ;;  %v3610_v37 = vadd.f32 %v3517_v22, %v661_v18  ;;  %v3616_v50 = vadd.f32 %v3517_v22, %v663_v39 }
 0x104   : > { %v672_v33 = vmul.f32 %v3513_v10, %v518_v63  ;;  %v674_v34 = vmul.f32 %v3513_v10, %v571_v2  ;;  %v3622_v55 = vadd.f32 %v3517_v22, %v662_v27  ;;  %v3625_v56 = vadd.f32 %v3517_v22, %v664_v28 }
 0x105   : > { %v3630_v18 = vadd.f32 %v3519_v23, %v671_v31  ;;  %v3633_v39 = vadd.f32 %v3519_v23, %v673_v32 }
 0x106   : > { %v3639_v27 = vadd.f32 %v3519_v23, %v674_v34 }
 0x108   : > { %v522_v35 = vpop.f32.mrb[12].mxu0  ;;  %v575_v36 = vpop.f32.mrb[12].mxu1 }
 0x109   : > { %v681_v38 = vmul.f32 %v3511_v9, %v522_v35  ;;  %v683_v40 = vmul.f32 %v3511_v9, %v575_v36  ;;  %v524_v41 = vpop.f32.mrb[13].mxu0  ;;  %v577_v43 = vpop.f32.mrb[13].mxu1  ;;  %v3636_v35 = vadd.f32 %v3519_v23, %v672_v33 }
 0x10a   : > { %v682_v51 = vmul.f32 %v3511_v9, %v524_v41  ;;  %v684_v6 = vmul.f32 %v3511_v9, %v577_v43  ;;  %v526_v8 = vpop.f32.mrb[14].mxu0  ;;  %v579_v11 = vpop.f32.mrb[14].mxu1 }
 0x10b   : > { %v528_v57 = vpop.f32.mrb[15].mxu0  ;;  %v581_v62 = vpop.f32.mrb[15].mxu1  ;;  %v3643_v36 = vadd.f32 %v3535_v44, %v681_v38  ;;  %v3646_v41 = vadd.f32 %v3535_v44, %v683_v40  ;;  %v691_v31 = vmul.f32 %v3515_v14, %v526_v8  ;;  %v693_v34 = vmul.f32 %v3515_v14, %v579_v11 }
 0x10c   : > { %v3651_v32 = vadd.f32 %v3535_v44, %v682_v51  ;;  %v3654_v33 = vadd.f32 %v3535_v44, %v684_v6  ;;  %v692_v54 = vmul.f32 %v3515_v14, %v528_v57  ;;  %v694_v40 = vmul.f32 %v3515_v14, %v581_v62 }
 0x10d   : > { %v3668_v38 = vadd.f32 %v3541_v47, %v691_v31  ;;  %v3674_v51 = vadd.f32 %v3541_v47, %v693_v34 }
 0x10e   : > { %v3678_v17 = vadd.f32 %v3541_v47, %v692_v54  ;;  %v3681_v31 = vadd.f32 %v3541_v47, %v694_v40 }
 0x110   : > { %v618_v6 = vpop.f32.mrb[16].mxu0  ;;  %v972_v21 = vpop.f32.mrb[16].mxu1 }
 0x111   : > { %v1203_v57 = vmul.f32 %v972_v21, %v3509_v13  ;;  %v620_v62 = vpop.f32.mrb[17].mxu0  ;;  %v974_v16 = vpop.f32.mrb[17].mxu1  ;;  %v665_v43 = vmul.f32 %v3509_v13, %v618_v6 }
 0x112   : > { %v1204_v29 = vmul.f32 %v974_v16, %v3509_v13  ;;  %v622_v2 = vpop.f32.mrb[18].mxu0  ;;  %v976_v11 = vpop.f32.mrb[18].mxu1  ;;  %v666_v34 = vmul.f32 %v3509_v13, %v620_v62 }
 0x113   : > { %v1243_v21 = vadd.f32 %v1203_v57, %v3517_v22  ;;  %v1213_v4 = vmul.f32 %v976_v11, %v3513_v10  ;;  %v624_v8 = vpop.f32.mrb[19].mxu0  ;;  %v978_v28 = vpop.f32.mrb[19].mxu1  ;;  %v675_v40 = vmul.f32 %v3513_v10, %v622_v2  ;;  %v3702_v2 = vadd.f32 %v3517_v22, %v665_v43 }
 0x114   : > { %v1244_v16 = vadd.f32 %v1204_v29, %v3517_v22  ;;  %v1214_v59 = vmul.f32 %v978_v28, %v3513_v10  ;;  %v676_v24 = vmul.f32 %v3513_v10, %v624_v8 }
 0x115   : > { %v1283_v63 = vmax.f32 %v1243_v21, 0.0  ;;  %v1253_v46 = vadd.f32 %v1213_v4, %v3519_v23  ;;  %v3705_v4 = vadd.f32 %v3517_v22, %v666_v34  ;;  %v3712_v29 = vadd.f32 %v3519_v23, %v675_v40 }
 0x116   : > { %v1284_v11 = vmax.f32 %v1244_v16, 0.0  ;;  %v1254_v6 = vadd.f32 %v1214_v59, %v3519_v23  ;;  %v3721_v48 = vadd.f32 %v3519_v23, %v676_v24 }
 0x117   : > { %v3699_v28 = vmax.f32 %v757_v12, %v1283_v63  ;;  %v1293_v21 = vmax.f32 %v1253_v46, 0.0 }
 0x118   : > { %v3709_v8 = vmax.f32 %v758_v3, %v1284_v11  ;;  %v1294_v59 = vmax.f32 %v1254_v6, 0.0  ;;  %v628_v16 = vpop.f32.mrb[20].mxu0  ;;  %v982_v57 = vpop.f32.mrb[20].mxu1 }
 0x119   : > { %v3716_v42 = vmax.f32 %v767_v15, %v1293_v21  ;;  %v685_v12 = vmul.f32 %v3511_v9, %v628_v16  ;;  %v1223_v46 = vmul.f32 %v982_v57, %v3511_v9  ;;  %v630_v63 = vpop.f32.mrb[21].mxu0  ;;  %v984_v43 = vpop.f32.mrb[21].mxu1 }
 0x11a   : > { %v3725_v3 = vmax.f32 %v768_v20, %v1294_v59  ;;  %v686_v34 = vmul.f32 %v3511_v9, %v630_v63  ;;  %v1224_v40 = vmul.f32 %v984_v43, %v3511_v9  ;;  %v632_v60 = vpop.f32.mrb[22].mxu0  ;;  %v986_v15 = vpop.f32.mrb[22].mxu1 }
 0x11b   : > { %v3730_v11 = vadd.f32 %v3535_v44, %v685_v12  ;;  %v1263_v57 = vadd.f32 %v1223_v46, %v3535_v44  ;;  %v695_v6 = vmul.f32 %v3515_v14, %v632_v60  ;;  %v1233_v24 = vmul.f32 %v986_v15, %v3515_v14  ;;  %v634_v21 = vpop.f32.mrb[23].mxu0  ;;  %v988_v16 = vpop.f32.mrb[23].mxu1 }
 0x11c   : > { %4333 = vst [vmem:[#allocation2_spill] sm:$0xff] %v3725_v3  ;;  %v3736_v61 = vadd.f32 %v3535_v44, %v686_v34  ;;  %v1264_v20 = vadd.f32 %v1224_v40, %v3535_v44  ;;  %v696_v59 = vmul.f32 %v3515_v14, %v634_v21  ;;  %v1234_v63 = vmul.f32 %v988_v16, %v3515_v14 }
 0x11d   : > { %v1303_v43 = vmax.f32 %v1263_v57, 0.0  ;;  %v3743_v46 = vadd.f32 %v3541_v47, %v695_v6  ;;  %v1273_v60 = vadd.f32 %v1233_v24, %v3541_v47  ;;  %v4337_v16 = vmax.f32 %v3588_v19, 0.0 }
 0x11e   : > { %v1304_v62 = vmax.f32 %v1264_v20, 0.0  ;;  %v3748_v34 = vadd.f32 %v3541_v47, %v696_v59  ;;  %v1274_v40 = vadd.f32 %v1234_v63, %v3541_v47  ;;  %v4335_v20 = vmax.f32 %v3572_v58, 0.0 }
 0x11f   : > { %v3755_v57 = vmax.f32 %v777_v0, %v1303_v43  ;;  %v1313_v6 = vmax.f32 %v1273_v60, 0.0  ;;  %v4339_v58 = vmax.f32 %v3594_v25, 0.0 }
 0x120   : > { %v3761_v15 = vmax.f32 %v4335_v20, %v1304_v62  ;;  %v1314_v59 = vmax.f32 %v1274_v40, 0.0  ;;  %v1025_v54 = vpop.f32.mrb[24].mxu0  ;;  %v1078_v63 = vpop.f32.mrb[24].mxu1 }
 0x121   : > { %4334 = vst [vmem:[#allocation3_spill] sm:$0xff] %v3755_v57  ;;  %v3766_v3 = vmax.f32 %v4337_v16, %v1313_v6  ;;  %v1205_v52 = vmul.f32 %v1025_v54, %v3509_v13  ;;  %v1207_v0 = vmul.f32 %v1078_v63, %v3509_v13  ;;  %v1027_v43 = vpop.f32.mrb[25].mxu0  ;;  %v1080_v60 = vpop.f32.mrb[25].mxu1 }
 0x122   : > { %4336 = vst [vmem:[#allocation4_spill] sm:$0xff] %v3761_v15  ;;  %v3773_v62 = vmax.f32 %v4339_v58, %v1314_v59  ;;  %v1206_v40 = vmul.f32 %v1027_v43, %v3509_v13  ;;  %v1208_v20 = vmul.f32 %v1080_v60, %v3509_v13  ;;  %v1029_v21 = vpop.f32.mrb[26].mxu0  ;;  %v1082_v19 = vpop.f32.mrb[26].mxu1 }
 0x123   : > { %4338 = vst [vmem:[#allocation5_spill] sm:$0xff] %v3766_v3  ;;  %v1245_v16 = vadd.f32 %v1205_v52, %v3517_v22  ;;  %v1247_v54 = vadd.f32 %v1207_v0, %v3517_v22  ;;  %v1215_v6 = vmul.f32 %v1029_v21, %v3513_v10  ;;  %v1217_v63 = vmul.f32 %v1082_v19, %v3513_v10  ;;  %v1031_v12 = vpop.f32.mrb[27].mxu0  ;;  %v1084_v24 = vpop.f32.mrb[27].mxu1 }
 0x124   : > { %4340 = vst [vmem:[#allocation6_spill] sm:$0xff] %v3773_v62  ;;  %v1246_v25 = vadd.f32 %v1206_v40, %v3517_v22  ;;  %v1248_v59 = vadd.f32 %v1208_v20, %v3517_v22  ;;  %v1216_v43 = vmul.f32 %v1031_v12, %v3513_v10  ;;  %v1218_v60 = vmul.f32 %v1084_v24, %v3513_v10 }
 0x125   : > { %v1285_v58 = vmax.f32 %v1245_v16, 0.0  ;;  %v1287_v62 = vmax.f32 %v1247_v54, 0.0  ;;  %v1255_v52 = vadd.f32 %v1215_v6, %v3519_v23  ;;  %v1257_v0 = vadd.f32 %v1217_v63, %v3519_v23 }
 0x126   : > { %v1286_v3 = vmax.f32 %v1246_v25, 0.0  ;;  %v1288_v21 = vmax.f32 %v1248_v59, 0.0  ;;  %v1256_v19 = vadd.f32 %v1216_v43, %v3519_v23  ;;  %v1258_v15 = vadd.f32 %v1218_v60, %v3519_v23 }
 0x127   : > { %v4341_v40 = vmax.f32 %v3538_v45, 0.0  ;;  %v4342_v12 = vmax.f32 %v3610_v37, 0.0  ;;  %v1295_v24 = vmax.f32 %v1255_v52, 0.0  ;;  %v1297_v16 = vmax.f32 %v1257_v0, 0.0 }
 0x128   : > { %v4343_v54 = vmax.f32 %v3547_v49, 0.0  ;;  %v4344_v63 = vmax.f32 %v3622_v55, 0.0  ;;  %v1296_v59 = vmax.f32 %v1256_v19, 0.0  ;;  %v1298_v43 = vmax.f32 %v1258_v15, 0.0  ;;  %v1035_v60 = vpop.f32.mrb[28].mxu0  ;;  %v1088_v45 = vpop.f32.mrb[28].mxu1 }
 0x129   : > { %v3791_v57 = vmax.f32 %v4341_v40, %v1285_v58  ;;  %v3795_v20 = vmax.f32 %v4342_v12, %v1287_v62  ;;  %v4345_v58 = vmax.f32 %v3556_v1, 0.0  ;;  %v4346_v37 = vmax.f32 %v3630_v18, 0.0  ;;  %v1037_v52 = vpop.f32.mrb[29].mxu0  ;;  %v1090_v55 = vpop.f32.mrb[29].mxu1 }
 0x12a   : > { %v3799_v6 = vmax.f32 %v4343_v54, %v1286_v3  ;;  %v3803_v25 = vmax.f32 %v4344_v63, %v1288_v21  ;;  %v1225_v49 = vmul.f32 %v1035_v60, %v3511_v9  ;;  %v1227_v3 = vmul.f32 %v1088_v45, %v3511_v9  ;;  %v1039_v12 = vpop.f32.mrb[30].mxu0 }
 0x12b   : > { %v3807_v40 = vmax.f32 %v4345_v58, %v1295_v24  ;;  %v3811_v62 = vmax.f32 %v4346_v37, %v1297_v16  ;;  %v4347_v0 = vmax.f32 %v3559_v5, 0.0  ;;  %v4348_v15 = vmax.f32 %v3636_v35, 0.0  ;;  %v1092_v24 = vpop.f32.mrb[30].mxu1 }
 0x12c   : > { %v1226_v1 = vmul.f32 %v1037_v52, %v3511_v9  ;;  %v1228_v18 = vmul.f32 %v1090_v55, %v3511_v9  ;;  %v1265_v16 = vadd.f32 %v1225_v49, %v3535_v44  ;;  %v1267_v54 = vadd.f32 %v1227_v3, %v3535_v44  ;;  %v1094_v60 = vpop.f32.mrb[31].mxu1 }
 0x12d   : > { %v3817_v21 = vmax.f32 %v4347_v0, %v1296_v59  ;;  %v3821_v19 = vmax.f32 %v4348_v15, %v1298_v43  ;;  %v1235_v63 = vmul.f32 %v1039_v12, %v3515_v14  ;;  %v1237_v5 = vmul.f32 %v1092_v24, %v3515_v14  ;;  %v1041_v59 = vpop.f32.mrb[31].mxu0 }
 0x12e   : > { %v1266_v35 = vadd.f32 %v1226_v1, %v3535_v44  ;;  %v1268_v43 = vadd.f32 %v1228_v18, %v3535_v44  ;;  %v1236_v45 = vmul.f32 %v1041_v59, %v3515_v14  ;;  %v1238_v58 = vmul.f32 %v1094_v60, %v3515_v14 }
 0x12f   : > { %v1305_v37 = vmax.f32 %v1265_v16, 0.0  ;;  %v1307_v52 = vmax.f32 %v1267_v54, 0.0  ;;  %v1275_v49 = vadd.f32 %v1235_v63, %v3541_v47  ;;  %v1277_v3 = vadd.f32 %v1237_v5, %v3541_v47 }
 0x130   : > { %v1306_v55 = vmax.f32 %v1266_v35, 0.0  ;;  %v1308_v0 = vmax.f32 %v1268_v43, 0.0  ;;  %v1276_v15 = vadd.f32 %v1236_v45, %v3541_v47  ;;  %v1278_v12 = vadd.f32 %v1238_v58, %v3541_v47  ;;  %v1131_v58 = vpop.f32.mrb[32].mxu0 }
 0x131   : > { %v4349_v1 = vmax.f32 %v3567_v53, 0.0  ;;  %v4350_v18 = vmax.f32 %v3643_v36, 0.0  ;;  %v1315_v16 = vmax.f32 %v1275_v49, 0.0  ;;  %v1317_v54 = vmax.f32 %v1277_v3, 0.0  ;;  %v1184_v53 = vpop.f32.mrb[32].mxu1  ;;  %v1133_v3 = vpop.f32.mrb[33].mxu0 }
 0x132   : > { %v4351_v63 = vmax.f32 %v3579_v7, 0.0  ;;  %v4352_v5 = vmax.f32 %v3651_v32, 0.0  ;;  %v1316_v43 = vmax.f32 %v1276_v15, 0.0  ;;  %v1318_v45 = vmax.f32 %v1278_v12, 0.0  ;;  %v1186_v32 = vpop.f32.mrb[33].mxu1 }
 0x133   : > { %v3839_v24 = vmax.f32 %v4349_v1, %v1305_v37  ;;  %v3843_v59 = vmax.f32 %v4350_v18, %v1307_v52  ;;  %v4353_v37 = vmax.f32 %v3597_v26, 0.0  ;;  %v4354_v36 = vmax.f32 %v3668_v38, 0.0  ;;  %v1135_v18 = vpop.f32.mrb[34].mxu0 }
 0x134   : > { %v3847_v60 = vmax.f32 %v4351_v63, %v1306_v55  ;;  %v3851_v35 = vmax.f32 %v4352_v5, %v1308_v0  ;;  %v1209_v7 = vmul.f32 %v1131_v58, %v3509_v13  ;;  %v1211_v49 = vmul.f32 %v1184_v53, %v3509_v13 }
 0x135   : > { %v3855_v1 = vmax.f32 %v4353_v37, %v1315_v16  ;;  %v3859_v52 = vmax.f32 %v4354_v36, %v1317_v54  ;;  %v4355_v55 = vmax.f32 %v3603_v30, 0.0  ;;  %v4356_v15 = vmax.f32 %v3678_v17, 0.0  ;;  %v1188_v16 = vpop.f32.mrb[34].mxu1 }
 0x136   : > { %v1210_v26 = vmul.f32 %v1133_v3, %v3509_v13  ;;  %v1212_v38 = vmul.f32 %v1186_v32, %v3509_v13  ;;  %v1249_v54 = vadd.f32 %v1209_v7, %v3517_v22  ;;  %v1251_v63 = vadd.f32 %v1211_v49, %v3517_v22  ;;  %v1190_v58 = vpop.f32.mrb[35].mxu1 }
 0x137   : > { %v3865_v0 = vmax.f32 %v4355_v55, %v1316_v43  ;;  %v3869_v12 = vmax.f32 %v4356_v15, %v1318_v45  ;;  %v1219_v5 = vmul.f32 %v1135_v18, %v3513_v10  ;;  %v1221_v30 = vmul.f32 %v1188_v16, %v3513_v10  ;;  %v1137_v43 = vpop.f32.mrb[35].mxu0 }
 0x138   : > { %v1250_v17 = vadd.f32 %v1210_v26, %v3517_v22  ;;  %v1252_v45 = vadd.f32 %v1212_v38, %v3517_v22  ;;  %v1220_v53 = vmul.f32 %v1137_v43, %v3513_v10  ;;  %v1222_v37 = vmul.f32 %v1190_v58, %v3513_v10 }
 0x139   : > { %v1289_v36 = vmax.f32 %v1249_v54, 0.0  ;;  %v1291_v3 = vmax.f32 %v1251_v63, 0.0  ;;  %v1259_v7 = vadd.f32 %v1219_v5, %v3519_v23  ;;  %v1261_v49 = vadd.f32 %v1221_v30, %v3519_v23 }
 0x13a   : > { %v1290_v32 = vmax.f32 %v1250_v17, 0.0  ;;  %v1292_v55 = vmax.f32 %v1252_v45, 0.0  ;;  %v1260_v15 = vadd.f32 %v1220_v53, %v3519_v23  ;;  %v1262_v18 = vadd.f32 %v1222_v37, %v3519_v23  ;;  %v1141_v37 = vpop.f32.mrb[36].mxu0 }
 0x13b   : > { %v4357_v26 = vmax.f32 %v3616_v50, 0.0  ;;  %v4358_v38 = vmax.f32 %v3702_v2, 0.0  ;;  %v1299_v54 = vmax.f32 %v1259_v7, 0.0  ;;  %v1301_v63 = vmax.f32 %v1261_v49, 0.0  ;;  %v1194_v50 = vpop.f32.mrb[36].mxu1  ;;  %v1143_v49 = vpop.f32.mrb[37].mxu0 }
 0x13c   : > { %v4359_v5 = vmax.f32 %v3625_v56, 0.0  ;;  %v4360_v30 = vmax.f32 %v3705_v4, 0.0  ;;  %v1300_v45 = vmax.f32 %v1260_v15, 0.0  ;;  %v1302_v53 = vmax.f32 %v1262_v18, 0.0  ;;  %v1196_v4 = vpop.f32.mrb[37].mxu1 }
 0x13d   : > { %v3887_v16 = vmax.f32 %v4357_v26, %v1289_v36  ;;  %v3891_v43 = vmax.f32 %v4358_v38, %v1291_v3  ;;  %v4361_v36 = vmax.f32 %v3633_v39, 0.0  ;;  %v4362_v2 = vmax.f32 %v3712_v29, 0.0  ;;  %v1145_v38 = vpop.f32.mrb[38].mxu0 }
 0x13e   : > { %v3895_v58 = vmax.f32 %v4359_v5, %v1290_v32  ;;  %v3899_v17 = vmax.f32 %v4360_v30, %v1292_v55  ;;  %v1229_v56 = vmul.f32 %v1141_v37, %v3511_v9  ;;  %v1231_v7 = vmul.f32 %v1194_v50, %v3511_v9 }
 0x13f   : > { %v3903_v26 = vmax.f32 %v4361_v36, %v1299_v54  ;;  %v3907_v3 = vmax.f32 %v4362_v2, %v1301_v63  ;;  %v4363_v32 = vmax.f32 %v3639_v27, 0.0  ;;  %v4364_v15 = vmax.f32 %v3721_v48, 0.0  ;;  %v1198_v54 = vpop.f32.mrb[38].mxu1 }
 0x140   : > { %v1230_v39 = vmul.f32 %v1143_v49, %v3511_v9  ;;  %v1232_v29 = vmul.f32 %v1196_v4, %v3511_v9  ;;  %v1269_v63 = vadd.f32 %v1229_v56, %v3535_v44  ;;  %v1271_v5 = vadd.f32 %v1231_v7, %v3535_v44  ;;  %v1200_v37 = vpop.f32.mrb[39].mxu1 }
 0x141   : > { %v3913_v55 = vmax.f32 %v4363_v32, %v1300_v45  ;;  %v3917_v18 = vmax.f32 %v4364_v15, %v1302_v53  ;;  %v1239_v30 = vmul.f32 %v1145_v38, %v3515_v14  ;;  %v1241_v27 = vmul.f32 %v1198_v54, %v3515_v14  ;;  %v1147_v45 = vpop.f32.mrb[39].mxu0 }
 0x142   : > { %v1270_v48 = vadd.f32 %v1230_v39, %v3535_v44  ;;  %v1272_v53 = vadd.f32 %v1232_v29, %v3535_v44  ;;  %v1240_v50 = vmul.f32 %v1147_v45, %v3515_v14  ;;  %v1242_v36 = vmul.f32 %v1200_v37, %v3515_v14 }
 0x143   : > { %v1309_v2 = vmax.f32 %v1269_v63, 0.0  ;;  %v1311_v49 = vmax.f32 %v1271_v5, 0.0  ;;  %v1279_v56 = vadd.f32 %v1239_v30, %v3541_v47  ;;  %v1281_v7 = vadd.f32 %v1241_v27, %v3541_v47 }
 0x144   : > { %v1310_v4 = vmax.f32 %v1270_v48, 0.0  ;;  %v1312_v32 = vmax.f32 %v1272_v53, 0.0  ;;  %v1280_v15 = vadd.f32 %v1240_v50, %v3541_v47  ;;  %v1282_v38 = vadd.f32 %v1242_v36, %v3541_v47  ;;  %v1538_v36 = vpop.f32.mrb[40].mxu0 }
 0x145   : > { %v4365_v39 = vmax.f32 %v3646_v41, 0.0  ;;  %v4366_v29 = vmax.f32 %v3730_v11, 0.0  ;;  %v1319_v63 = vmax.f32 %v1279_v56, 0.0  ;;  %v1321_v5 = vmax.f32 %v1281_v7, 0.0  ;;  %v1591_v41 = vpop.f32.mrb[40].mxu1  ;;  %v1540_v7 = vpop.f32.mrb[41].mxu0 }
 0x146   : > { %v4367_v30 = vmax.f32 %v3654_v33, 0.0  ;;  %v4368_v27 = vmax.f32 %v3736_v61, 0.0  ;;  %v1320_v53 = vmax.f32 %v1280_v15, 0.0  ;;  %v1322_v50 = vmax.f32 %v1282_v38, 0.0  ;;  %v1593_v61 = vpop.f32.mrb[41].mxu1 }
 0x147   : > { %v3935_v54 = vmax.f32 %v4365_v39, %v1309_v2  ;;  %v3939_v45 = vmax.f32 %v4366_v29, %v1311_v49  ;;  %v4369_v2 = vmax.f32 %v3674_v51, 0.0  ;;  %v4370_v11 = vmax.f32 %v3743_v46, 0.0  ;;  %v1542_v29 = vpop.f32.mrb[42].mxu0 }
 0x148   : > { %v3943_v37 = vmax.f32 %v4367_v30, %v1310_v4  ;;  %v3947_v48 = vmax.f32 %v4368_v27, %v1312_v32  ;;  %v1769_v33 = vmul.f32 %v1538_v36, %v3509_v13  ;;  %v1771_v56 = vmul.f32 %v1591_v41, %v3509_v13 }
 0x149   : > { %v3951_v39 = vmax.f32 %v4369_v2, %v1319_v63  ;;  %v3955_v49 = vmax.f32 %v4370_v11, %v1321_v5  ;;  %v4371_v4 = vmax.f32 %v3681_v31, 0.0  ;;  %v4372_v15 = vmax.f32 %v3748_v34, 0.0  ;;  %v1595_v63 = vpop.f32.mrb[42].mxu1 }
 0x14a   : > { %v1770_v51 = vmul.f32 %v1540_v7, %v3509_v13  ;;  %v1772_v46 = vmul.f32 %v1593_v61, %v3509_v13  ;;  %v1809_v5 = vadd.f32 %v1769_v33, %v3517_v22  ;;  %v1811_v30 = vadd.f32 %v1771_v56, %v3517_v22  ;;  %v1597_v36 = vpop.f32.mrb[43].mxu1 }
 0x14b   : > { %v3961_v32 = vmax.f32 %v4371_v4, %v1320_v53  ;;  %v3965_v38 = vmax.f32 %v4372_v15, %v1322_v50  ;;  %v1779_v27 = vmul.f32 %v1542_v29, %v3513_v10  ;;  %v1781_v31 = vmul.f32 %v1595_v63, %v3513_v10  ;;  %v1544_v53 = vpop.f32.mrb[43].mxu0 }
 0x14c   : > { %v1810_v34 = vadd.f32 %v1770_v51, %v3517_v22  ;;  %v1812_v50 = vadd.f32 %v1772_v46, %v3517_v22  ;;  %v1780_v41 = vmul.f32 %v1544_v53, %v3513_v10  ;;  %v1782_v2 = vmul.f32 %v1597_v36, %v3513_v10  ;;  %v1548_v36 = vpop.f32.mrb[44].mxu0 }
 0x14d   : > { %v1849_v11 = vmax.f32 %v1809_v5, 0.0  ;;  %v1851_v7 = vmax.f32 %v1811_v30, 0.0  ;;  %v1819_v33 = vadd.f32 %v1779_v27, %v3519_v23  ;;  %v1821_v56 = vadd.f32 %v1781_v31, %v3519_v23 }
 0x14e   : > { %v1850_v61 = vmax.f32 %v1810_v34, 0.0  ;;  %v1852_v4 = vmax.f32 %v1812_v50, 0.0  ;;  %v1820_v15 = vadd.f32 %v1780_v41, %v3519_v23  ;;  %v1822_v29 = vadd.f32 %v1782_v2, %v3519_v23  ;;  %v1601_v34 = vpop.f32.mrb[44].mxu1  ;;  %v1550_v2 = vpop.f32.mrb[45].mxu0 }
 0x14f   : > { %v3982_v51 = vmax.f32 %v3699_v28, %v1849_v11  ;;  %v3985_v46 = vmax.f32 %v3791_v57, %v1851_v7  ;;  %v1859_v63 = vmax.f32 %v1819_v33, 0.0  ;;  %v1861_v53 = vmax.f32 %v1821_v56, 0.0  ;;  %v4374_v11 = vld [vmem:[#allocation2_spill] sm:$0xff]  ;;  %v1552_v56 = vpop.f32.mrb[46].mxu0 }
 0x150   : > { %v3988_v5 = vmax.f32 %v3709_v8, %v1850_v61  ;;  %v3991_v30 = vmax.f32 %v3799_v6, %v1852_v4  ;;  %v1860_v27 = vmax.f32 %v1820_v15, 0.0  ;;  %v1862_v31 = vmax.f32 %v1822_v29, 0.0  ;;  %v1603_v8 = vpop.f32.mrb[45].mxu1 }
 0x151   : > { %v3994_v50 = vmax.f32 %v3716_v42, %v1859_v63  ;;  %v3997_v28 = vmax.f32 %v3807_v40, %v1861_v53  ;;  %v1789_v57 = vmul.f32 %v1548_v36, %v3511_v9  ;;  %v1791_v41 = vmul.f32 %v1601_v34, %v3511_v9  ;;  %v1605_v61 = vpop.f32.mrb[46].mxu1  ;;  %v1554_v63 = vpop.f32.mrb[47].mxu0 }
 0x152   : > { %v4002_v7 = vmax.f32 %v4374_v11, %v1860_v27  ;;  %v4005_v6 = vmax.f32 %v3817_v21, %v1862_v31  ;;  %v1790_v33 = vmul.f32 %v1550_v2, %v3511_v9  ;;  %v1792_v42 = vmul.f32 %v1603_v8, %v3511_v9  ;;  %v1607_v53 = vpop.f32.mrb[47].mxu1 }
 0x153   : > { %4373 = vst [vmem:[#allocation7_spill] sm:$0xff] %v3997_v28  ;;  %v1829_v40 = vadd.f32 %v1789_v57, %v3535_v44  ;;  %v1831_v4 = vadd.f32 %v1791_v41, %v3535_v44  ;;  %v1799_v15 = vmul.f32 %v1552_v56, %v3515_v14  ;;  %v1801_v29 = vmul.f32 %v1605_v61, %v3515_v14  ;;  %v4378_v28 = vld [vmem:[#allocation5_spill] sm:$0xff] }
 0x154   : > { %4375 = vst [vmem:[#allocation2_spill] sm:$0xff] %v4005_v6  ;;  %v1830_v27 = vadd.f32 %v1790_v33, %v3535_v44  ;;  %v1832_v21 = vadd.f32 %v1792_v42, %v3535_v44  ;;  %v1800_v31 = vmul.f32 %v1554_v63, %v3515_v14  ;;  %v1802_v36 = vmul.f32 %v1607_v53, %v3515_v14  ;;  %v4376_v6 = vld [vmem:[#allocation3_spill] sm:$0xff] }
 0x155   : > { %v1869_v34 = vmax.f32 %v1829_v40, 0.0  ;;  %v1871_v2 = vmax.f32 %v1831_v4, 0.0  ;;  %v1839_v57 = vadd.f32 %v1799_v15, %v3541_v47  ;;  %v1841_v41 = vadd.f32 %v1801_v29, %v3541_v47  ;;  %v4377_v40 = vld [vmem:[#allocation4_spill] sm:$0xff] }
 0x156   : > { %v1870_v8 = vmax.f32 %v1830_v27, 0.0  ;;  %v1872_v11 = vmax.f32 %v1832_v21, 0.0  ;;  %v1840_v56 = vadd.f32 %v1800_v31, %v3541_v47  ;;  %v1842_v61 = vadd.f32 %v1802_v36, %v3541_v47  ;;  %v1644_v21 = vpop.f32.mrb[48].mxu0  ;;  %v1697_v31 = vpop.f32.mrb[48].mxu1 }
 0x157   : > { %v4022_v33 = vmax.f32 %v4376_v6, %v1869_v34  ;;  %v4025_v42 = vmax.f32 %v3839_v24, %v1871_v2  ;;  %v1879_v63 = vmax.f32 %v1839_v57, 0.0  ;;  %v1881_v53 = vmax.f32 %v1841_v41, 0.0  ;;  %v1646_v2 = vpop.f32.mrb[49].mxu0  ;;  %v1699_v57 = vpop.f32.mrb[49].mxu1  ;;  %v4380_v41 = vld [vmem:[#allocation6_spill] sm:$0xff] }
 0x158   : > { %v4028_v4 = vmax.f32 %v4377_v40, %v1870_v8  ;;  %v4031_v15 = vmax.f32 %v3847_v60, %v1872_v11  ;;  %v1880_v29 = vmax.f32 %v1840_v56, 0.0  ;;  %v1882_v27 = vmax.f32 %v1842_v61, 0.0  ;;  %v1648_v56 = vpop.f32.mrb[50].mxu0  ;;  %v1701_v61 = vpop.f32.mrb[50].mxu1 }
 0x159   : > { %v4034_v36 = vmax.f32 %v4378_v28, %v1879_v63  ;;  %v4037_v6 = vmax.f32 %v3855_v1, %v1881_v53  ;;  %v1773_v24 = vmul.f32 %v1644_v21, %v3509_v13  ;;  %v1775_v34 = vmul.f32 %v1697_v31, %v3509_v13  ;;  %v1650_v21 = vpop.f32.mrb[51].mxu0 }
 0x15a   : > { %v4042_v8 = vmax.f32 %v4380_v41, %v1880_v29  ;;  %v4045_v60 = vmax.f32 %v3865_v0, %v1882_v27  ;;  %v1774_v11 = vmul.f32 %v1646_v2, %v3509_v13  ;;  %v1776_v28 = vmul.f32 %v1699_v57, %v3509_v13  ;;  %v1703_v29 = vpop.f32.mrb[51].mxu1 }
 0x15b   : > { %4379 = vst [vmem:[#allocation3_spill] sm:$0xff] %v4037_v6  ;;  %v1813_v1 = vadd.f32 %v1773_v24, %v3517_v22  ;;  %v1815_v63 = vadd.f32 %v1775_v34, %v3517_v22  ;;  %v1783_v53 = vmul.f32 %v1648_v56, %v3513_v10  ;;  %v1785_v40 = vmul.f32 %v1701_v61, %v3513_v10 }
 0x15c   : > { %4381 = vst [vmem:[#allocation4_spill] sm:$0xff] %v4045_v60  ;;  %v1814_v31 = vadd.f32 %v1774_v11, %v3517_v22  ;;  %v1816_v0 = vadd.f32 %v1776_v28, %v3517_v22  ;;  %v1784_v27 = vmul.f32 %v1650_v21, %v3513_v10  ;;  %v1786_v2 = vmul.f32 %v1703_v29, %v3513_v10 }
 0x15d   : > { %v1853_v57 = vmax.f32 %v1813_v1, 0.0  ;;  %v1855_v41 = vmax.f32 %v1815_v63, 0.0  ;;  %v1823_v24 = vadd.f32 %v1783_v53, %v3519_v23  ;;  %v1825_v34 = vadd.f32 %v1785_v40, %v3519_v23 }
 0x15e   : > { %v1854_v60 = vmax.f32 %v1814_v31, 0.0  ;;  %v1856_v56 = vmax.f32 %v1816_v0, 0.0  ;;  %v1824_v61 = vadd.f32 %v1784_v27, %v3519_v23  ;;  %v1826_v6 = vadd.f32 %v1786_v2, %v3519_v23  ;;  %v1654_v31 = vpop.f32.mrb[52].mxu0  ;;  %v1707_v0 = vpop.f32.mrb[52].mxu1 }
 0x15f   : > { %v4062_v11 = vmax.f32 %v3795_v20, %v1853_v57  ;;  %v4065_v28 = vmax.f32 %v3887_v16, %v1855_v41  ;;  %v1863_v21 = vmax.f32 %v1823_v24, 0.0  ;;  %v1865_v29 = vmax.f32 %v1825_v34, 0.0  ;;  %v1656_v57 = vpop.f32.mrb[53].mxu0 }
 0x160   : > { %v4068_v1 = vmax.f32 %v3803_v25, %v1854_v60  ;;  %v4071_v63 = vmax.f32 %v3895_v58, %v1856_v56  ;;  %v1864_v53 = vmax.f32 %v1824_v61, 0.0  ;;  %v1866_v40 = vmax.f32 %v1826_v6, 0.0  ;;  %v1709_v25 = vpop.f32.mrb[53].mxu1  ;;  %v1658_v41 = vpop.f32.mrb[54].mxu0 }
 0x161   : > { %v4074_v27 = vmax.f32 %v3811_v62, %v1863_v21  ;;  %v4077_v20 = vmax.f32 %v3903_v26, %v1865_v29  ;;  %v1793_v16 = vmul.f32 %v1654_v31, %v3511_v9  ;;  %v1795_v2 = vmul.f32 %v1707_v0, %v3511_v9  ;;  %v1711_v24 = vpop.f32.mrb[54].mxu1  ;;  %v1660_v21 = vpop.f32.mrb[55].mxu0 }
 0x162   : > { %v4082_v60 = vmax.f32 %v3821_v19, %v1864_v53  ;;  %v4085_v58 = vmax.f32 %v3913_v55, %v1866_v40  ;;  %v1794_v6 = vmul.f32 %v1656_v57, %v3511_v9  ;;  %v1796_v62 = vmul.f32 %v1709_v25, %v3511_v9  ;;  %v1713_v19 = vpop.f32.mrb[55].mxu1 }
 0x163   : > { %v1833_v26 = vadd.f32 %v1793_v16, %v3535_v44  ;;  %v1835_v34 = vadd.f32 %v1795_v2, %v3535_v44  ;;  %v1803_v56 = vmul.f32 %v1658_v41, %v3515_v14  ;;  %v1805_v61 = vmul.f32 %v1711_v24, %v3515_v14 }
 0x164   : > { %v1834_v29 = vadd.f32 %v1794_v6, %v3535_v44  ;;  %v1836_v55 = vadd.f32 %v1796_v62, %v3535_v44  ;;  %v1804_v53 = vmul.f32 %v1660_v21, %v3515_v14  ;;  %v1806_v40 = vmul.f32 %v1713_v19, %v3515_v14 }
 0x165   : > { %v1873_v31 = vmax.f32 %v1833_v26, 0.0  ;;  %v1875_v0 = vmax.f32 %v1835_v34, 0.0  ;;  %v1843_v16 = vadd.f32 %v1803_v56, %v3541_v47  ;;  %v1845_v2 = vadd.f32 %v1805_v61, %v3541_v47 }
 0x166   : > { %v1874_v57 = vmax.f32 %v1834_v29, 0.0  ;;  %v1876_v25 = vmax.f32 %v1836_v55, 0.0  ;;  %v1844_v41 = vadd.f32 %v1804_v53, %v3541_v47  ;;  %v1846_v24 = vadd.f32 %v1806_v40, %v3541_v47  ;;  %v1750_v29 = vpop.f32.mrb[56].mxu0  ;;  %v2104_v55 = vpop.f32.mrb[56].mxu1 }
 0x167   : > { %v4102_v6 = vmax.f32 %v3843_v59, %v1873_v31  ;;  %v4105_v62 = vmax.f32 %v3935_v54, %v1875_v0  ;;  %v1883_v21 = vmax.f32 %v1843_v16, 0.0  ;;  %v1885_v19 = vmax.f32 %v1845_v2, 0.0  ;;  %v1752_v31 = vpop.f32.mrb[57].mxu0 }
 0x168   : > { %v4108_v26 = vmax.f32 %v3851_v35, %v1874_v57  ;;  %v4111_v34 = vmax.f32 %v3943_v37, %v1876_v25  ;;  %v1884_v56 = vmax.f32 %v1844_v41, 0.0  ;;  %v1886_v61 = vmax.f32 %v1846_v24, 0.0  ;;  %v2106_v35 = vpop.f32.mrb[57].mxu1  ;;  %v1754_v2 = vpop.f32.mrb[58].mxu0 }
 0x169   : > { %v4114_v53 = vmax.f32 %v3859_v52, %v1883_v21  ;;  %v4117_v59 = vmax.f32 %v3951_v39, %v1885_v19  ;;  %v1777_v54 = vmul.f32 %v1750_v29, %v3509_v13  ;;  %v2335_v40 = vmul.f32 %v2104_v55, %v3509_v13  ;;  %v2108_v39 = vpop.f32.mrb[58].mxu1 }
 0x16a   : > { %v4122_v0 = vmax.f32 %v3869_v12, %v1884_v56  ;;  %v4125_v37 = vmax.f32 %v3961_v32, %v1886_v61  ;;  %v1778_v16 = vmul.f32 %v1752_v31, %v3509_v13  ;;  %v2336_v52 = vmul.f32 %v2106_v35, %v3509_v13  ;;  %v1756_v12 = vpop.f32.mrb[59].mxu0  ;;  %v2110_v21 = vpop.f32.mrb[59].mxu1 }
 0x16b   : > { %v1817_v57 = vadd.f32 %v1777_v54, %v3517_v22  ;;  %v2375_v25 = vadd.f32 %v2335_v40, %v3517_v22  ;;  %v1787_v41 = vmul.f32 %v1754_v2, %v3513_v10  ;;  %v2345_v24 = vmul.f32 %v2108_v39, %v3513_v10 }
 0x16c   : > { %v1818_v32 = vadd.f32 %v1778_v16, %v3517_v22  ;;  %v2376_v19 = vadd.f32 %v2336_v52, %v3517_v22  ;;  %v1788_v56 = vmul.f32 %v1756_v12, %v3513_v10  ;;  %v2346_v61 = vmul.f32 %v2110_v21, %v3513_v10 }
 0x16d   : > { %v1857_v29 = vmax.f32 %v1817_v57, 0.0  ;;  %v2415_v55 = vmax.f32 %v2375_v25, 0.0  ;;  %v1827_v54 = vadd.f32 %v1787_v41, %v3519_v23  ;;  %v2385_v40 = vadd.f32 %v2345_v24, %v3519_v23 }
 0x16e   : > { %v1858_v31 = vmax.f32 %v1818_v32, 0.0  ;;  %v2416_v35 = vmax.f32 %v2376_v19, 0.0  ;;  %v1828_v2 = vadd.f32 %v1788_v56, %v3519_v23  ;;  %v2386_v39 = vadd.f32 %v2346_v61, %v3519_v23  ;;  %v1760_v32 = vpop.f32.mrb[60].mxu0  ;;  %v2114_v19 = vpop.f32.mrb[60].mxu1 }
 0x16f   : > { %v4143_v16 = vmax.f32 %v3891_v43, %v1857_v29  ;;  %v2455_v52 = vmax.f32 %v3982_v51, %v2415_v55  ;;  %v1867_v12 = vmax.f32 %v1827_v54, 0.0  ;;  %v2425_v21 = vmax.f32 %v2385_v40, 0.0  ;;  %v2116_v61 = vpop.f32.mrb[61].mxu1 }
 0x170   : > { %v4147_v57 = vmax.f32 %v3899_v17, %v1858_v31  ;;  %v2456_v25 = vmax.f32 %v3988_v5, %v2416_v35  ;;  %v1868_v41 = vmax.f32 %v1828_v2, 0.0  ;;  %v2426_v24 = vmax.f32 %v2386_v39, 0.0  ;;  %v1762_v5 = vpop.f32.mrb[61].mxu0 }
 0x171   : > { %v4156_v43 = vmax.f32 %v3907_v3, %v1867_v12  ;;  %v2465_v51 = vmax.f32 %v3994_v50, %v2425_v21  ;;  %v1797_v56 = vmul.f32 %v1760_v32, %v3511_v9  ;;  %v2355_v17 = vmul.f32 %v2114_v19, %v3511_v9  ;;  %v1764_v31 = vpop.f32.mrb[62].mxu0  ;;  %v2118_v3 = vpop.f32.mrb[62].mxu1 }
 0x172   : > { %v2904_v29 = vpack.c.bf16 %v2456_v25, %v2455_v52  ;;  %v4162_v55 = vmax.f32 %v3917_v18, %v1868_v41  ;;  %v2466_v54 = vmax.f32 %v4002_v7, %v2426_v24  ;;  %v1798_v40 = vmul.f32 %v1762_v5, %v3511_v9  ;;  %v1766_v12 = vpop.f32.mrb[63].mxu0  ;;  %v2120_v52 = vpop.f32.mrb[63].mxu1 }
 0x173   : > { %v1837_v50 = vadd.f32 %v1797_v56, %v3535_v44  ;;  %v2395_v35 = vadd.f32 %v2355_v17, %v3535_v44  ;;  %v2356_v2 = vmul.f32 %v2116_v61, %v3511_v9  ;;  %v1807_v39 = vmul.f32 %v1764_v31, %v3515_v14 }
 0x174   : > { %2615 = vst [vmem:[%s4153_s19] sm:$0xff] %v2904_v29  ;;  %v2909_v18 = vpack.c.bf16 %v2466_v54, %v2465_v51  ;;  %v1838_v21 = vadd.f32 %v1798_v40, %v3535_v44  ;;  %v2365_v7 = vmul.f32 %v2118_v3, %v3515_v14  ;;  %v1808_v25 = vmul.f32 %v1766_v12, %v3515_v14 }
 0x175   : > { %v1877_v41 = vmax.f32 %v1837_v50, 0.0  ;;  %v2435_v24 = vmax.f32 %v2395_v35, 0.0  ;;  %v2396_v32 = vadd.f32 %v2356_v2, %v3535_v44  ;;  %v1847_v19 = vadd.f32 %v1807_v39, %v3541_v47  ;;  %v2157_v2 = vpop.f32.mrb[64].mxu0  ;;  %v2210_v39 = vpop.f32.mrb[64].mxu1 }
 0x176   : > { %2623 = vst [vmem:[%s4153_s19 + $0x28] sm:$0xff] %v2909_v18  ;;  %v1878_v56 = vmax.f32 %v1838_v21, 0.0  ;;  %v2405_v17 = vadd.f32 %v2365_v7, %v3541_v47  ;;  %v1848_v5 = vadd.f32 %v1808_v25, %v3541_v47  ;;  %v2366_v51 = vmul.f32 %v2120_v52, %v3515_v14  ;;  %v2159_v18 = vpop.f32.mrb[65].mxu0  ;;  %v2212_v21 = vpop.f32.mrb[65].mxu1 }
 0x177   : > { %v4181_v61 = vmax.f32 %v3939_v45, %v1877_v41  ;;  %v2475_v29 = vmax.f32 %v4022_v33, %v2435_v24  ;;  %v2436_v54 = vmax.f32 %v2396_v32, 0.0  ;;  %v1887_v40 = vmax.f32 %v1847_v19, 0.0  ;;  %v2161_v24 = vpop.f32.mrb[66].mxu0 }
 0x178   : > { %v4185_v31 = vmax.f32 %v3947_v48, %v1878_v56  ;;  %v2445_v3 = vmax.f32 %v2405_v17, 0.0  ;;  %v1888_v50 = vmax.f32 %v1848_v5, 0.0  ;;  %v2406_v35 = vadd.f32 %v2366_v51, %v3541_v47  ;;  %v2163_v17 = vpop.f32.mrb[67].mxu0 }
 0x179   : > { %v2476_v12 = vmax.f32 %v4028_v4, %v2436_v54  ;;  %v4190_v52 = vmax.f32 %v3955_v49, %v1887_v40  ;;  %v2337_v45 = vmul.f32 %v2157_v2, %v3509_v13  ;;  %v2339_v33 = vmul.f32 %v2210_v39, %v3509_v13  ;;  %v2214_v4 = vpop.f32.mrb[66].mxu1 }
 0x17a   : > { %v2485_v48 = vmax.f32 %v4034_v36, %v2445_v3  ;;  %v4196_v7 = vmax.f32 %v3965_v38, %v1888_v50  ;;  %v2446_v25 = vmax.f32 %v2406_v35, 0.0  ;;  %v2338_v41 = vmul.f32 %v2159_v18, %v3509_v13  ;;  %v2216_v5 = vpop.f32.mrb[67].mxu1 }
 0x17b   : > { %v2914_v32 = vpack.c.bf16 %v2476_v12, %v2475_v29  ;;  %v2377_v49 = vadd.f32 %v2337_v45, %v3517_v22  ;;  %v2379_v19 = vadd.f32 %v2339_v33, %v3517_v22  ;;  %v2340_v56 = vmul.f32 %v2212_v21, %v3509_v13 }
 0x17c   : > { %v2486_v36 = vmax.f32 %v4042_v8, %v2446_v25  ;;  %v2378_v51 = vadd.f32 %v2338_v41, %v3517_v22  ;;  %v2347_v38 = vmul.f32 %v2161_v24, %v3513_v10  ;;  %v2349_v54 = vmul.f32 %v2214_v4, %v3513_v10  ;;  %v2220_v4 = vpop.f32.mrb[68].mxu1 }
 0x17d   : > { %2628 = vst [vmem:[%s4153_s19 + $0x50] sm:$0xff] %v2914_v32  ;;  %v2417_v40 = vmax.f32 %v2377_v49, 0.0  ;;  %v2419_v29 = vmax.f32 %v2379_v19, 0.0  ;;  %v2380_v3 = vadd.f32 %v2340_v56, %v3517_v22  ;;  %v2348_v50 = vmul.f32 %v2163_v17, %v3513_v10  ;;  %v2222_v56 = vpop.f32.mrb[69].mxu1 }
 0x17e   : > { %v2919_v35 = vpack.c.bf16 %v2486_v36, %v2485_v48  ;;  %v2418_v2 = vmax.f32 %v2378_v51, 0.0  ;;  %v2387_v39 = vadd.f32 %v2347_v38, %v3519_v23  ;;  %v2389_v8 = vadd.f32 %v2349_v54, %v3519_v23  ;;  %v2167_v48 = vpop.f32.mrb[68].mxu0  ;;  %v4382_v36 = vld [vmem:[#allocation7_spill] sm:$0xff]  ;;  %v2224_v54 = vpop.f32.mrb[70].mxu1 }
 0x17f   : > { %v2457_v12 = vmax.f32 %v3985_v46, %v2417_v40  ;;  %v2459_v45 = vmax.f32 %v4062_v11, %v2419_v29  ;;  %v2420_v33 = vmax.f32 %v2380_v3, 0.0  ;;  %v2388_v18 = vadd.f32 %v2348_v50, %v3519_v23  ;;  %v2169_v11 = vpop.f32.mrb[69].mxu0 }
 0x180   : > { %2633 = vst [vmem:[%s4153_s19 + $0x78] sm:$0xff] %v2919_v35  ;;  %v2458_v21 = vmax.f32 %v3991_v30, %v2418_v2  ;;  %v2427_v25 = vmax.f32 %v2387_v39, 0.0  ;;  %v2429_v41 = vmax.f32 %v2389_v8, 0.0  ;;  %v2350_v24 = vmul.f32 %v2216_v5, %v3513_v10  ;;  %v2171_v38 = vpop.f32.mrb[70].mxu0  ;;  %v2226_v2 = vpop.f32.mrb[71].mxu1 }
 0x181   : > { %v2460_v32 = vmax.f32 %v4068_v1, %v2420_v33  ;;  %v2428_v49 = vmax.f32 %v2388_v18, 0.0  ;;  %v2357_v19 = vmul.f32 %v2167_v48, %v3511_v9  ;;  %v2359_v46 = vmul.f32 %v2220_v4, %v3511_v9  ;;  %v4383_v1 = vld [vmem:[#allocation2_spill] sm:$0xff]  ;;  %v2173_v35 = vpop.f32.mrb[71].mxu0 }
 0x182   : > { %v2905_v17 = vpack.c.bf16 %v2458_v21, %v2457_v12  ;;  %v2467_v51 = vmax.f32 %v4382_v36, %v2427_v25  ;;  %v2469_v30 = vmax.f32 %v4074_v27, %v2429_v41  ;;  %v2390_v5 = vadd.f32 %v2350_v24, %v3519_v23  ;;  %v2316_v36 = vpop.f32.mrb[72].mxu1 }
 0x183   : > { %v2906_v40 = vpack.c.bf16 %v2460_v32, %v2459_v45  ;;  %v2468_v29 = vmax.f32 %v4383_v1, %v2428_v49  ;;  %v2397_v3 = vadd.f32 %v2357_v19, %v3535_v44  ;;  %v2399_v50 = vadd.f32 %v2359_v46, %v3535_v44  ;;  %v4384_v1 = vld [vmem:[#allocation3_spill] sm:$0xff] }
 0x184   : > { %2616 = vst [vmem:[%s4153_s19 + $0x8] sm:$0xff] %v2905_v17  ;;  %v2430_v39 = vmax.f32 %v2390_v5, 0.0  ;;  %v2358_v8 = vmul.f32 %v2169_v11, %v3511_v9  ;;  %v2360_v27 = vmul.f32 %v2222_v56, %v3511_v9  ;;  %v2367_v12 = vmul.f32 %v2171_v38, %v3515_v14  ;;  %v2263_v17 = vpop.f32.mrb[72].mxu0 }
 0x185   : > { %2617 = vst [vmem:[%s4153_s19 + $0x10] sm:$0xff] %v2906_v40  ;;  %v2910_v33 = vpack.c.bf16 %v2468_v29, %v2467_v51  ;;  %v2437_v45 = vmax.f32 %v2397_v3, 0.0  ;;  %v2439_v18 = vmax.f32 %v2399_v50, 0.0  ;;  %v2369_v21 = vmul.f32 %v2224_v54, %v3515_v14  ;;  %v2265_v54 = vpop.f32.mrb[73].mxu0 }
 0x186   : > { %v2470_v25 = vmax.f32 %v4082_v60, %v2430_v39  ;;  %v2398_v41 = vadd.f32 %v2358_v8, %v3535_v44  ;;  %v2400_v24 = vadd.f32 %v2360_v27, %v3535_v44  ;;  %v2407_v48 = vadd.f32 %v2367_v12, %v3541_v47  ;;  %v2267_v50 = vpop.f32.mrb[74].mxu0 }
 0x187   : > { %2624 = vst [vmem:[%s4153_s19 + $0x30] sm:$0xff] %v2910_v33  ;;  %v2477_v4 = vmax.f32 %v4025_v42, %v2437_v45  ;;  %v2479_v32 = vmax.f32 %v4102_v6, %v2439_v18  ;;  %v2409_v49 = vadd.f32 %v2369_v21, %v3541_v47  ;;  %v2368_v19 = vmul.f32 %v2173_v35, %v3515_v14  ;;  %v2318_v6 = vpop.f32.mrb[73].mxu1  ;;  %v2269_v12 = vpop.f32.mrb[75].mxu0  ;;  %v4385_v21 = vld [vmem:[#allocation4_spill] sm:$0xff] }
 0x188   : > { %v2911_v46 = vpack.c.bf16 %v2470_v25, %v2469_v30  ;;  %v2438_v11 = vmax.f32 %v2398_v41, 0.0  ;;  %v2440_v56 = vmax.f32 %v2400_v24, 0.0  ;;  %v2447_v60 = vmax.f32 %v2407_v48, 0.0  ;;  %v2320_v35 = vpop.f32.mrb[74].mxu1 }
 0x189   : > { %v2449_v51 = vmax.f32 %v2409_v49, 0.0  ;;  %v2408_v5 = vadd.f32 %v2368_v19, %v3541_v47  ;;  %v2370_v38 = vmul.f32 %v2226_v2, %v3515_v14  ;;  %v2341_v42 = vmul.f32 %v2263_v17, %v3509_v13  ;;  %v2322_v33 = vpop.f32.mrb[75].mxu1 }
 0x18a   : > { %2625 = vst [vmem:[%s4153_s19 + $0x38] sm:$0xff] %v2911_v46  ;;  %v2478_v40 = vmax.f32 %v4031_v15, %v2438_v11  ;;  %v2480_v30 = vmax.f32 %v4108_v26, %v2440_v56  ;;  %v2487_v29 = vmax.f32 %v4384_v1, %v2447_v60  ;;  %v2343_v3 = vmul.f32 %v2316_v36, %v3509_v13 }
 0x18b   : > { %v2489_v2 = vmax.f32 %v4114_v53, %v2449_v51  ;;  %v2448_v39 = vmax.f32 %v2408_v5, 0.0  ;;  %v2410_v8 = vadd.f32 %v2370_v38, %v3541_v47  ;;  %v2381_v27 = vadd.f32 %v2341_v42, %v3517_v22  ;;  %v2273_v51 = vpop.f32.mrb[76].mxu0  ;;  %v2326_v5 = vpop.f32.mrb[76].mxu1 }
 0x18c   : > { %v2915_v15 = vpack.c.bf16 %v2478_v40, %v2477_v4  ;;  %v2916_v45 = vpack.c.bf16 %v2480_v30, %v2479_v32  ;;  %v2383_v26 = vadd.f32 %v2343_v3, %v3517_v22  ;;  %v2342_v18 = vmul.f32 %v2265_v54, %v3509_v13 }
 0x18d   : > { %v2488_v25 = vmax.f32 %v4385_v21, %v2448_v39  ;;  %v2450_v41 = vmax.f32 %v2410_v8, 0.0  ;;  %v2421_v24 = vmax.f32 %v2381_v27, 0.0  ;;  %v2344_v48 = vmul.f32 %v2318_v6, %v3509_v13  ;;  %v2328_v6 = vpop.f32.mrb[77].mxu1 }
 0x18e   : > { %2629 = vst [vmem:[%s4153_s19 + $0x58] sm:$0xff] %v2915_v15  ;;  %2630 = vst [vmem:[%s4153_s19 + $0x60] sm:$0xff] %v2916_v45  ;;  %v2423_v53 = vmax.f32 %v2383_v26, 0.0  ;;  %v2382_v49 = vadd.f32 %v2342_v18, %v3517_v22  ;;  %v2351_v19 = vmul.f32 %v2267_v50, %v3513_v10  ;;  %v2353_v4 = vmul.f32 %v2320_v35, %v3513_v10 }
 0x18f   : > { %v2920_v32 = vpack.c.bf16 %v2488_v25, %v2487_v29  ;;  %v2490_v46 = vmax.f32 %v4122_v0, %v2450_v41  ;;  %v2461_v11 = vmax.f32 %v4065_v28, %v2421_v24  ;;  %v2384_v56 = vadd.f32 %v2344_v48, %v3517_v22  ;;  %v2275_v28 = vpop.f32.mrb[77].mxu0  ;;  %v2330_v29 = vpop.f32.mrb[78].mxu1 }
 0x190   : > { %v2463_v60 = vmax.f32 %v4143_v16, %v2423_v53  ;;  %v2422_v13 = vmax.f32 %v2382_v49, 0.0  ;;  %v2391_v17 = vadd.f32 %v2351_v19, %v3519_v23  ;;  %v2393_v36 = vadd.f32 %v2353_v4, %v3519_v23  ;;  %v2277_v1 = vpop.f32.mrb[78].mxu0  ;;  %v2332_v39 = vpop.f32.mrb[79].mxu1 }
 0x191   : > { %2634 = vst [vmem:[%s4153_s19 + $0x80] sm:$0xff] %v2920_v32  ;;  %v2921_v38 = vpack.c.bf16 %v2490_v46, %v2489_v2  ;;  %v2424_v42 = vmax.f32 %v2384_v56, 0.0  ;;  %v2352_v54 = vmul.f32 %v2269_v12, %v3513_v10  ;;  %v2354_v0 = vmul.f32 %v2322_v33, %v3513_v10  ;;  %v2279_v2 = vpop.f32.mrb[79].mxu0 }
 0x192   : > { %v2462_v22 = vmax.f32 %v4071_v63, %v2422_v13  ;;  %v2431_v16 = vmax.f32 %v2391_v17, 0.0  ;;  %v2433_v40 = vmax.f32 %v2393_v36, 0.0  ;;  %v2361_v30 = vmul.f32 %v2273_v51, %v3511_v9 }
 0x193   : > { %2635 = vst [vmem:[%s4153_s19 + $0x88] sm:$0xff] %v2921_v38  ;;  %v2464_v3 = vmax.f32 %v4147_v57, %v2424_v42  ;;  %v2392_v50 = vadd.f32 %v2352_v54, %v3519_v23  ;;  %v2394_v35 = vadd.f32 %v2354_v0, %v3519_v23  ;;  %v2363_v10 = vmul.f32 %v2326_v5, %v3511_v9 }
 0x194   : > { %v2907_v63 = vpack.c.bf16 %v2462_v22, %v2461_v11  ;;  %v2471_v27 = vmax.f32 %v4077_v20, %v2431_v16  ;;  %v2473_v57 = vmax.f32 %v4156_v43, %v2433_v40  ;;  %v2401_v12 = vadd.f32 %v2361_v30, %v3535_v44 }
 0x195   : > { %v2908_v33 = vpack.c.bf16 %v2464_v3, %v2463_v60  ;;  %v2432_v23 = vmax.f32 %v2392_v50, 0.0  ;;  %v2434_v15 = vmax.f32 %v2394_v35, 0.0  ;;  %v2403_v45 = vadd.f32 %v2363_v10, %v3535_v44 }
 0x196   : > { %2618 = vst [vmem:[%s4153_s19 + $0x18] sm:$0xff] %v2907_v63  ;;  %v2441_v26 = vmax.f32 %v2401_v12, 0.0  ;;  %v2362_v18 = vmul.f32 %v2275_v28, %v3511_v9  ;;  %v2364_v21 = vmul.f32 %v2328_v6, %v3511_v9  ;;  %v2371_v25 = vmul.f32 %v2277_v1, %v3515_v14 }
 0x197   : > { %2622 = vst.msk [vmem:[%s4153_s19 + $0x20] sm:$0xff] %vm4279_vm5, %v2908_v33  ;;  %v2472_v20 = vmax.f32 %v4085_v58, %v2432_v23  ;;  %v2474_v43 = vmax.f32 %v4162_v55, %v2434_v15  ;;  %v2443_v41 = vmax.f32 %v2403_v45, 0.0  ;;  %v2373_v24 = vmul.f32 %v2330_v29, %v3515_v14 }
 0x198   : > { %v2481_v48 = vmax.f32 %v4105_v62, %v2441_v26  ;;  %v2402_v53 = vadd.f32 %v2362_v18, %v3535_v44  ;;  %v2404_v9 = vadd.f32 %v2364_v21, %v3535_v44  ;;  %v2411_v49 = vadd.f32 %v2371_v25, %v3541_v47 }
 0x199   : > { %v2912_v19 = vpack.c.bf16 %v2472_v20, %v2471_v27  ;;  %v2913_v4 = vpack.c.bf16 %v2474_v43, %v2473_v57  ;;  %v2483_v32 = vmax.f32 %v4181_v61, %v2443_v41  ;;  %v2413_v58 = vadd.f32 %v2373_v24, %v3541_v47 }
 0x19a   : > { %v2442_v46 = vmax.f32 %v2402_v53, 0.0  ;;  %v2444_v55 = vmax.f32 %v2404_v9, 0.0  ;;  %v2451_v11 = vmax.f32 %v2411_v49, 0.0  ;;  %v2372_v56 = vmul.f32 %v2279_v2, %v3515_v14 }
 0x19b   : > { %2626 = vst [vmem:[%s4153_s19 + $0x40] sm:$0xff] %v2912_v19  ;;  %2627 = vst.msk [vmem:[%s4153_s19 + $0x48] sm:$0xff] %vm4279_vm5, %v2913_v4  ;;  %v2453_v44 = vmax.f32 %v2413_v58, 0.0  ;;  %v2374_v62 = vmul.f32 %v2332_v39, %v3515_v14 }
 0x19c   : > { %v2482_v60 = vmax.f32 %v4111_v34, %v2442_v46  ;;  %v2484_v61 = vmax.f32 %v4185_v31, %v2444_v55  ;;  %v2491_v13 = vmax.f32 %v4117_v59, %v2451_v11  ;;  %v2412_v17 = vadd.f32 %v2372_v56, %v3541_v47 }
 0x19d   : > { %v2493_v36 = vmax.f32 %v4190_v52, %v2453_v44  ;;  %v2414_v51 = vadd.f32 %v2374_v62, %v3541_v47 }
 0x19e   : > { %v2917_v5 = vpack.c.bf16 %v2482_v60, %v2481_v48  ;;  %v2918_v38 = vpack.c.bf16 %v2484_v61, %v2483_v32  ;;  %v2452_v42 = vmax.f32 %v2412_v17, 0.0 }
 0x19f   : > { %v2454_v54 = vmax.f32 %v2414_v51, 0.0 }
 0x1a0   : > { %2631 = vst [vmem:[%s4153_s19 + $0x68] sm:$0xff] %v2917_v5  ;;  %2632 = vst.msk [vmem:[%s4153_s19 + $0x70] sm:$0xff] %vm4279_vm5, %v2918_v38  ;;  %v2492_v14 = vmax.f32 %v4125_v37, %v2452_v42 }
 0x1a1   : > { %v2494_v34 = vmax.f32 %v4196_v7, %v2454_v54 }
 0x1a2   : > { %v2922_v31 = vpack.c.bf16 %v2492_v14, %v2491_v13 }
 0x1a3   : > { %v2923_v59 = vpack.c.bf16 %v2494_v34, %v2493_v36 }
 0x1a4   : > { %2636 = vst [vmem:[%s4153_s19 + $0x90] sm:$0xff] %v2922_v31 }
 0x1a5   : > { %2637 = vst.msk [vmem:[%s4153_s19 + $0x98] sm:$0xff] %vm4279_vm5, %v2923_v59 }
 0x1a6 PF: > { %s14_s15 = sadd.s32 1, %s3066_s15  }
 0x1a7   : > { %p11_p4 = scmp.ge.s32.totalorder %s14_s15, 10  }
 0x1a9   :  { %13 = sbr.rel (!%p11_p4) target bundleno = 1 (0x1), region = 69 }

// kernel: forward.6
= control target key start
LH: loop header
LB: loop body
LE: loop exit
PB: predicated region body
PF: predicated region fallthrough
CT: control target
= control target key end

     0   :  { %s4619_s15 = smov 0   ;;  %s5775_s0 = inlined_call_operand.vmem [shape: bf16[8,4,288,300], index: 0, kind: input, shape index: {}]   ;;  %s5776_s1 = inlined_call_operand.vmem [shape: bf16[64,288], index: 1, kind: input, shape index: {}]   ;;  %s5777_s2 = inlined_call_operand.vmem [shape: f32[64,1], index: 2, kind: input, shape index: {}]   ;;  %s5778_s3 = inlined_call_operand.vmem [shape: f32[64,1], index: 3, kind: input, shape index: {}]   ;;  %s5779_s4 = inlined_call_operand.vmem [shape: bf16[8,64,300], index: 4, kind: output, shape index: {}]  }
   0x1 LB: > { %s3443_s16 = sadd.s32 4294967295, %s4591_s15   ;;  %p3447_p0 = scmp.ge.s32.totalorder %s4591_s15, 1  ;;  %s4591_s15 = sphi %s4619_s15, %s14_s15  }
   0x2   : > { %p162_p1 = scmp.lt.s32.totalorder %s4591_s15, 9 }
   0x4   : > { %p163_p2 = pnand %p3447_p0, %p162_p1 }
   0x6   : > { %166 = sbr.rel (%p163_p2) target bundleno = 591 (0x24f), region = 36 }
   0xd   : > { %p188_p3 = scmp.lt.s32.totalorder %s3443_s16, 7  ;;  %v4630_v0 = vld [vmem:[%s5776_s1 + $0x4] ss:$12 sps:$4 sm:$0xff]   ;;  %v4593_v1 = vmov 0   ;;  %v4681_v36 = vld [vmem:[%s5776_s1] ss:$12 sps:$4 sm:$0xff]  }
   0xe   : > { %842 = vmatprep.mubr.bf16.mxu1 %v4630_v0  ;;  %696 = vmatprep.mubr.bf16.mxu0 %v4630_v0  ;;  %v4687_v38 = vld [vmem:[%s5776_s1 + $0x1c] ss:$12 sps:$4 sm:$0xff]   ;;  %v4698_v43 = vld [vmem:[%s5776_s1 + $0x18] ss:$12 sps:$4 sm:$0xff]   ;;  %v4704_v45 = vld [vmem:[%s5776_s1 + $0x34] ss:$12 sps:$4 sm:$0xff]  }
   0xf   : > { %s5802_s16 = smov (!%p188_p3, %s3443_s16), 7  ;;  %4267 = vset.pattern.permute.xlu0 %v4593_v1  ;;  %4268 = vset.pattern.permute.xlu1 %v4593_v1  ;;  %v4715_v50 = vld [vmem:[%s5776_s1 + $0x30] ss:$12 sps:$4 sm:$0xff]   ;;  %v4722_v53 = vld [vmem:[%s5776_s1 + $0x4c] ss:$12 sps:$4 sm:$0xff]   ;;  %vm651_vm0 = vcmask 261120  }
  0x10   : > { %s4256_s19 = smul.u32 1728, %s5802_s16  ;;  %v4731_v56 = vld [vmem:[%s5776_s1 + $0x48] ss:$12 sps:$4 sm:$0xff]   ;;  %v4749_v63 = vld [vmem:[%s5776_s1 + $0x20] ss:$12 sps:$4 sm:$0xff]   ;;  %vm3372_vm1 = vcmask 355328  }
  0x11   : > { %v4736_v57 = vld [vmem:[%s5776_s1 + $0x8] ss:$12 sps:$4 sm:$0xff]  }
  0x12   : > { %s4642_s22 = scalar_lea.vmem %s5775_s0, %s4256_s19 }
  0x13   : > { %v4269_v2 = vld [vmem:[%s4642_s22 + $0x4] ss:$12 sps:$4 sm:$0xff]   ;;  %v4271_v3 = vld [vmem:[%s4642_s22 + $0xc8] ss:$12 sps:$4 sm:$0xff]   ;;  %v4272_v4 = vld [vmem:[%s4642_s22] ss:$12 sps:$4 sm:$0xff]  }
  0x14   : > { %664 = vmatprep.subr.bf16.mxu0 %v4269_v2  ;;  %3960 = vmatprep.subr.bf16.mxu1 %v4271_v3  ;;  %v4273_v5 = vld [vmem:[%s4642_s22 + $0x8] ss:$12 sps:$4 sm:$0xff]   ;;  %v4276_v7 = vld [vmem:[%s4642_s22 + $0xe0] ss:$12 sps:$4 sm:$0xff]   ;;  %v4277_v8 = vld [vmem:[%s4642_s22 + $0x18] ss:$12 sps:$4 sm:$0xff]  }
  0x15   : > { %665 = vmatpush1.bf16.msra.mxu0 %v4272_v4  ;;  %v4274_v6 = vld [vmem:[%s4642_s22 + $0x1c] ss:$12 sps:$4 sm:$0xff]   ;;  %3961 = vmatpush3.bf16.msra.mxu1 %v4273_v5  ;;  %v4278_v9 = vld [vmem:[%s4642_s22 + $0x20] ss:$12 sps:$4 sm:$0xff]   ;;  %v4281_v11 = vld [vmem:[%s4642_s22 + $0xf8] ss:$12 sps:$4 sm:$0xff]  }
  0x16   : > { %666 = vmatprep.subr.bf16.mxu0 %v4274_v6  ;;  %3962 = vmatprep.subr.bf16.mxu1 %v4276_v7  ;;  %v4279_v10 = vld [vmem:[%s4642_s22 + $0x34] ss:$12 sps:$4 sm:$0xff]   ;;  %v4282_v12 = vld [vmem:[%s4642_s22 + $0x30] ss:$12 sps:$4 sm:$0xff]   ;;  %v4283_v13 = vld [vmem:[%s4642_s22 + $0x38] ss:$12 sps:$4 sm:$0xff]  }
  0x17   : > { %v4284_v14 = vld [vmem:[%s4642_s22 + $0x4c] ss:$12 sps:$4 sm:$0xff]   ;;  %v4286_v15 = vld [vmem:[%s4642_s22 + $0x110] ss:$12 sps:$4 sm:$0xff]   ;;  %v4287_v16 = vld [vmem:[%s4642_s22 + $0x48] ss:$12 sps:$4 sm:$0xff]  }
  0x18   : > { %v4288_v17 = vld [vmem:[%s4642_s22 + $0x50] ss:$12 sps:$4 sm:$0xff]   ;;  %v4291_v19 = vld [vmem:[%s4642_s22 + $0x128] ss:$12 sps:$4 sm:$0xff]   ;;  %v4292_v20 = vld [vmem:[%s4642_s22 + $0x60] ss:$12 sps:$4 sm:$0xff]  }
  0x19   : > { %667 = vmatpush1.bf16.msra.mxu0 %v4277_v8  ;;  %3963 = vmatpush3.bf16.msra.mxu1 %v4278_v9  ;;  %v4289_v18 = vld [vmem:[%s4642_s22 + $0x64] ss:$12 sps:$4 sm:$0xff]   ;;  %v4293_v21 = vld [vmem:[%s4642_s22 + $0x68] ss:$12 sps:$4 sm:$0xff]   ;;  %v4296_v23 = vld [vmem:[%s4642_s22 + $0x140] ss:$12 sps:$4 sm:$0xff]  }
  0x1a   : > { %668 = vmatprep.subr.bf16.mxu0 %v4279_v10  ;;  %3964 = vmatprep.subr.bf16.mxu1 %v4281_v11  ;;  %v4294_v22 = vld [vmem:[%s4642_s22 + $0x7c] ss:$12 sps:$4 sm:$0xff]   ;;  %v4297_v24 = vld [vmem:[%s4642_s22 + $0x78] ss:$12 sps:$4 sm:$0xff]   ;;  %v4298_v25 = vld [vmem:[%s4642_s22 + $0x80] ss:$12 sps:$4 sm:$0xff]  }
  0x1b   : > { %v4299_v26 = vld [vmem:[%s4642_s22 + $0x94] ss:$12 sps:$4 sm:$0xff]   ;;  %v4301_v27 = vld [vmem:[%s4642_s22 + $0x158] ss:$12 sps:$4 sm:$0xff]   ;;  %v4302_v28 = vld [vmem:[%s4642_s22 + $0x90] ss:$12 sps:$4 sm:$0xff]  }
  0x1c   : > { %v4303_v29 = vld [vmem:[%s4642_s22 + $0x98] ss:$12 sps:$4 sm:$0xff]   ;;  %v4306_v31 = vld [vmem:[%s4642_s22 + $0x170] ss:$12 sps:$4 sm:$0xff]   ;;  %v4307_v32 = vld [vmem:[%s4642_s22 + $0xa8] ss:$12 sps:$4 sm:$0xff]  }
  0x1d   : > { %669 = vmatpush1.bf16.msra.mxu0 %v4282_v12  ;;  %3965 = vmatpush3.bf16.msra.mxu1 %v4283_v13  ;;  %v4304_v30 = vld [vmem:[%s4642_s22 + $0xac] ss:$12 sps:$4 sm:$0xff]   ;;  %v4308_v33 = vld [vmem:[%s4642_s22 + $0xb0] ss:$12 sps:$4 sm:$0xff]   ;;  %v4314_v35 = vld [vmem:[%s4642_s22 + $0x188] ss:$12 sps:$4 sm:$0xff]  }
  0x1e   : > { %670 = vmatprep.subr.bf16.mxu0 %v4284_v14  ;;  %3966 = vmatprep.subr.bf16.mxu1 %v4286_v15  ;;  %v4311_v34 = vld [vmem:[%s4642_s22 + $0xc4] ss:$12 sps:$4 sm:$0xff]   ;;  %v4315_v37 = vld [vmem:[%s4642_s22 + $0xc0] ss:$12 sps:$4 sm:$0xff]   ;;  %v4316_v39 = vld [vmem:[%s4642_s22 + $0xdc] ss:$12 sps:$4 sm:$0xff]  }
  0x1f   : > { %v4333_v40 = vld [vmem:[%s4642_s22 + $0x1a0] ss:$12 sps:$4 sm:$0xff]   ;;  %v4318_v41 = vld [vmem:[%s4642_s22 + $0xd8] ss:$12 sps:$4 sm:$0xff]   ;;  %v4324_v44 = vld [vmem:[%s4642_s22 + $0xf0] ss:$12 sps:$4 sm:$0xff]  }
  0x20   : > { %v4321_v42 = vld [vmem:[%s4642_s22 + $0xf4] ss:$12 sps:$4 sm:$0xff]   ;;  %v4325_v47 = vld [vmem:[%s4642_s22 + $0x10c] ss:$12 sps:$4 sm:$0xff]   ;;  %v4330_v49 = vld [vmem:[%s4642_s22 + $0x124] ss:$12 sps:$4 sm:$0xff]  }
  0x21   : > { %671 = vmatpush1.bf16.msra.mxu0 %v4287_v16  ;;  %3967 = vmatpush3.bf16.msra.mxu1 %v4288_v17  ;;  %v4350_v46 = vld [vmem:[%s4642_s22 + $0x1b4] ss:$12 sps:$4 sm:$0xff]   ;;  %v4335_v52 = vld [vmem:[%s4642_s22 + $0x13c] ss:$12 sps:$4 sm:$0xff]   ;;  %v4337_v54 = vld [vmem:[%s4642_s22 + $0x138] ss:$12 sps:$4 sm:$0xff]  }
  0x22   : > { %672 = vmatprep.subr.bf16.mxu0 %v4289_v18  ;;  %3968 = vmatprep.subr.bf16.mxu1 %v4291_v19  ;;  %v4327_v48 = vld [vmem:[%s4642_s22 + $0x108] ss:$12 sps:$4 sm:$0xff]   ;;  %v4334_v51 = vld [vmem:[%s4642_s22 + $0x120] ss:$12 sps:$4 sm:$0xff]   ;;  %v4343_v58 = vld [vmem:[%s4642_s22 + $0x150] ss:$12 sps:$4 sm:$0xff]  }
  0x23   : > { %v4340_v55 = vld [vmem:[%s4642_s22 + $0x154] ss:$12 sps:$4 sm:$0xff]   ;;  %v4344_v59 = vld [vmem:[%s4642_s22 + $0x16c] ss:$12 sps:$4 sm:$0xff]   ;;  %v4365_v61 = vld [vmem:[%s4642_s22 + $0x184] ss:$12 sps:$4 sm:$0xff]  }
  0x24   : > { %v4346_v60 = vld [vmem:[%s4642_s22 + $0x168] ss:$12 sps:$4 sm:$0xff]   ;;  %v4348_v62 = vld [vmem:[%s4642_s22 + $0x1b0] ss:$12 sps:$4 sm:$0xff]   ;;  %v4354_v2 = vld [vmem:[%s4642_s22 + $0x1cc] ss:$12 sps:$4 sm:$0xff]  }
  0x25   : > { %673 = vmatpush1.bf16.msra.mxu0 %v4292_v20  ;;  %3969 = vmatpush3.bf16.msra.mxu1 %v4293_v21  ;;  %v4755_v3 = vld [vmem:[%s5776_s1 + $0x38] ss:$12 sps:$4 sm:$0xff]   ;;  %v4363_v4 = vld [vmem:[%s4642_s22 + $0x180] ss:$12 sps:$4 sm:$0xff]   ;;  %v4380_v5 = vld [vmem:[%s4642_s22 + $0x19c] ss:$12 sps:$4 sm:$0xff]  }
  0x26   : > { %674 = vmatprep.subr.bf16.mxu0 %v4294_v22  ;;  %3970 = vmatprep.subr.bf16.mxu1 %v4296_v23  ;;  %v4352_v6 = vld [vmem:[%s4642_s22 + $0x1c8] ss:$12 sps:$4 sm:$0xff]   ;;  %v4358_v7 = vld [vmem:[%s4642_s22 + $0x1e4] ss:$12 sps:$4 sm:$0xff]   ;;  %v4356_v11 = vld [vmem:[%s4642_s22 + $0x1e0] ss:$12 sps:$4 sm:$0xff]  }
  0x27   : > { %v4378_v8 = vld [vmem:[%s4642_s22 + $0x198] ss:$12 sps:$4 sm:$0xff]   ;;  %v4772_v10 = vld [vmem:[%s5776_s1 + $0x50] ss:$12 sps:$4 sm:$0xff]   ;;  %v4368_v14 = vld [vmem:[%s4642_s22 + $0x214] ss:$12 sps:$4 sm:$0xff]  }
  0x28   : > { %v4384_v9 = vld [vmem:[%s4642_s22 + $0x278] ss:$12 sps:$4 sm:$0xff]   ;;  %v4362_v12 = vld [vmem:[%s4642_s22 + $0x1fc] ss:$12 sps:$4 sm:$0xff]   ;;  %v217_v18 = vld [vmem:[%s5777_s2 + $0x10] sm:$0xff] }
  0x29   : > { %675 = vmatpush1.bf16.msra.mxu0 %v4297_v24  ;;  %3971 = vmatpush3.bf16.msra.mxu1 %v4298_v25  ;;  %v4360_v13 = vld [vmem:[%s4642_s22 + $0x1f8] ss:$12 sps:$4 sm:$0xff]   ;;  %v4366_v15 = vld [vmem:[%s4642_s22 + $0x210] ss:$12 sps:$4 sm:$0xff]   ;;  %v4369_v19 = vld [vmem:[%s4642_s22 + $0x228] ss:$12 sps:$4 sm:$0xff]  }
  0x2a   : > { %676 = vmatprep.subr.bf16.mxu0 %v4299_v26  ;;  %3972 = vmatprep.subr.bf16.mxu1 %v4301_v27  ;;  %v4371_v16 = vld [vmem:[%s4642_s22 + $0x22c] ss:$12 sps:$4 sm:$0xff]   ;;  %v215_v17 = vld [vmem:[%s5777_s2] sm:$0xff]  ;;  %v4377_v25 = vld [vmem:[%s4642_s22 + $0x25c] ss:$12 sps:$4 sm:$0xff]  }
  0x2b   : > { %942 = vperm.xlu0 %4267, %v215_v17   ;;  %v4374_v20 = vld [vmem:[%s4642_s22 + $0x244] ss:$12 sps:$4 sm:$0xff]   ;;  %952 = vperm.xlu1 %4268, %v217_v18   ;;  %v216_v21 = vld [vmem:[%s5777_s2 + $0x8] sm:$0xff]  ;;  %v218_v22 = vld [vmem:[%s5777_s2 + $0x18] sm:$0xff] }
  0x2c   : > { %v4372_v23 = vld [vmem:[%s4642_s22 + $0x240] ss:$12 sps:$4 sm:$0xff]   ;;  %v4375_v27 = vld [vmem:[%s4642_s22 + $0x258] ss:$12 sps:$4 sm:$0xff]  }
  0x2d   : > { %677 = vmatpush1.bf16.msra.mxu0 %v4302_v28  ;;  %3973 = vmatpush3.bf16.msra.mxu1 %v4303_v29  ;;  %v219_v24 = vld [vmem:[%s5777_s2 + $0x20] sm:$0xff]  ;;  %v220_v26 = vld [vmem:[%s5777_s2 + $0x28] sm:$0xff]  ;;  %v221_v28 = vld [vmem:[%s5777_s2 + $0x30] sm:$0xff] }
  0x2e   : > { %678 = vmatprep.subr.bf16.mxu0 %v4304_v30  ;;  %3974 = vmatprep.subr.bf16.mxu1 %v4306_v31  ;;  %v4383_v29 = vld [vmem:[%s4642_s22 + $0x274] ss:$12 sps:$4 sm:$0xff]   ;;  %v222_v30 = vld [vmem:[%s5777_s2 + $0x38] sm:$0xff] }
  0x2f   : > { %947 = vperm.xlu0 %4267, %v216_v21   ;;  %957 = vperm.xlu1 %4268, %v218_v22   ;;  %v4381_v31 = vld [vmem:[%s4642_s22 + $0x270] ss:$12 sps:$4 sm:$0xff]   ;;  %v4416_v17 = vld [vmem:[%s4642_s22 + $0x318] ss:$12 sps:$4 sm:$0xff]  }
  0x30   : > { %v4424_v18 = vld [vmem:[%s4642_s22 + $0x338] ss:$12 sps:$4 sm:$0xff]   ;;  %v4428_v22 = vld [vmem:[%s4642_s22 + $0x350] ss:$12 sps:$4 sm:$0xff]  }
  0x31   : > { %679 = vmatpush1.bf16.msra.mxu0 %v4307_v32  ;;  %3975 = vmatpush3.bf16.msra.mxu1 %v4308_v33  ;;  %v4385_v32 = vld [vmem:[%s4642_s22 + $0x1b8] ss:$12 sps:$4 sm:$0xff]   ;;  %v4389_v33 = vld [vmem:[%s4642_s22 + $0x290] ss:$12 sps:$4 sm:$0xff]  }
  0x32   : > { %680 = vmatprep.subr.bf16.mxu0 %v4311_v34  ;;  %4144 = vmatprep.subr.bf16.mxu1 %v4314_v35  ;;  %v4388_v34 = vld [vmem:[%s4642_s22 + $0x28c] ss:$12 sps:$4 sm:$0xff]  }
  0x33   : > { %962 = vperm.xlu0 %4267, %v219_v24   ;;  %967 = vperm.xlu1 %4268, %v220_v26   ;;  %v4427_v21 = vld [vmem:[%s4642_s22 + $0x34c] ss:$12 sps:$4 sm:$0xff]   ;;  %v4431_v24 = vld [vmem:[%s4642_s22 + $0x364] ss:$12 sps:$4 sm:$0xff]  }
  0x34   : > { %843 = vmatmul.mubr.bf16.vlgmr.msra.gmra.mrb[0].mxu1 %v4681_v36  ;;  %v4443_v26 = vld [vmem:[%s4642_s22 + $0x398] ss:$12 sps:$4 sm:$0xff]  }
  0x35   : > { %681 = vmatpush1.bf16.msra.mxu0 %v4315_v37  ;;  %4145 = vmatpush3.bf16.msra.mxu1 %v4314_v35  ;;  %v4386_v35 = vld [vmem:[%s4642_s22 + $0x288] ss:$12 sps:$4 sm:$0xff]   ;;  %v4390_v37 = vld [vmem:[%s4642_s22 + $0x1d0] ss:$12 sps:$4 sm:$0xff]  }
  0x36   : > { %682 = vmatprep.subr.bf16.mxu0 %v4316_v39  ;;  %850 = vmatprep.mubr.bf16.mxu1 %v4687_v38  ;;  %v223_v39 = vld [vmem:[%s5778_s3] sm:$0xff] }
  0x37   : > { %4146 = vmatprep.subr.bf16.mxu1 %v4333_v40  ;;  %972 = vperm.xlu0 %4267, %v221_v28   ;;  %v4447_v28 = vld [vmem:[%s4642_s22 + $0x470] ss:$12 sps:$4 sm:$0xff]  }
  0x38   : > { %977 = vperm.xlu1 %4268, %v222_v30   ;;  %v4448_v30 = vld [vmem:[%s4642_s22 + $0x3b0] ss:$12 sps:$4 sm:$0xff]  }
  0x39   : > { %683 = vmatpush1.bf16.msra.mxu0 %v4318_v41  ;;  %4147 = vmatpush3.bf16.msra.mxu1 %v4333_v40  ;;  %v224_v40 = vld [vmem:[%s5778_s3 + $0x8] sm:$0xff] }
  0x3a   : > { %684 = vmatprep.subr.bf16.mxu0 %v4321_v42  ;;  %1453 = vmatprep.subr.bf16.mxu1 %v4350_v46  ;;  %v4394_v41 = vld [vmem:[%s4642_s22 + $0x2a8] ss:$12 sps:$4 sm:$0xff]   ;;  %v4393_v42 = vld [vmem:[%s4642_s22 + $0x2a4] ss:$12 sps:$4 sm:$0xff]   ;;  %v4391_v46 = vld [vmem:[%s4642_s22 + $0x2a0] ss:$12 sps:$4 sm:$0xff]  }
  0x3b   : > { %1006 = vperm.xlu0 %4267, %v223_v39   ;;  %v4457_v39 = vld [vmem:[%s4642_s22 + $0x4a0] ss:$12 sps:$4 sm:$0xff]  }
  0x3c   : > { %851 = vmatmul.mubr.bf16.gmra.mrb[4].mxu1 %v4698_v43  ;;  %1011 = vperm.xlu1 %4268, %v224_v40   ;;  %v4454_v40 = vld [vmem:[%s4642_s22 + $0x3d8] ss:$12 sps:$4 sm:$0xff]  }
  0x3d   : > { %685 = vmatpush1.bf16.msra.mxu0 %v4324_v44  ;;  %858 = vmatprep.mubr.bf16.mxu1 %v4704_v45  ;;  %v4395_v44 = vld [vmem:[%s4642_s22 + $0x1e8] ss:$12 sps:$4 sm:$0xff]  }
  0x3e   : > { %686 = vmatprep.subr.bf16.mxu0 %v4325_v47  ;;  %v225_v47 = vld [vmem:[%s5778_s3 + $0x10] sm:$0xff] }
  0x3f   : > { %1016 = vperm.xlu0 %4267, %v225_v47   ;;  %v4463_v47 = vld [vmem:[%s4642_s22 + $0x3f8] ss:$12 sps:$4 sm:$0xff]  }
  0x41   : > { %687 = vmatpush1.bf16.msra.mxu0 %v4327_v48  ;;  %v4398_v48 = vld [vmem:[%s4642_s22 + $0x2bc] ss:$12 sps:$4 sm:$0xff]  }
  0x42   : > { %688 = vmatprep.subr.bf16.mxu0 %v4330_v49  ;;  %v226_v49 = vld [vmem:[%s5778_s3 + $0x18] sm:$0xff] }
  0x43   : > { %1021 = vperm.xlu1 %4268, %v226_v49   ;;  %v4467_v49 = vld [vmem:[%s4642_s22 + $0x4d0] ss:$12 sps:$4 sm:$0xff]  }
  0x44   : > { %859 = vmatmul.mubr.bf16.gmra.mrb[8].mxu1 %v4715_v50 }
  0x45   : > { %689 = vmatpush1.bf16.msra.mxu0 %v4334_v51  ;;  %866 = vmatprep.mubr.bf16.mxu1 %v4722_v53  ;;  %v4399_v51 = vld [vmem:[%s4642_s22 + $0x2c0] ss:$12 sps:$4 sm:$0xff]  }
  0x46   : > { %690 = vmatprep.subr.bf16.mxu0 %v4335_v52  ;;  %v4400_v52 = vld [vmem:[%s4642_s22 + $0x200] ss:$12 sps:$4 sm:$0xff]  }
  0x49   : > { %691 = vmatpush1.bf16.msra.mxu0 %v4337_v54  ;;  %v227_v54 = vld [vmem:[%s5778_s3 + $0x20] sm:$0xff] }
  0x4a   : > { %692 = vmatprep.subr.bf16.mxu0 %v4340_v55  ;;  %v228_v55 = vld [vmem:[%s5778_s3 + $0x28] sm:$0xff]  ;;  %1026 = vperm.xlu0 %4267, %v227_v54   ;;  %v4471_v54 = vld [vmem:[%s4642_s22 + $0x424] ss:$12 sps:$4 sm:$0xff]  }
  0x4b   : > { %1031 = vperm.xlu1 %4268, %v228_v55   ;;  %v4472_v55 = vld [vmem:[%s4642_s22 + $0x4e8] ss:$12 sps:$4 sm:$0xff]  }
  0x4c   : > { %867 = vmatmul.mubr.bf16.gmra.mrb[12].mxu1 %v4731_v56 }
  0x4d   : > { %693 = vmatpush1.bf16.msra.mxu0 %v4343_v58  ;;  %4148 = vmatprep.mubr.msk.bf16.mxu1 %vm651_vm0, %v4736_v57  ;;  %v4396_v58 = vld [vmem:[%s4642_s22 + $0x2b8] ss:$12 sps:$4 sm:$0xff]  }
  0x4e   : > { %694 = vmatprep.subr.bf16.mxu0 %v4344_v59  ;;  %v4404_v59 = vld [vmem:[%s4642_s22 + $0x2d8] ss:$12 sps:$4 sm:$0xff]  }
  0x51   : > { %695 = vmatpush1.bf16.msra.mxu0 %v4346_v60  ;;  %v4403_v60 = vld [vmem:[%s4642_s22 + $0x2d4] ss:$12 sps:$4 sm:$0xff]  }
  0x52   : > { %737 = vmatprep.subr.bf16.mxu0 %v4365_v61  ;;  %v4401_v61 = vld [vmem:[%s4642_s22 + $0x2d0] ss:$12 sps:$4 sm:$0xff]  }
  0x54   : > { %697 = vmatmul.mubr.bf16.vlgmr.msra.gmra.mrb[0].mxu0 %v4681_v36  ;;  %4149 = vmatmul.mubr.msk.bf16.vlgmr.msra.gmra.mrb[16].mxu1 %vm651_vm0, %v4749_v63 }
  0x55   : > { %706 = vmatprep.mubr.bf16.mxu0 %v4687_v38  ;;  %1454 = vmatpush1.bf16.msra.mxu1 %v4348_v62  ;;  %v229_v62 = vld [vmem:[%s5778_s3 + $0x30] sm:$0xff] }
  0x56   : > { %4152 = vmatprep.mubr.msk.bf16.mxu1 %vm651_vm0, %v4755_v3  ;;  %1455 = vmatprep.subr.bf16.mxu1 %v4354_v2  ;;  %v4405_v2 = vld [vmem:[%s4642_s22 + $0x218] ss:$12 sps:$4 sm:$0xff]  }
  0x57   : > { %738 = vmatpush1.bf16.msra.mxu0 %v4363_v4  ;;  %v230_v4 = vld [vmem:[%s5778_s3 + $0x38] sm:$0xff]  ;;  %1036 = vperm.xlu0 %4267, %v229_v62  }
  0x58   : > { %739 = vmatprep.subr.bf16.mxu0 %v4380_v5  ;;  %v4409_v5 = vld [vmem:[%s4642_s22 + $0x2f0] ss:$12 sps:$4 sm:$0xff]   ;;  %1041 = vperm.xlu1 %4268, %v230_v4   ;;  %v4473_v62 = vld [vmem:[%s4642_s22 + $0x438] ss:$12 sps:$4 sm:$0xff]  }
  0x59   : > { %1456 = vmatpush1.bf16.msra.mxu1 %v4352_v6  ;;  %v4408_v6 = vld [vmem:[%s4642_s22 + $0x2ec] ss:$12 sps:$4 sm:$0xff]   ;;  %v4980_v4 = vld [vmem:[%s5776_s1 + $0x1c] ss:$12 sps:$4 sm:$0xff]  }
  0x5a   : > { %1457 = vmatprep.subr.bf16.mxu1 %v4358_v7  ;;  %v4406_v7 = vld [vmem:[%s4642_s22 + $0x2e8] ss:$12 sps:$4 sm:$0xff]  }
  0x5b   : > { %740 = vmatpush1.bf16.msra.mxu0 %v4378_v8  ;;  %v4410_v8 = vld [vmem:[%s4642_s22 + $0x230] ss:$12 sps:$4 sm:$0xff]  }
  0x5c   : > { %707 = vmatmul.mubr.bf16.gmra.mrb[4].mxu0 %v4698_v43  ;;  %4006 = vmatprep.subr.bf16.mxu0 %v4384_v9  ;;  %v4414_v9 = vld [vmem:[%s4642_s22 + $0x308] ss:$12 sps:$4 sm:$0xff]  }
  0x5d   : > { %4153 = vmatmul.mubr.msk.bf16.gmra.mrb[20].mxu1 %vm651_vm0, %v4772_v10  ;;  %716 = vmatprep.mubr.bf16.mxu0 %v4704_v45 }
  0x5e   : > { %1458 = vmatpush1.bf16.msra.mxu1 %v4356_v11  ;;  %1485 = vmatprep.mubr.bf16.mxu1 %v4630_v0  ;;  %v4413_v11 = vld [vmem:[%s4642_s22 + $0x304] ss:$12 sps:$4 sm:$0xff]  }
  0x5f   : > { %1459 = vmatprep.subr.bf16.mxu1 %v4362_v12  ;;  %v4415_v12 = vld [vmem:[%s4642_s22 + $0x248] ss:$12 sps:$4 sm:$0xff]  }
  0x62   : > { %1460 = vmatpush1.bf16.msra.mxu1 %v4360_v13  ;;  %v4411_v13 = vld [vmem:[%s4642_s22 + $0x300] ss:$12 sps:$4 sm:$0xff]  }
  0x63   : > { %1461 = vmatprep.subr.bf16.mxu1 %v4368_v14  ;;  %v4419_v14 = vld [vmem:[%s4642_s22 + $0x320] ss:$12 sps:$4 sm:$0xff]  }
  0x64   : > { %717 = vmatmul.mubr.bf16.gmra.mrb[8].mxu0 %v4715_v50 }
  0x65   : > { %726 = vmatprep.mubr.bf16.mxu0 %v4722_v53 }
  0x66   : > { %1462 = vmatpush1.bf16.msra.mxu1 %v4366_v15  ;;  %v4418_v15 = vld [vmem:[%s4642_s22 + $0x31c] ss:$12 sps:$4 sm:$0xff]  }
  0x67   : > { %1463 = vmatprep.subr.bf16.mxu1 %v4371_v16  ;;  %v4420_v16 = vld [vmem:[%s4642_s22 + $0x260] ss:$12 sps:$4 sm:$0xff]  }
  0x6a   : > { %1464 = vmatpush1.bf16.msra.mxu1 %v4369_v19  ;;  %v4423_v19 = vld [vmem:[%s4642_s22 + $0x334] ss:$12 sps:$4 sm:$0xff]  }
  0x6b   : > { %1465 = vmatprep.subr.bf16.mxu1 %v4374_v20  ;;  %v4421_v20 = vld [vmem:[%s4642_s22 + $0x330] ss:$12 sps:$4 sm:$0xff]  }
  0x6c   : > { %727 = vmatmul.mubr.bf16.gmra.mrb[12].mxu0 %v4731_v56 }
  0x6d   : > { %769 = vmatprep.mubr.bf16.mxu0 %v4593_v1 }
  0x6e   : > { %1466 = vmatpush1.bf16.msra.mxu1 %v4372_v23  ;;  %v4432_v23 = vld [vmem:[%s4642_s22 + $0x428] ss:$12 sps:$4 sm:$0xff]  }
  0x6f   : > { %1467 = vmatprep.subr.bf16.mxu1 %v4377_v25  ;;  %v4442_v25 = vld [vmem:[%s4642_s22 + $0x458] ss:$12 sps:$4 sm:$0xff]  }
  0x72   : > { %1468 = vmatpush1.bf16.msra.mxu1 %v4375_v27  ;;  %v4446_v27 = vld [vmem:[%s4642_s22 + $0x3ac] ss:$12 sps:$4 sm:$0xff]  }
  0x73   : > { %1469 = vmatprep.subr.bf16.mxu1 %v4383_v29  ;;  %v4444_v29 = vld [vmem:[%s4642_s22 + $0x3a8] ss:$12 sps:$4 sm:$0xff]  }
  0x74   : > { %3516 = vmatmul.mubr.msk.bf16.vlgmr.msra.gmra.mrb[0].mxu0 %vm651_vm0, %v4736_v57 }
  0x75   : > { %4007 = vmatpush3.bf16.msra.mxu0 %v4385_v32  ;;  %779 = vmatprep.mubr.bf16.mxu0 %v4593_v1  ;;  %v4452_v32 = vld [vmem:[%s4642_s22 + $0x488] ss:$12 sps:$4 sm:$0xff]  }
  0x76   : > { %1470 = vmatpush1.bf16.msra.mxu1 %v4381_v31  ;;  %4008 = vmatprep.subr.bf16.mxu0 %v4389_v33  ;;  %v4451_v31 = vld [vmem:[%s4642_s22 + $0x3c4] ss:$12 sps:$4 sm:$0xff]  }
  0x77   : > { %1471 = vmatprep.subr.bf16.mxu1 %v4388_v34  ;;  %v4941_v33 = vld [vmem:[%s5776_s1 + $0x4] ss:$12 sps:$4 sm:$0xff]   ;;  %v4449_v34 = vld [vmem:[%s4642_s22 + $0x3c0] ss:$12 sps:$4 sm:$0xff]  }
  0x79   : > { %4009 = vmatpush3.bf16.msra.mxu0 %v4390_v37  ;;  %v4456_v37 = vld [vmem:[%s4642_s22 + $0x3dc] ss:$12 sps:$4 sm:$0xff]  }
  0x7a   : > { %1472 = vmatpush1.bf16.msra.mxu1 %v4386_v35  ;;  %4010 = vmatprep.subr.bf16.mxu0 %v4394_v41  ;;  %v4453_v35 = vld [vmem:[%s4642_s22 + $0x3c8] ss:$12 sps:$4 sm:$0xff]   ;;  %v4458_v41 = vld [vmem:[%s4642_s22 + $0x3e0] ss:$12 sps:$4 sm:$0xff]  }
  0x7b   : > { %1473 = vmatprep.subr.bf16.mxu1 %v4393_v42  ;;  %v4461_v42 = vld [vmem:[%s4642_s22 + $0x3f4] ss:$12 sps:$4 sm:$0xff]  }
  0x7c   : > { %3517 = vmatmul.mubr.msk.bf16.gmra.mrb[4].mxu0 %vm651_vm0, %v4749_v63 }
  0x7d   : > { %4011 = vmatpush3.bf16.msra.mxu0 %v4395_v44  ;;  %789 = vmatprep.mubr.bf16.mxu0 %v4593_v1  ;;  %v4462_v44 = vld [vmem:[%s4642_s22 + $0x4b8] ss:$12 sps:$4 sm:$0xff]  }
  0x7e   : > { %1474 = vmatpush1.bf16.msra.mxu1 %v4391_v46  ;;  %4012 = vmatprep.subr.bf16.mxu0 %v4399_v51  ;;  %v4459_v46 = vld [vmem:[%s4642_s22 + $0x3f0] ss:$12 sps:$4 sm:$0xff]   ;;  %v4464_v51 = vld [vmem:[%s4642_s22 + $0x408] ss:$12 sps:$4 sm:$0xff]  }
  0x7f   : > { %1475 = vmatprep.subr.bf16.mxu1 %v4398_v48  ;;  %v4466_v48 = vld [vmem:[%s4642_s22 + $0x40c] ss:$12 sps:$4 sm:$0xff]  }
  0x81   : > { %4013 = vmatpush3.bf16.msra.mxu0 %v4400_v52  ;;  %v4468_v52 = vld [vmem:[%s4642_s22 + $0x410] ss:$12 sps:$4 sm:$0xff]  }
  0x82   : > { %1476 = vmatpush1.bf16.msra.mxu1 %v4396_v58  ;;  %4014 = vmatprep.subr.bf16.mxu0 %v4404_v59  ;;  %v4469_v58 = vld [vmem:[%s4642_s22 + $0x420] ss:$12 sps:$4 sm:$0xff]   ;;  %v4475_v59 = vld [vmem:[%s4642_s22 + $0x43c] ss:$12 sps:$4 sm:$0xff]  }
  0x83   : > { %1477 = vmatprep.subr.bf16.mxu1 %v4403_v60  ;;  %v4485_v60 = vld [vmem:[%s4642_s22 + $0x500] ss:$12 sps:$4 sm:$0xff]  }
  0x84   : > { %3518 = vmatmul.mubr.msk.bf16.gmra.mrb[8].mxu0 %vm651_vm0, %v4755_v3 }
  0x85   : > { %4015 = vmatpush3.bf16.msra.mxu0 %v4405_v2  ;;  %799 = vmatprep.mubr.bf16.mxu0 %v4593_v1  ;;  %v4478_v2 = vld [vmem:[%s4642_s22 + $0x454] ss:$12 sps:$4 sm:$0xff]  }
  0x86   : > { %1478 = vmatpush1.bf16.msra.mxu1 %v4401_v61  ;;  %4016 = vmatprep.subr.bf16.mxu0 %v4409_v5  ;;  %v4972_v61 = vld [vmem:[%s5776_s1] ss:$12 sps:$4 sm:$0xff]  }
  0x87   : > { %1479 = vmatprep.subr.bf16.mxu1 %v4408_v6  ;;  %v4497_v5 = vld [vmem:[%s4642_s22 + $0x514] ss:$12 sps:$4 sm:$0xff]   ;;  %v4476_v6 = vld [vmem:[%s4642_s22 + $0x450] ss:$12 sps:$4 sm:$0xff]  }
  0x89   : > { %4017 = vmatpush3.bf16.msra.mxu0 %v4410_v8  ;;  %v4989_v8 = vld [vmem:[%s5776_s1 + $0x18] ss:$12 sps:$4 sm:$0xff]  }
  0x8a   : > { %1480 = vmatpush1.bf16.msra.mxu1 %v4406_v7  ;;  %4018 = vmatprep.subr.bf16.mxu0 %v4414_v9  ;;  %v4481_v7 = vld [vmem:[%s4642_s22 + $0x46c] ss:$12 sps:$4 sm:$0xff]   ;;  %v4479_v9 = vld [vmem:[%s4642_s22 + $0x468] ss:$12 sps:$4 sm:$0xff]  }
  0x8b   : > { %1481 = vmatprep.subr.bf16.mxu1 %v4413_v11  ;;  %v4996_v11 = vld [vmem:[%s5776_s1 + $0x34] ss:$12 sps:$4 sm:$0xff]  }
  0x8c   : > { %3519 = vmatmul.mubr.msk.bf16.gmra.mrb[12].mxu0 %vm651_vm0, %v4772_v10 }
  0x8d   : > { %4019 = vmatpush3.bf16.msra.mxu0 %v4415_v12  ;;  %1631 = vmatprep.mubr.bf16.mxu0 %v4630_v0  ;;  %v4425_v0 = vld [vmem:[%s4642_s22 + $0x348] ss:$12 sps:$4 sm:$0xff]   ;;  %v4484_v12 = vld [vmem:[%s4642_s22 + $0x484] ss:$12 sps:$4 sm:$0xff]  }
  0x8e   : > { %1482 = vmatpush1.bf16.msra.mxu1 %v4411_v13  ;;  %4020 = vmatprep.subr.bf16.mxu0 %v4419_v14  ;;  %v4482_v13 = vld [vmem:[%s4642_s22 + $0x480] ss:$12 sps:$4 sm:$0xff]   ;;  %v4488_v14 = vld [vmem:[%s4642_s22 + $0x49c] ss:$12 sps:$4 sm:$0xff]  }
  0x8f   : > { %1483 = vmatprep.subr.bf16.mxu1 %v4418_v15  ;;  %v5005_v15 = vld [vmem:[%s5776_s1 + $0x30] ss:$12 sps:$4 sm:$0xff]  }
  0x91   : > { %4021 = vmatpush3.bf16.msra.mxu0 %v4420_v16  ;;  %v4486_v16 = vld [vmem:[%s4642_s22 + $0x498] ss:$12 sps:$4 sm:$0xff]  }
  0x92   : > { %1484 = vmatpush1.bf16.msra.mxu1 %v4416_v17  ;;  %4156 = vmatprep.subr.bf16.mxu0 %v4424_v18  ;;  %v5012_v17 = vld [vmem:[%s5776_s1 + $0x4c] ss:$12 sps:$4 sm:$0xff]  }
  0x93   : > { %1526 = vmatprep.subr.bf16.mxu1 %v4423_v19  ;;  %v4489_v19 = vld [vmem:[%s4642_s22 + $0x4b0] ss:$12 sps:$4 sm:$0xff]  }
  0x94   : > { %1632 = vmatmul.mubr.bf16.vlgmr.msra.gmra.mrb[16].mxu0 %v4681_v36 }
  0x95   : > { %1486 = vmatmul.mubr.bf16.vlgmr.msra.gmra.mrb[24].mxu1 %v4681_v36  ;;  %1639 = vmatprep.mubr.bf16.mxu0 %v4687_v38  ;;  %v4429_v36 = vld [vmem:[%s4642_s22 + $0x360] ss:$12 sps:$4 sm:$0xff]  }
  0x96   : > { %1527 = vmatpush1.bf16.msra.mxu1 %v4421_v20  ;;  %1495 = vmatprep.mubr.bf16.mxu1 %v4687_v38  ;;  %v4433_v38 = vld [vmem:[%s4642_s22 + $0x368] ss:$12 sps:$4 sm:$0xff]   ;;  %v4494_v20 = vld [vmem:[%s4642_s22 + $0x4cc] ss:$12 sps:$4 sm:$0xff]  }
  0x97   : > { %4157 = vmatpush3.bf16.msra.mxu0 %v4424_v18  ;;  %1528 = vmatprep.subr.bf16.mxu1 %v4427_v21  ;;  %v4491_v18 = vld [vmem:[%s4642_s22 + $0x4b4] ss:$12 sps:$4 sm:$0xff]  }
  0x98   : > { %4158 = vmatprep.subr.bf16.mxu0 %v4428_v22  ;;  %v5021_v21 = vld [vmem:[%s5776_s1 + $0x48] ss:$12 sps:$4 sm:$0xff]  }
  0x9a   : > { %1529 = vmatpush1.bf16.msra.mxu1 %v4425_v0  ;;  %v5028_v0 = vld [vmem:[%s5776_s1 + $0x8] ss:$12 sps:$4 sm:$0xff]  }
  0x9b   : > { %4159 = vmatpush3.bf16.msra.mxu0 %v4428_v22  ;;  %4052 = vmatprep.subr.bf16.mxu1 %v4432_v23  ;;  %v4492_v22 = vld [vmem:[%s4642_s22 + $0x4c8] ss:$12 sps:$4 sm:$0xff]   ;;  %v4509_v23 = vld [vmem:[%s4642_s22 + $0x4e4] ss:$12 sps:$4 sm:$0xff]  }
  0x9c   : > { %1640 = vmatmul.mubr.bf16.gmra.mrb[20].mxu0 %v4698_v43  ;;  %2186 = vmatprep.subr.bf16.mxu0 %v4431_v24  ;;  %v4495_v24 = vld [vmem:[%s4642_s22 + $0x510] ss:$12 sps:$4 sm:$0xff]  }
  0x9d   : > { %1496 = vmatmul.mubr.bf16.gmra.mrb[28].mxu1 %v4698_v43  ;;  %1647 = vmatprep.mubr.bf16.mxu0 %v4704_v45  ;;  %v4436_v43 = vld [vmem:[%s4642_s22 + $0x37c] ss:$12 sps:$4 sm:$0xff]  }
  0x9e   : > { %1505 = vmatprep.mubr.bf16.mxu1 %v4704_v45  ;;  %v4437_v45 = vld [vmem:[%s4642_s22 + $0x440] ss:$12 sps:$4 sm:$0xff]  }
  0xa4   : > { %1648 = vmatmul.mubr.bf16.gmra.mrb[24].mxu0 %v4715_v50 }
  0xa5   : > { %1506 = vmatmul.mubr.bf16.gmra.mrb[32].mxu1 %v4715_v50  ;;  %1655 = vmatprep.mubr.bf16.mxu0 %v4722_v53  ;;  %v4434_v50 = vld [vmem:[%s4642_s22 + $0x378] ss:$12 sps:$4 sm:$0xff]  }
  0xa6   : > { %1515 = vmatprep.mubr.bf16.mxu1 %v4722_v53  ;;  %v4438_v53 = vld [vmem:[%s4642_s22 + $0x380] ss:$12 sps:$4 sm:$0xff]  }
  0xac   : > { %1656 = vmatmul.mubr.bf16.gmra.mrb[28].mxu0 %v4731_v56 }
  0xad   : > { %1516 = vmatmul.mubr.bf16.gmra.mrb[36].mxu1 %v4731_v56  ;;  %4160 = vmatprep.mubr.msk.bf16.mxu0 %vm651_vm0, %v4736_v57  ;;  %v4441_v56 = vld [vmem:[%s4642_s22 + $0x394] ss:$12 sps:$4 sm:$0xff]  }
  0xae   : > { %1558 = vmatprep.mubr.bf16.mxu1 %v4593_v1 }
  0xb4   : > { %4161 = vmatmul.mubr.msk.bf16.vlgmr.msra.gmra.mrb[32].mxu0 %vm651_vm0, %v4749_v63 }
  0xb5   : > { %3650 = vmatmul.mubr.msk.bf16.vlgmr.msra.gmra.mrb[24].mxu1 %vm651_vm0, %v4736_v57  ;;  %2187 = vmatpush1.bf16.msra.mxu0 %v4429_v36  ;;  %v4439_v57 = vld [vmem:[%s4642_s22 + $0x390] ss:$12 sps:$4 sm:$0xff]   ;;  %v4500_v36 = vld [vmem:[%s4642_s22 + $0x52c] ss:$12 sps:$4 sm:$0xff]  }
  0xb6   : > { %4053 = vmatpush3.bf16.msra.mxu1 %v4433_v38  ;;  %2188 = vmatprep.subr.bf16.mxu0 %v4436_v43  ;;  %v4507_v38 = vld [vmem:[%s4642_s22 + $0x4e0] ss:$12 sps:$4 sm:$0xff]   ;;  %v4524_v43 = vld [vmem:[%s4642_s22 + $0x4fc] ss:$12 sps:$4 sm:$0xff]  }
  0xb7   : > { %4054 = vmatprep.subr.bf16.mxu1 %v4437_v45  ;;  %1568 = vmatprep.mubr.bf16.mxu1 %v4593_v1  ;;  %v4498_v45 = vld [vmem:[%s4642_s22 + $0x528] ss:$12 sps:$4 sm:$0xff]  }
  0xb8   : > { %4164 = vmatprep.mubr.msk.bf16.mxu0 %vm651_vm0, %v4755_v3 }
  0xb9   : > { %2189 = vmatpush1.bf16.msra.mxu0 %v4434_v50  ;;  %v4503_v50 = vld [vmem:[%s4642_s22 + $0x544] ss:$12 sps:$4 sm:$0xff]  }
  0xba   : > { %4055 = vmatpush3.bf16.msra.mxu1 %v4438_v53  ;;  %2190 = vmatprep.subr.bf16.mxu0 %v4441_v56  ;;  %v4522_v53 = vld [vmem:[%s4642_s22 + $0x4f8] ss:$12 sps:$4 sm:$0xff]  }
  0xbb   : > { %4056 = vmatprep.subr.bf16.mxu1 %v4442_v25  ;;  %v4528_v56 = vld [vmem:[%s4642_s22 + $0x5d8] ss:$12 sps:$4 sm:$0xff]   ;;  %v4501_v25 = vld [vmem:[%s4642_s22 + $0x540] ss:$12 sps:$4 sm:$0xff]  }
  0xbc   : > { %4165 = vmatmul.mubr.msk.bf16.gmra.mrb[36].mxu0 %vm651_vm0, %v4772_v10 }
  0xbd   : > { %3651 = vmatmul.mubr.msk.bf16.gmra.mrb[28].mxu1 %vm651_vm0, %v4749_v63  ;;  %2191 = vmatpush1.bf16.msra.mxu0 %v4439_v57  ;;  %v4512_v57 = vld [vmem:[%s4642_s22 + $0x574] ss:$12 sps:$4 sm:$0xff]  }
  0xbe   : > { %4057 = vmatpush3.bf16.msra.mxu1 %v4443_v26  ;;  %2192 = vmatprep.subr.bf16.mxu0 %v4446_v27  ;;  %v4510_v26 = vld [vmem:[%s4642_s22 + $0x570] ss:$12 sps:$4 sm:$0xff]   ;;  %v4515_v27 = vld [vmem:[%s4642_s22 + $0x58c] ss:$12 sps:$4 sm:$0xff]  }
  0xbf   : > { %4058 = vmatprep.subr.bf16.mxu1 %v4447_v28  ;;  %1578 = vmatprep.mubr.bf16.mxu1 %v4593_v1  ;;  %v4518_v28 = vld [vmem:[%s4642_s22 + $0x5a4] ss:$12 sps:$4 sm:$0xff]  }
  0xc0   : > { %2218 = vmatprep.mubr.bf16.mxu0 %v4941_v33 }
  0xc1   : > { %2193 = vmatpush1.bf16.msra.mxu0 %v4444_v29 }
  0xc2   : > { %4059 = vmatpush3.bf16.msra.mxu1 %v4448_v30  ;;  %2194 = vmatprep.subr.bf16.mxu0 %v4451_v31 }
  0xc3   : > { %4060 = vmatprep.subr.bf16.mxu1 %v4452_v32 }
  0xc5   : > { %3652 = vmatmul.mubr.msk.bf16.gmra.mrb[32].mxu1 %vm651_vm0, %v4755_v3  ;;  %2195 = vmatpush1.bf16.msra.mxu0 %v4449_v34  ;;  %v4516_v34 = vld [vmem:[%s4642_s22 + $0x5a0] ss:$12 sps:$4 sm:$0xff]  }
  0xc6   : > { %4061 = vmatpush3.bf16.msra.mxu1 %v4453_v35  ;;  %2196 = vmatprep.subr.bf16.mxu0 %v4456_v37  ;;  %v4521_v37 = vld [vmem:[%s4642_s22 + $0x5bc] ss:$12 sps:$4 sm:$0xff]  }
  0xc7   : > { %4062 = vmatprep.subr.bf16.mxu1 %v4457_v39  ;;  %1588 = vmatprep.mubr.bf16.mxu1 %v4593_v1 }
  0xc9   : > { %2197 = vmatpush1.bf16.msra.mxu0 %v4454_v40  ;;  %v4519_v40 = vld [vmem:[%s4642_s22 + $0x5b8] ss:$12 sps:$4 sm:$0xff]  }
  0xca   : > { %4063 = vmatpush3.bf16.msra.mxu1 %v4458_v41  ;;  %2198 = vmatprep.subr.bf16.mxu0 %v4461_v42  ;;  %v4527_v41 = vld [vmem:[%s4642_s22 + $0x5d4] ss:$12 sps:$4 sm:$0xff]  }
  0xcb   : > { %4064 = vmatprep.subr.bf16.mxu1 %v4462_v44 }
  0xcd   : > { %3653 = vmatmul.mubr.msk.bf16.gmra.mrb[36].mxu1 %vm651_vm0, %v4772_v10  ;;  %2199 = vmatpush1.bf16.msra.mxu0 %v4459_v46  ;;  %v4529_v46 = vld [vmem:[%s4642_s22 + $0x518] ss:$12 sps:$4 sm:$0xff]  }
  0xce   : > { %4065 = vmatpush3.bf16.msra.mxu1 %v4463_v47  ;;  %2200 = vmatprep.subr.bf16.mxu0 %v4466_v48 }
  0xcf   : > { %4066 = vmatprep.subr.bf16.mxu1 %v4467_v49  ;;  %2364 = vmatprep.mubr.bf16.mxu1 %v4941_v33  ;;  %v4525_v49 = vld [vmem:[%s4642_s22 + $0x5d0] ss:$12 sps:$4 sm:$0xff]  }
  0xd1   : > { %2201 = vmatpush1.bf16.msra.mxu0 %v4464_v51  ;;  %v4533_v51 = vld [vmem:[%s4642_s22 + $0x5f0] ss:$12 sps:$4 sm:$0xff]  }
  0xd2   : > { %4067 = vmatpush3.bf16.msra.mxu1 %v4468_v52  ;;  %2202 = vmatprep.subr.bf16.mxu0 %v4471_v54  ;;  %v4532_v54 = vld [vmem:[%s4642_s22 + $0x5ec] ss:$12 sps:$4 sm:$0xff]  }
  0xd3   : > { %4168 = vmatprep.subr.bf16.mxu1 %v4472_v55 }
  0xd5   : > { %2365 = vmatmul.mubr.bf16.vlgmr.msra.gmra.mrb[40].mxu1 %v4972_v61  ;;  %2203 = vmatpush1.bf16.msra.mxu0 %v4469_v58  ;;  %v4534_v58 = vld [vmem:[%s4642_s22 + $0x530] ss:$12 sps:$4 sm:$0xff]  }
  0xd6   : > { %4169 = vmatpush3.bf16.msra.mxu1 %v4472_v55  ;;  %2204 = vmatprep.subr.bf16.mxu0 %v4475_v59  ;;  %v4530_v59 = vld [vmem:[%s4642_s22 + $0x5e8] ss:$12 sps:$4 sm:$0xff]  }
  0xd7   : > { %2372 = vmatprep.mubr.bf16.mxu1 %v4980_v4  ;;  %4170 = vmatprep.subr.bf16.mxu1 %v4485_v60 }
  0xd9   : > { %2205 = vmatpush1.bf16.msra.mxu0 %v4473_v62  ;;  %v4537_v62 = vld [vmem:[%s4642_s22 + $0x604] ss:$12 sps:$4 sm:$0xff]  }
  0xda   : > { %2206 = vmatprep.subr.bf16.mxu0 %v4478_v2  ;;  %4171 = vmatpush3.bf16.msra.mxu1 %v4485_v60  ;;  %v4538_v60 = vld [vmem:[%s4642_s22 + $0x608] ss:$12 sps:$4 sm:$0xff]  }
  0xdb   : > { %2919 = vmatprep.subr.bf16.mxu1 %v4497_v5 }
  0xdd   : > { %2373 = vmatmul.mubr.bf16.gmra.mrb[44].mxu1 %v4989_v8  ;;  %2207 = vmatpush1.bf16.msra.mxu0 %v4476_v6  ;;  %v4539_v6 = vld [vmem:[%s4642_s22 + $0x548] ss:$12 sps:$4 sm:$0xff]  }
  0xde   : > { %2208 = vmatprep.subr.bf16.mxu0 %v4481_v7  ;;  %2380 = vmatprep.mubr.bf16.mxu1 %v4996_v11 }
  0xe1   : > { %2209 = vmatpush1.bf16.msra.mxu0 %v4479_v9 }
  0xe2   : > { %2210 = vmatprep.subr.bf16.mxu0 %v4484_v12  ;;  %v4535_v12 = vld [vmem:[%s4642_s22 + $0x600] ss:$12 sps:$4 sm:$0xff]  }
  0xe5   : > { %2381 = vmatmul.mubr.bf16.gmra.mrb[48].mxu1 %v5005_v15  ;;  %2211 = vmatpush1.bf16.msra.mxu0 %v4482_v13  ;;  %v4543_v13 = vld [vmem:[%s4642_s22 + $0x620] ss:$12 sps:$4 sm:$0xff]  }
  0xe6   : > { %2212 = vmatprep.subr.bf16.mxu0 %v4488_v14  ;;  %2388 = vmatprep.mubr.bf16.mxu1 %v5012_v17 }
  0xe9   : > { %2213 = vmatpush1.bf16.msra.mxu0 %v4486_v16  ;;  %v4542_v16 = vld [vmem:[%s4642_s22 + $0x61c] ss:$12 sps:$4 sm:$0xff]  }
  0xea   : > { %2214 = vmatprep.subr.bf16.mxu0 %v4491_v18 }
  0xed   : > { %2389 = vmatmul.mubr.bf16.gmra.mrb[52].mxu1 %v5021_v21  ;;  %2215 = vmatpush1.bf16.msra.mxu0 %v4489_v19  ;;  %v5098_v19 = vld [vmem:[%s5776_s1 + $0x20] ss:$12 sps:$4 sm:$0xff]  }
  0xee   : > { %2216 = vmatprep.subr.bf16.mxu0 %v4494_v20  ;;  %4172 = vmatprep.mubr.msk.bf16.mxu1 %vm651_vm0, %v5028_v0  ;;  %v4544_v20 = vld [vmem:[%s4642_s22 + $0x560] ss:$12 sps:$4 sm:$0xff]  }
  0xf1   : > { %2217 = vmatpush1.bf16.msra.mxu0 %v4492_v22  ;;  %v4540_v22 = vld [vmem:[%s4642_s22 + $0x618] ss:$12 sps:$4 sm:$0xff]  }
  0xf2   : > { %2259 = vmatprep.subr.bf16.mxu0 %v4509_v23  ;;  %v4548_v23 = vld [vmem:[%s4642_s22 + $0x638] ss:$12 sps:$4 sm:$0xff]  }
  0xf4   : > { %2219 = vmatmul.mubr.bf16.vlgmr.msra.gmra.mrb[40].mxu0 %v4972_v61 }
  0xf5   : > { %4173 = vmatmul.mubr.msk.bf16.vlgmr.msra.gmra.mrb[56].mxu1 %vm651_vm0, %v4749_v63  ;;  %2228 = vmatprep.mubr.bf16.mxu0 %v4980_v4  ;;  %v4506_v63 = vld [vmem:[%s4642_s22 + $0x55c] ss:$12 sps:$4 sm:$0xff]  }
  0xf6   : > { %2920 = vmatpush1.bf16.msra.mxu1 %v4495_v24  ;;  %4176 = vmatprep.mubr.msk.bf16.mxu1 %vm651_vm0, %v4755_v3  ;;  %v4504_v3 = vld [vmem:[%s4642_s22 + $0x558] ss:$12 sps:$4 sm:$0xff]   ;;  %v4547_v24 = vld [vmem:[%s4642_s22 + $0x634] ss:$12 sps:$4 sm:$0xff]  }
  0xf7   : > { %2921 = vmatprep.subr.bf16.mxu1 %v4500_v36  ;;  %2260 = vmatpush1.bf16.msra.mxu0 %v4507_v38 }
  0xf8   : > { %2261 = vmatprep.subr.bf16.mxu0 %v4524_v43  ;;  %v4549_v43 = vld [vmem:[%s4642_s22 + $0x578] ss:$12 sps:$4 sm:$0xff]  }
  0xfa   : > { %2922 = vmatpush1.bf16.msra.mxu1 %v4498_v45 }
  0xfb   : > { %2923 = vmatprep.subr.bf16.mxu1 %v4503_v50  ;;  %2262 = vmatpush1.bf16.msra.mxu0 %v4522_v53  ;;  %v4545_v53 = vld [vmem:[%s4642_s22 + $0x630] ss:$12 sps:$4 sm:$0xff]  }
  0xfc   : > { %2229 = vmatmul.mubr.bf16.gmra.mrb[44].mxu0 %v4989_v8  ;;  %4098 = vmatprep.subr.bf16.mxu0 %v4528_v56  ;;  %v4553_v56 = vld [vmem:[%s4642_s22 + $0x650] ss:$12 sps:$4 sm:$0xff]  }
  0xfd   : > { %4177 = vmatmul.mubr.msk.bf16.gmra.mrb[60].mxu1 %vm651_vm0, %v4772_v10  ;;  %2238 = vmatprep.mubr.bf16.mxu0 %v4996_v11  ;;  %v4513_v10 = vld [vmem:[%s4642_s22 + $0x588] ss:$12 sps:$4 sm:$0xff]  }
  0xfe   : > { %2924 = vmatpush1.bf16.msra.mxu1 %v4501_v25  ;;  %2951 = vmatprep.mubr.bf16.mxu1 %v4941_v33 }
  0xff   : > { %2925 = vmatprep.subr.bf16.mxu1 %v4506_v63  ;;  %v4552_v63 = vld [vmem:[%s4642_s22 + $0x64c] ss:$12 sps:$4 sm:$0xff]  }
 0x102   : > { %2926 = vmatpush1.bf16.msra.mxu1 %v4504_v3 }
 0x103   : > { %2927 = vmatprep.subr.bf16.mxu1 %v4512_v57  ;;  %v5114_v57 = vld [vmem:[%s5776_s1 + $0x38] ss:$12 sps:$4 sm:$0xff]  }
 0x104   : > { %2239 = vmatmul.mubr.bf16.gmra.mrb[48].mxu0 %v5005_v15 }
 0x105   : > { %2248 = vmatprep.mubr.bf16.mxu0 %v5012_v17 }
 0x106   : > { %2928 = vmatpush1.bf16.msra.mxu1 %v4510_v26  ;;  %v4554_v26 = vld [vmem:[%s4642_s22 + $0x590] ss:$12 sps:$4 sm:$0xff]  }
 0x107   : > { %2929 = vmatprep.subr.bf16.mxu1 %v4515_v27  ;;  %v3976_v29 = vpop.f32.mrb[0].mxu1  ;;  %v4550_v27 = vld [vmem:[%s4642_s22 + $0x648] ss:$12 sps:$4 sm:$0xff]  }
 0x108   : > { %v3977_v30 = vpop.f32.mrb[1].mxu1 }
 0x109   : > { %v5062_v31 = vadd.f32 %v3977_v30, %v3976_v29  ;;  %v3979_v32 = vpop.f32.mrb[2].mxu1 }
 0x10a   : > { %2930 = vmatpush1.bf16.msra.mxu1 %v4513_v10  ;;  %v3980_v35 = vpop.f32.mrb[3].mxu1  ;;  %v4558_v10 = vld [vmem:[%s4642_s22 + $0x668] ss:$12 sps:$4 sm:$0xff]  }
 0x10b   : > { %2931 = vmatprep.subr.bf16.mxu1 %v4518_v28  ;;  %v5066_v39 = vadd.f32 %v3980_v35, %v3979_v32  ;;  %v4557_v28 = vld [vmem:[%s4642_s22 + $0x664] ss:$12 sps:$4 sm:$0xff]  }
 0x10c   : > { %2249 = vmatmul.mubr.bf16.gmra.mrb[52].mxu0 %v5021_v21 }
 0x10d   : > { %2291 = vmatprep.mubr.bf16.mxu0 %v4593_v1 }
 0x10e   : > { %2932 = vmatpush1.bf16.msra.mxu1 %v4516_v34  ;;  %v4559_v34 = vld [vmem:[%s4642_s22 + $0x5a8] ss:$12 sps:$4 sm:$0xff]  }
 0x10f   : > { %2933 = vmatprep.subr.bf16.mxu1 %v4521_v37  ;;  %v3982_v42 = vpop.f32.mrb[4].mxu1 }
 0x110   : > { %v3983_v44 = vpop.f32.mrb[5].mxu1 }
 0x111   : > { %v5073_v47 = vadd.f32 %v3983_v44, %v3982_v42  ;;  %v3985_v48 = vpop.f32.mrb[6].mxu1 }
 0x112   : > { %2934 = vmatpush1.bf16.msra.mxu1 %v4519_v40  ;;  %v3986_v52 = vpop.f32.mrb[7].mxu1  ;;  %v4555_v40 = vld [vmem:[%s4642_s22 + $0x660] ss:$12 sps:$4 sm:$0xff]  }
 0x113   : > { %2935 = vmatprep.subr.bf16.mxu1 %v4527_v41  ;;  %v5078_v55 = vadd.f32 %v3986_v52, %v3985_v48  ;;  %v4563_v41 = vld [vmem:[%s4642_s22 + $0x680] ss:$12 sps:$4 sm:$0xff]  }
 0x114   : > { %3784 = vmatmul.mubr.msk.bf16.vlgmr.msra.gmra.mrb[40].mxu0 %vm651_vm0, %v5028_v0  ;;  %v4564_v48 = vld [vmem:[%s4642_s22 + $0x5c0] ss:$12 sps:$4 sm:$0xff]  }
 0x115   : > { %4099 = vmatpush3.bf16.msra.mxu0 %v4529_v46  ;;  %2301 = vmatprep.mubr.bf16.mxu0 %v4593_v1  ;;  %v4562_v46 = vld [vmem:[%s4642_s22 + $0x67c] ss:$12 sps:$4 sm:$0xff]  }
 0x116   : > { %2936 = vmatpush1.bf16.msra.mxu1 %v4525_v49  ;;  %4100 = vmatprep.subr.bf16.mxu0 %v4533_v51  ;;  %v4560_v49 = vld [vmem:[%s4642_s22 + $0x678] ss:$12 sps:$4 sm:$0xff]  }
 0x117   : > { %2937 = vmatprep.subr.bf16.mxu1 %v4532_v54  ;;  %v3988_v2 = vpop.f32.mrb[8].mxu1  ;;  %v4568_v51 = vld [vmem:[%s4642_s22 + $0x698] ss:$12 sps:$4 sm:$0xff]  }
 0x118   : > { %v3989_v5 = vpop.f32.mrb[9].mxu1 }
 0x119   : > { %4101 = vmatpush3.bf16.msra.mxu0 %v4534_v58  ;;  %v5088_v7 = vadd.f32 %v3989_v5, %v3988_v2  ;;  %v3991_v9 = vpop.f32.mrb[10].mxu1  ;;  %v4571_v2 = vld [vmem:[%s4642_s22 + $0x6ac] ss:$12 sps:$4 sm:$0xff]  }
 0x11a   : > { %2938 = vmatpush1.bf16.msra.mxu1 %v4530_v59  ;;  %4102 = vmatprep.subr.bf16.mxu0 %v4538_v60  ;;  %v3992_v14 = vpop.f32.mrb[11].mxu1 }
 0x11b   : > { %2939 = vmatprep.subr.bf16.mxu1 %v4537_v62  ;;  %v5093_v18 = vadd.f32 %v3992_v14, %v3991_v9  ;;  %v5200_v14 = vpop.permute.xlu1 %952 }
 0x11c   : > { %3785 = vmatmul.mubr.msk.bf16.gmra.mrb[44].mxu0 %vm651_vm0, %v5098_v19 }
 0x11d   : > { %4103 = vmatpush3.bf16.msra.mxu0 %v4539_v6  ;;  %2311 = vmatprep.mubr.bf16.mxu0 %v4593_v1  ;;  %v4572_v6 = vld [vmem:[%s4642_s22 + $0x6b0] ss:$12 sps:$4 sm:$0xff]  }
 0x11e   : > { %2940 = vmatpush1.bf16.msra.mxu1 %v4535_v12  ;;  %4104 = vmatprep.subr.bf16.mxu0 %v4543_v13  ;;  %v5198_v13 = vpop.permute.xlu0 %942 }
 0x11f   : > { %2941 = vmatprep.subr.bf16.mxu1 %v4542_v16  ;;  %v3994_v36 = vpop.f32.mrb[12].mxu1  ;;  %5784 = vst [vmem:[#allocation2_spill] sm:$0xff] %v5198_v13 }
 0x120   : > { %v3995_v38 = vpop.f32.mrb[13].mxu1 }
 0x121   : > { %4105 = vmatpush3.bf16.msra.mxu0 %v4544_v20  ;;  %v3996_v45 = vadd.f32 %v3995_v38, %v3994_v36  ;;  %v3997_v50 = vpop.f32.mrb[14].mxu1 }
 0x122   : > { %2942 = vmatpush1.bf16.msra.mxu1 %v4540_v22  ;;  %4106 = vmatprep.subr.bf16.mxu0 %v4548_v23  ;;  %v3998_v25 = vpop.f32.mrb[15].mxu1  ;;  %v5217_v22 = vpop.permute.xlu1 %957 }
 0x123   : > { %2943 = vmatprep.subr.bf16.mxu1 %v4547_v24  ;;  %v3999_v3 = vadd.f32 %v3998_v25, %v3997_v50 }
 0x124   : > { %3786 = vmatmul.mubr.msk.bf16.gmra.mrb[48].mxu0 %vm651_vm0, %v5114_v57 }
 0x125   : > { %4107 = vmatpush3.bf16.msra.mxu0 %v4549_v43  ;;  %2321 = vmatprep.mubr.bf16.mxu0 %v4593_v1 }
 0x126   : > { %2944 = vmatpush1.bf16.msra.mxu1 %v4545_v53  ;;  %4108 = vmatprep.subr.bf16.mxu0 %v4553_v56  ;;  %v5230_v36 = vpop.permute.xlu1 %967 }
 0x127   : > { %2945 = vmatprep.subr.bf16.mxu1 %v4552_v63  ;;  %v4150_v29 = vpop.f32.mrb[16].mxu1 }
 0x128   : > { %v5124_v30 = vadd.f32 %v4150_v29, %v5073_v47  ;;  %v909_v32 = vpop.f32.mrb[17].mxu1 }
 0x129   : > { %4109 = vmatpush3.bf16.msra.mxu0 %v4554_v26  ;;  %v5128_v35 = vadd.f32 %v5062_v31, %v909_v32  ;;  %v4151_v37 = vpop.f32.mrb[18].mxu1  ;;  %v5142_v31 = vld [vmem:[%s5776_s1 + $0x50] ss:$12 sps:$4 sm:$0xff]  }
 0x12a   : > { %2946 = vmatpush1.bf16.msra.mxu1 %v4550_v27  ;;  %4110 = vmatprep.subr.bf16.mxu0 %v4558_v10  ;;  %v5133_v42 = vadd.f32 %v4151_v37, %v5078_v55  ;;  %v912_v44 = vpop.f32.mrb[19].mxu1 }
 0x12b   : > { %2947 = vmatprep.subr.bf16.mxu1 %v4557_v28  ;;  %v5137_v47 = vadd.f32 %v5066_v39, %v912_v44  ;;  %v4567_v39 = vld [vmem:[%s4642_s22 + $0x694] ss:$12 sps:$4 sm:$0xff]   ;;  %v982_v44 = vmul.f32 %v5198_v13, %v5128_v35 }
 0x12c   : > { %3787 = vmatmul.mubr.msk.bf16.gmra.mrb[52].mxu0 %vm651_vm0, %v5142_v31 }
 0x12d   : > { %4111 = vmatpush3.bf16.msra.mxu0 %v4559_v34  ;;  %3097 = vmatprep.mubr.bf16.mxu0 %v4941_v33  ;;  %v4565_v33 = vld [vmem:[%s4642_s22 + $0x690] ss:$12 sps:$4 sm:$0xff]  }
 0x12e   : > { %2948 = vmatpush1.bf16.msra.mxu1 %v4555_v40  ;;  %4112 = vmatprep.subr.bf16.mxu0 %v4563_v41  ;;  %v988_v41 = vmul.f32 %v5200_v14, %v5124_v30 }
 0x12f   : > { %2949 = vmatprep.subr.bf16.mxu1 %v4562_v46 }
 0x130   : > { %v4154_v52 = vpop.f32.mrb[20].mxu1 }
 0x131   : > { %v5151_v54 = vadd.f32 %v4154_v52, %v3996_v45  ;;  %v925_v55 = vpop.f32.mrb[21].mxu1  ;;  %4113 = vmatpush3.bf16.msra.mxu0 %v4564_v48  ;;  %v991_v48 = vmul.f32 %v5217_v22, %v5133_v42 }
 0x132   : > { %2950 = vmatpush1.bf16.msra.mxu1 %v4560_v49  ;;  %v5154_v58 = vadd.f32 %v5088_v7, %v925_v55  ;;  %v4155_v59 = vpop.f32.mrb[22].mxu1  ;;  %4180 = vmatprep.subr.bf16.mxu0 %v4568_v51  ;;  %v4569_v7 = vld [vmem:[%s4642_s22 + $0x6a8] ss:$12 sps:$4 sm:$0xff]   ;;  %s4257_s22 = smul.u32 96, %s5802_s16 }
 0x133   : > { %v5157_v60 = vadd.f32 %v4155_v59, %v3999_v3  ;;  %v928_v62 = vpop.f32.mrb[23].mxu1  ;;  %2992 = vmatprep.subr.bf16.mxu1 %v4567_v39 }
 0x134   : > { %v5161_v5 = vadd.f32 %v5093_v18, %v928_v62  ;;  %3098 = vmatmul.mubr.bf16.vlgmr.msra.gmra.mrb[56].mxu0 %v4972_v61  ;;  %v5213_v18 = vpop.permute.xlu0 %947  ;;  %s5689_s7 = scalar_lea.vmem %s5779_s4, %s4257_s22 }
 0x135   : > { %2952 = vmatmul.mubr.bf16.vlgmr.msra.gmra.mrb[64].mxu1 %v4972_v61  ;;  %3105 = vmatprep.mubr.bf16.mxu0 %v4980_v4  ;;  %5785 = vst [vmem:[#allocation3_spill] sm:$0xff] %v5213_v18  ;;  %v985_v35 = vmul.f32 %v5213_v18, %v5137_v47 }
 0x136   : > { %2993 = vmatpush1.bf16.msra.mxu1 %v4565_v33  ;;  %2961 = vmatprep.mubr.bf16.mxu1 %v4980_v4 }
 0x137   : > { %4181 = vmatpush3.bf16.msra.mxu0 %v4568_v51  ;;  %2994 = vmatprep.subr.bf16.mxu1 %v4571_v2 }
 0x138   : > { %4182 = vmatprep.subr.bf16.mxu0 %v4572_v6 }
 0x13a   : > { %2995 = vmatpush1.bf16.msra.mxu1 %v4569_v7 }
 0x13b   : > { %4183 = vmatpush3.bf16.msra.mxu0 %v4572_v6 }
 0x13c   : > { %3106 = vmatmul.mubr.bf16.gmra.mrb[60].mxu0 %v4989_v8 }
 0x13d   : > { %2962 = vmatmul.mubr.bf16.gmra.mrb[68].mxu1 %v4989_v8  ;;  %3113 = vmatprep.mubr.bf16.mxu0 %v4996_v11 }
 0x13e   : > { %2971 = vmatprep.mubr.bf16.mxu1 %v4996_v11 }
 0x144   : > { %3114 = vmatmul.mubr.bf16.gmra.mrb[64].mxu0 %v5005_v15 }
 0x145   : > { %2972 = vmatmul.mubr.bf16.gmra.mrb[72].mxu1 %v5005_v15  ;;  %3121 = vmatprep.mubr.bf16.mxu0 %v5012_v17 }
 0x146   : > { %2981 = vmatprep.mubr.bf16.mxu1 %v5012_v17 }
 0x147   : > { %v5177_v61 = vpop.f32.mrb[0].mxu0 }
 0x148   : > { %v5179_v4 = vpop.f32.mrb[1].mxu0 }
 0x149   : > { %v5181_v9 = vpop.f32.mrb[2].mxu0 }
 0x14a   : > { %v5183_v12 = vpop.f32.mrb[3].mxu0 }
 0x14c   : > { %3122 = vmatmul.mubr.bf16.gmra.mrb[68].mxu0 %v5021_v21 }
 0x14d   : > { %2982 = vmatmul.mubr.bf16.gmra.mrb[76].mxu1 %v5021_v21  ;;  %4184 = vmatprep.mubr.msk.bf16.mxu0 %vm651_vm0, %v5028_v0 }
 0x14e   : > { %3024 = vmatprep.mubr.bf16.mxu1 %v4593_v1 }
 0x14f   : > { %v5190_v8 = vpop.f32.mrb[4].mxu0 }
 0x150   : > { %v5192_v11 = vpop.f32.mrb[5].mxu0 }
 0x151   : > { %v5194_v15 = vpop.f32.mrb[6].mxu0 }
 0x152   : > { %v5196_v17 = vpop.f32.mrb[7].mxu0 }
 0x154   : > { %4185 = vmatmul.mubr.msk.bf16.vlgmr.msra.gmra.mrb[72].mxu0 %vm651_vm0, %v5098_v19 }
 0x155   : > { %3918 = vmatmul.mubr.msk.bf16.vlgmr.msra.gmra.mrb[64].mxu1 %vm651_vm0, %v5028_v0  ;;  %4188 = vmatprep.mubr.msk.bf16.mxu0 %vm651_vm0, %v5114_v57  ;;  %v5226_v0 = vpop.permute.xlu0 %962 }
 0x156   : > { %3034 = vmatprep.mubr.bf16.mxu1 %v4593_v1  ;;  %v994_v6 = vmul.f32 %v5226_v0, %v5154_v58  ;;  %v983_v58 = vmul.f32 %v5213_v18, %v5181_v9 }
 0x157   : > { %v5209_v21 = vpop.f32.mrb[8].mxu0 }
 0x158   : > { %v5211_v16 = vpop.f32.mrb[9].mxu0 }
 0x159   : > { %v5215_v20 = vpop.f32.mrb[10].mxu0  ;;  %v5238_v50 = vpop.permute.xlu0 %972 }
 0x15a   : > { %v5219_v23 = vpop.f32.mrb[11].mxu0  ;;  %v1000_v42 = vmul.f32 %v5238_v50, %v5151_v54  ;;  %v980_v54 = vmul.f32 %v5198_v13, %v5177_v61  ;;  %v989_v61 = vmul.f32 %v5217_v22, %v5194_v15 }
 0x15c   : > { %4189 = vmatmul.mubr.msk.bf16.gmra.mrb[76].mxu0 %vm651_vm0, %v5142_v31 }
 0x15d   : > { %3919 = vmatmul.mubr.msk.bf16.gmra.mrb[68].mxu1 %vm651_vm0, %v5098_v19  ;;  %v5242_v19 = vpop.permute.xlu1 %977  ;;  %v5247_v26 = vpop.permute.xlu0 %1006 }
 0x15e   : > { %3044 = vmatprep.mubr.bf16.mxu1 %v4593_v1  ;;  %v5274_v39 = vadd.f32 %v5247_v26, %v982_v44  ;;  %v1003_v7 = vmul.f32 %v5242_v19, %v5157_v60 }
 0x15f   : > { %v5228_v24 = vpop.f32.mrb[12].mxu0 }
 0x160   : > { %v5232_v38 = vpop.f32.mrb[13].mxu0 }
 0x161   : > { %v5234_v43 = vpop.f32.mrb[14].mxu0  ;;  %v5251_v10 = vpop.permute.xlu1 %1011 }
 0x162   : > { %v5236_v45 = vpop.f32.mrb[15].mxu0  ;;  %v5255_v29 = vpop.permute.xlu0 %1016  ;;  %v5309_v60 = vadd.f32 %v5251_v10, %v985_v35 }
 0x163   : > { %v5279_v30 = vadd.f32 %v5255_v29, %v988_v41 }
 0x165   : > { %3920 = vmatmul.mubr.msk.bf16.gmra.mrb[72].mxu1 %vm651_vm0, %v5114_v57  ;;  %v5259_v34 = vpop.permute.xlu1 %1021 }
 0x166   : > { %3054 = vmatprep.mubr.bf16.mxu1 %v4593_v1  ;;  %v5267_v46 = vpop.permute.xlu0 %1026  ;;  %v5288_v62 = vadd.f32 %v5259_v34, %v991_v48 }
 0x167   : > { %v4022_v53 = vpop.f32.mrb[16].mxu0 }
 0x168   : > { %v4023_v56 = vpop.f32.mrb[17].mxu0 }
 0x169   : > { %v5245_v25 = vadd.f32 %v4023_v56, %v4022_v53  ;;  %v4025_v63 = vpop.f32.mrb[18].mxu0  ;;  %v5271_v49 = vpop.permute.xlu1 %1031  ;;  %v997_v56 = vmul.f32 %v5230_v36, %v5161_v5  ;;  %v986_v5 = vmul.f32 %v5200_v14, %v5190_v8  ;;  %v992_v8 = vmul.f32 %v5226_v0, %v5209_v21 }
 0x16a   : > { %v4026_v3 = vpop.f32.mrb[19].mxu0  ;;  %v5295_v53 = vpop.permute.xlu0 %1036 }
 0x16b   : > { %v5249_v27 = vadd.f32 %v4026_v3, %v4025_v63  ;;  %v981_v3 = vmul.f32 %v5198_v13, %v5179_v4  ;;  %v990_v4 = vmul.f32 %v5217_v22, %v5196_v17  ;;  %v5323_v41 = vadd.f32 %v5295_v53, %v1000_v42 }
 0x16c   : > { %v5336_v17 = vadd.f32 %v5271_v49, %v997_v56 }
 0x16d   : > { %3921 = vmatmul.mubr.msk.bf16.gmra.mrb[76].mxu1 %vm651_vm0, %v5142_v31  ;;  %v5300_v63 = vpop.permute.xlu1 %1041  ;;  %v5340_v48 = vadd.f32 %v5247_v26, %v981_v3  ;;  %v5361_v56 = vadd.f32 %v5259_v34, %v990_v4  ;;  %v995_v4 = vmul.f32 %v5230_v36, %v5215_v20 }
 0x16e   : > { %v5333_v15 = vadd.f32 %v5300_v63, %v1003_v7  ;;  %v5358_v7 = vadd.f32 %v5259_v34, %v989_v61 }
 0x16f   : > { %v4028_v57 = vpop.f32.mrb[20].mxu0  ;;  %v1069_v61 = vmax.f32 %v5340_v48, 0.0 }
 0x170   : > { %v4029_v28 = vpop.f32.mrb[21].mxu0 }
 0x171   : > { %v5257_v1 = vadd.f32 %v4029_v28, %v4028_v57  ;;  %v4031_v32 = vpop.f32.mrb[22].mxu0  ;;  %v984_v57 = vmul.f32 %v5213_v18, %v5183_v12  ;;  %v987_v28 = vmul.f32 %v5200_v14, %v5192_v11  ;;  %v5326_v12 = vadd.f32 %v5267_v46, %v994_v6 }
 0x172   : > { %v4032_v37 = vpop.f32.mrb[23].mxu0 }
 0x173   : > { %v5261_v40 = vadd.f32 %v4032_v37, %v4031_v32  ;;  %v5346_v21 = vadd.f32 %v5251_v10, %v984_v57  ;;  %v5352_v35 = vadd.f32 %v5255_v29, %v987_v28 }
 0x177   : > { %v4034_v31 = vpop.f32.mrb[24].mxu0 }
 0x178   : > { %v4035_v51 = vpop.f32.mrb[25].mxu0 }
 0x179   : > { %v5276_v52 = vadd.f32 %v4035_v51, %v4034_v31  ;;  %v4037_v55 = vpop.f32.mrb[26].mxu0  ;;  %v1044_v31 = vadd.f32 %v5247_v26, %v980_v54  ;;  %v5343_v51 = vadd.f32 %v5251_v10, %v983_v58  ;;  %v993_v54 = vmul.f32 %v5226_v0, %v5211_v16 }
 0x17a   : > { %v4038_v59 = vpop.f32.mrb[27].mxu0  ;;  %v5367_v58 = vadd.f32 %v5267_v46, %v992_v8  ;;  %v1072_v16 = vmax.f32 %v5346_v21, 0.0  ;;  %v5388_v21 = vmul.f32 %v5230_v36, %v5219_v23 }
 0x17b   : > { %v5283_v33 = vadd.f32 %v4038_v59, %v4037_v55  ;;  %v5349_v59 = vadd.f32 %v5255_v29, %v986_v5  ;;  %v5393_v5 = vadd.f32 %v5271_v49, %v995_v4 }
 0x17f   : > { %v4040_v32 = vpop.f32.mrb[28].mxu0 }
 0x180   : > { %v4041_v9 = vpop.f32.mrb[29].mxu0 }
 0x181   : > { %v5330_v11 = vadd.f32 %v4041_v9, %v4040_v32  ;;  %v4043_v44 = vpop.f32.mrb[30].mxu0  ;;  %v1068_v32 = vmax.f32 %v1044_v31, 0.0  ;;  %v1071_v9 = vmax.f32 %v5343_v51, 0.0  ;;  %v5382_v31 = vadd.f32 %v5267_v46, %v993_v54 }
 0x182   : > { %v4044_v55 = vpop.f32.mrb[31].mxu0 }
 0x183   : > { %v5354_v42 = vadd.f32 %v4044_v55, %v4043_v44 }
 0x187   : > { %v4162_v55 = vpop.f32.mrb[32].mxu0 }
 0x188   : > { %v1560_v48 = vpop.f32.mrb[24].mxu1  ;;  %v1707_v28 = vadd.f32 %v4162_v55, %v5257_v1  ;;  %v1698_v20 = vpop.f32.mrb[33].mxu0 }
 0x189   : > { %v1729_v57 = vmul.f32 %v1560_v48, %v5198_v13  ;;  %v1562_v8 = vpop.f32.mrb[25].mxu1  ;;  %v1699_v3 = vadd.f32 %v5245_v25, %v1698_v20  ;;  %v4163_v44 = vpop.f32.mrb[34].mxu0 }
 0x18a   : > { %v1730_v54 = vmul.f32 %v1562_v8, %v5198_v13  ;;  %v1737_v1 = vmul.f32 %v1707_v28, %v5200_v14  ;;  %v1564_v55 = vpop.f32.mrb[26].mxu1  ;;  %v1710_v51 = vadd.f32 %v4163_v44, %v5261_v40  ;;  %v1701_v6 = vpop.f32.mrb[35].mxu0 }
 0x18b   : > { %v1753_v23 = vadd.f32 %v1729_v57, %v5247_v26  ;;  %v1732_v37 = vmul.f32 %v1564_v55, %v5213_v18  ;;  %v1731_v48 = vmul.f32 %v1699_v3, %v5198_v13  ;;  %v1566_v2 = vpop.f32.mrb[27].mxu1  ;;  %v1702_v25 = vadd.f32 %v5249_v27, %v1701_v6 }
 0x18c   : > { %v1754_v4 = vadd.f32 %v1730_v54, %v5247_v26  ;;  %v1761_v20 = vadd.f32 %v1737_v1, %v5255_v29  ;;  %v1733_v8 = vmul.f32 %v1566_v2, %v5213_v18  ;;  %v1740_v28 = vmul.f32 %v1710_v51, %v5217_v22 }
 0x18d   : > { %v1777_v47 = vmax.f32 %v1753_v23, 0.0  ;;  %v1756_v40 = vadd.f32 %v1732_v37, %v5251_v10  ;;  %v1755_v57 = vadd.f32 %v1731_v48, %v5247_v26  ;;  %v1734_v44 = vmul.f32 %v1702_v25, %v5213_v18 }
 0x18e   : > { %v1778_v55 = vmax.f32 %v1754_v4, 0.0  ;;  %v1785_v3 = vmax.f32 %v1761_v20, 0.0  ;;  %v1757_v13 = vadd.f32 %v1733_v8, %v5251_v10  ;;  %v1764_v27 = vadd.f32 %v1740_v28, %v5259_v34 }
 0x18f   : > { %v5411_v6 = vmax.f32 %v1068_v32, %v1777_v47  ;;  %v1780_v54 = vmax.f32 %v1756_v40, 0.0  ;;  %v1779_v1 = vmax.f32 %v1755_v57, 0.0  ;;  %v1758_v2 = vadd.f32 %v1734_v44, %v5251_v10  ;;  %v4166_v51 = vpop.f32.mrb[36].mxu0 }
 0x190   : > { %v5414_v23 = vmax.f32 %v1069_v61, %v1778_v55  ;;  %v5786_v37 = vmax.f32 %v5279_v30, 0.0  ;;  %v1781_v25 = vmax.f32 %v1757_v13, 0.0  ;;  %v1788_v4 = vmax.f32 %v1764_v27, 0.0  ;;  %v1570_v20 = vpop.f32.mrb[28].mxu1  ;;  %v1714_v18 = vpop.f32.mrb[37].mxu0 }
 0x191   : > { %v5420_v8 = vmax.f32 %v1071_v9, %v1780_v54  ;;  %v5787_v47 = vmax.f32 %v5274_v39, 0.0  ;;  %v1782_v28 = vmax.f32 %v1758_v2, 0.0  ;;  %v1735_v40 = vmul.f32 %v1570_v20, %v5200_v14  ;;  %v1572_v57 = vpop.f32.mrb[29].mxu1  ;;  %v4167_v61 = vpop.f32.mrb[38].mxu0 }
 0x192   : > { %v5418_v48 = vmax.f32 %v5786_v37, %v1785_v3  ;;  %v5427_v44 = vmax.f32 %v1072_v16, %v1781_v25  ;;  %v5788_v30 = vmax.f32 %v5288_v62, 0.0  ;;  %v1736_v13 = vmul.f32 %v1572_v57, %v5200_v14  ;;  %v1574_v3 = vpop.f32.mrb[30].mxu1  ;;  %v1717_v27 = vpop.f32.mrb[39].mxu0 }
 0x193   : > { %v5424_v32 = vmax.f32 %v5787_v47, %v1779_v1  ;;  %v1723_v9 = vadd.f32 %v4166_v51, %v5330_v11  ;;  %v5789_v39 = vmax.f32 %v5309_v60, 0.0  ;;  %v1759_v1 = vadd.f32 %v1735_v40, %v5255_v29  ;;  %v1576_v37 = vpop.f32.mrb[31].mxu1 }
 0x194   : > { %v5431_v55 = vmax.f32 %v5788_v30, %v1788_v4  ;;  %v1738_v2 = vmul.f32 %v1574_v3, %v5217_v22  ;;  %v1715_v16 = vadd.f32 %v5276_v52, %v1714_v18  ;;  %v1760_v62 = vadd.f32 %v1736_v13, %v5255_v29 }
 0x195   : > { %v5437_v54 = vmax.f32 %v5789_v39, %v1782_v28  ;;  %v1749_v25 = vmul.f32 %v1723_v9, %v5238_v50  ;;  %v1739_v4 = vmul.f32 %v1576_v37, %v5217_v22  ;;  %v1726_v11 = vadd.f32 %v4167_v61, %v5354_v42 }
 0x196   : > { %v1783_v51 = vmax.f32 %v1759_v1, 0.0  ;;  %v1762_v60 = vadd.f32 %v1738_v2, %v5259_v34  ;;  %v1743_v20 = vmul.f32 %v1715_v16, %v5226_v0  ;;  %v1718_v47 = vadd.f32 %v5283_v33, %v1717_v27 }
 0x197   : > { %v1784_v28 = vmax.f32 %v1760_v62, 0.0  ;;  %v1773_v40 = vadd.f32 %v1749_v25, %v5295_v53  ;;  %v1763_v18 = vadd.f32 %v1739_v4, %v5259_v34  ;;  %v1752_v52 = vmul.f32 %v1726_v11, %v5242_v19 }
 0x198   : > { %v5790_v57 = vmax.f32 %v5349_v59, 0.0  ;;  %v1786_v13 = vmax.f32 %v1762_v60, 0.0  ;;  %v1767_v42 = vadd.f32 %v1743_v20, %v5267_v46  ;;  %v1746_v61 = vmul.f32 %v1718_v47, %v5230_v36  ;;  %v1580_v1 = vpop.f32.mrb[32].mxu1 }
 0x199   : > { %v5791_v9 = vmax.f32 %v5352_v35, 0.0  ;;  %v1797_v33 = vmax.f32 %v1773_v40, 0.0  ;;  %v1787_v27 = vmax.f32 %v1763_v18, 0.0  ;;  %v1776_v39 = vadd.f32 %v1752_v52, %v5300_v63  ;;  %v1582_v25 = vpop.f32.mrb[33].mxu1 }
 0x19a   : > { %v5454_v30 = vmax.f32 %v5790_v57, %v1783_v51  ;;  %v5792_v2 = vmax.f32 %v5358_v7, 0.0  ;;  %v1791_v59 = vmax.f32 %v1767_v42, 0.0  ;;  %v1770_v37 = vadd.f32 %v1746_v61, %v5271_v49  ;;  %v1584_v7 = vpop.f32.mrb[34].mxu1 }
 0x19b   : > { %v5460_v3 = vmax.f32 %v5791_v9, %v1784_v28  ;;  %v1741_v62 = vmul.f32 %v1580_v1, %v5226_v0  ;;  %v5793_v4 = vmax.f32 %v5323_v41, 0.0  ;;  %v5794_v11 = vmax.f32 %v5361_v56, 0.0  ;;  %v1586_v41 = vpop.f32.mrb[35].mxu1 }
 0x19c   : > { %v5465_v16 = vmax.f32 %v5792_v2, %v1786_v13  ;;  %v1800_v60 = vmax.f32 %v1776_v39, 0.0  ;;  %v1742_v20 = vmul.f32 %v1582_v25, %v5226_v0  ;;  %v5795_v47 = vmax.f32 %v5326_v12, 0.0 }
 0x19d   : > { %v5471_v35 = vmax.f32 %v5793_v4, %v1797_v33  ;;  %v5475_v51 = vmax.f32 %v5794_v11, %v1787_v27  ;;  %v1794_v40 = vmax.f32 %v1770_v37, 0.0  ;;  %v1765_v18 = vadd.f32 %v1741_v62, %v5267_v46 }
 0x19e   : > { %v5480_v28 = vmax.f32 %v5795_v47, %v1791_v59  ;;  %v1744_v52 = vmul.f32 %v1584_v7, %v5230_v36  ;;  %v1060_v57 = vadd.f32 %v5271_v49, %v5388_v21  ;;  %v5796_v56 = vmax.f32 %v5333_v15, 0.0 }
 0x19f   : > { %v1766_v42 = vadd.f32 %v1742_v20, %v5267_v46  ;;  %v1745_v61 = vmul.f32 %v1586_v41, %v5230_v36  ;;  %v998_v12 = vmul.f32 %v5238_v50, %v5228_v24  ;;  %v5797_v9 = vmax.f32 %v5336_v17, 0.0 }
 0x1a0   : > { %v5488_v13 = vmax.f32 %v5796_v56, %v1800_v60  ;;  %v1789_v27 = vmax.f32 %v1765_v18, 0.0  ;;  %v1768_v39 = vadd.f32 %v1744_v52, %v5271_v49  ;;  %v1081_v21 = vmax.f32 %v5382_v31, 0.0  ;;  %v1590_v11 = vpop.f32.mrb[36].mxu1 }
 0x1a1   : > { %v5496_v33 = vmax.f32 %v5797_v9, %v1794_v40  ;;  %v999_v15 = vmul.f32 %v5238_v50, %v5232_v38  ;;  %v1790_v1 = vmax.f32 %v1766_v42, 0.0  ;;  %v1769_v2 = vadd.f32 %v1745_v61, %v5271_v49 }
 0x1a2   : > { %v1083_v59 = vmax.f32 %v5393_v5, 0.0  ;;  %v1001_v24 = vmul.f32 %v5242_v19, %v5234_v43  ;;  %v5798_v17 = vmax.f32 %v5367_v58, 0.0  ;;  %v1792_v62 = vmax.f32 %v1768_v39, 0.0  ;;  %v1592_v43 = vpop.f32.mrb[37].mxu1 }
 0x1a3   : > { %v1084_v25 = vmax.f32 %v1060_v57, 0.0  ;;  %v1002_v31 = vmul.f32 %v5242_v19, %v5236_v45  ;;  %v5512_v4 = vmax.f32 %v1081_v21, %v1790_v1  ;;  %v1793_v38 = vmax.f32 %v1769_v2, 0.0  ;;  %v1594_v40 = vpop.f32.mrb[38].mxu1 }
 0x1a4   : > { %v5508_v37 = vmax.f32 %v5798_v17, %v1789_v27  ;;  %v1062_v60 = vadd.f32 %v5295_v53, %v998_v12  ;;  %v5515_v20 = vmax.f32 %v1083_v59, %v1792_v62  ;;  %v1747_v5 = vmul.f32 %v1590_v11, %v5238_v50  ;;  %v1596_v41 = vpop.f32.mrb[39].mxu1 }
 0x1a5   : > { %v1063_v58 = vadd.f32 %v5295_v53, %v999_v15  ;;  %v5519_v7 = vmax.f32 %v1084_v25, %v1793_v38  ;;  %v1748_v47 = vmul.f32 %v1592_v43, %v5238_v50  ;;  %v1065_v45 = vadd.f32 %v5300_v63, %v1001_v24 }
 0x1a6   : > { %v1771_v18 = vadd.f32 %v1747_v5, %v5295_v53  ;;  %v1750_v52 = vmul.f32 %v1594_v40, %v5242_v19  ;;  %v1066_v57 = vadd.f32 %v5300_v63, %v1002_v31  ;;  %v1751_v42 = vmul.f32 %v1596_v41, %v5242_v19 }
 0x1a7   : > { %v1772_v56 = vadd.f32 %v1748_v47, %v5295_v53  ;;  %v1086_v61 = vmax.f32 %v1062_v60, 0.0  ;;  %v1087_v27 = vmax.f32 %v1063_v58, 0.0  ;;  %v1089_v15 = vmax.f32 %v1065_v45, 0.0 }
 0x1a8   : > { %v1795_v12 = vmax.f32 %v1771_v18, 0.0  ;;  %v1774_v9 = vadd.f32 %v1750_v52, %v5300_v63  ;;  %v1775_v21 = vadd.f32 %v1751_v42, %v5300_v63  ;;  %v1090_v59 = vmax.f32 %v1066_v57, 0.0  ;;  %v4068_v62 = vpop.f32.mrb[40].mxu1 }
 0x1a9   : > { %v1796_v39 = vmax.f32 %v1772_v56, 0.0  ;;  %v4069_v31 = vpop.f32.mrb[41].mxu1 }
 0x1aa   : > { %v5530_v1 = vmax.f32 %v1086_v61, %v1795_v12  ;;  %v1798_v2 = vmax.f32 %v1774_v9, 0.0  ;;  %v1799_v17 = vmax.f32 %v1775_v21, 0.0  ;;  %v4070_v11 = vadd.f32 %v4069_v31, %v4068_v62  ;;  %v4071_v60 = vpop.f32.mrb[42].mxu1 }
 0x1ab   : > { %v5532_v24 = vmax.f32 %v1087_v27, %v1796_v39  ;;  %v4072_v5 = vpop.f32.mrb[43].mxu1 }
 0x1ac   : > { %v5534_v25 = vmax.f32 %v1089_v15, %v1798_v2  ;;  %v5536_v38 = vmax.f32 %v1090_v59, %v1799_v17  ;;  %v4073_v43 = vadd.f32 %v4072_v5, %v4071_v60 }
 0x1b0   : > { %v4074_v58 = vpop.f32.mrb[44].mxu1 }
 0x1b1   : > { %v4075_v47 = vpop.f32.mrb[45].mxu1 }
 0x1b2   : > { %v4076_v40 = vadd.f32 %v4075_v47, %v4074_v58  ;;  %v4077_v45 = vpop.f32.mrb[46].mxu1 }
 0x1b3   : > { %v4078_v18 = vpop.f32.mrb[47].mxu1 }
 0x1b4   : > { %v4079_v52 = vadd.f32 %v4078_v18, %v4077_v45  ;;  %v5799_v45 = vld [vmem:[#allocation2_spill] sm:$0xff] }
 0x1b8   : > { %v4080_v41 = vpop.f32.mrb[48].mxu1 }
 0x1b9   : > { %v4081_v57 = vpop.f32.mrb[49].mxu1 }
 0x1ba   : > { %v4082_v56 = vadd.f32 %v4081_v57, %v4080_v41  ;;  %v4083_v42 = vpop.f32.mrb[50].mxu1 }
 0x1bb   : > { %v4084_v61 = vpop.f32.mrb[51].mxu1 }
 0x1bc   : > { %v4085_v12 = vadd.f32 %v4084_v61, %v4083_v42 }
 0x1c0   : > { %v4086_v9 = vpop.f32.mrb[52].mxu1 }
 0x1c1   : > { %v4087_v27 = vpop.f32.mrb[53].mxu1 }
 0x1c2   : > { %v4088_v39 = vadd.f32 %v4087_v27, %v4086_v9  ;;  %v4089_v21 = vpop.f32.mrb[54].mxu1  ;;  %v5800_v9 = vld [vmem:[#allocation3_spill] sm:$0xff] }
 0x1c3   : > { %v4090_v15 = vpop.f32.mrb[55].mxu1 }
 0x1c4   : > { %v4091_v2 = vadd.f32 %v4090_v15, %v4089_v21 }
 0x1c8   : > { %v4174_v59 = vpop.f32.mrb[56].mxu1 }
 0x1c9   : > { %v2440_v17 = vadd.f32 %v4174_v59, %v4076_v40  ;;  %v2431_v62 = vpop.f32.mrb[57].mxu1 }
 0x1ca   : > { %v2432_v31 = vadd.f32 %v4070_v11, %v2431_v62  ;;  %v4175_v60 = vpop.f32.mrb[58].mxu1 }
 0x1cb   : > { %v2470_v5 = vmul.f32 %v2440_v17, %v5200_v14  ;;  %v2443_v58 = vadd.f32 %v4175_v60, %v4079_v52  ;;  %v2434_v47 = vpop.f32.mrb[59].mxu1 }
 0x1cc   : > { %v2464_v18 = vmul.f32 %v2432_v31, %v5799_v45  ;;  %v2435_v41 = vadd.f32 %v4073_v43, %v2434_v47 }
 0x1cd   : > { %v2494_v57 = vadd.f32 %v2470_v5, %v5255_v29  ;;  %v2473_v42 = vmul.f32 %v2443_v58, %v5217_v22 }
 0x1ce   : > { %v2488_v61 = vadd.f32 %v2464_v18, %v5247_v26  ;;  %v2467_v27 = vmul.f32 %v2435_v41, %v5800_v9 }
 0x1cf   : > { %v2518_v21 = vmax.f32 %v2494_v57, 0.0  ;;  %v2497_v40 = vadd.f32 %v2473_v42, %v5259_v34 }
 0x1d0   : > { %v2512_v11 = vmax.f32 %v2488_v61, 0.0  ;;  %v2491_v15 = vadd.f32 %v2467_v27, %v5251_v10  ;;  %v4178_v59 = vpop.f32.mrb[60].mxu1 }
 0x1d1   : > { %v5547_v52 = vmax.f32 %v5418_v48, %v2518_v21  ;;  %v2521_v17 = vmax.f32 %v2497_v40, 0.0  ;;  %v2456_v43 = vadd.f32 %v4178_v59, %v4088_v39  ;;  %v2447_v62 = vpop.f32.mrb[61].mxu1 }
 0x1d2   : > { %v5550_v31 = vmax.f32 %v5424_v32, %v2512_v11  ;;  %v2515_v60 = vmax.f32 %v2491_v15, 0.0  ;;  %v2448_v5 = vadd.f32 %v4082_v56, %v2447_v62  ;;  %v4179_v58 = vpop.f32.mrb[62].mxu1 }
 0x1d3   : > { %v5553_v47 = vmax.f32 %v5431_v55, %v2521_v17  ;;  %v2482_v18 = vmul.f32 %v2456_v43, %v5238_v50  ;;  %v2459_v41 = vadd.f32 %v4179_v58, %v4091_v2  ;;  %v2450_v57 = vpop.f32.mrb[63].mxu1 }
 0x1d4   : > { %v5557_v42 = vmax.f32 %v5437_v54, %v2515_v60  ;;  %v2476_v48 = vmul.f32 %v2448_v5, %v5226_v0  ;;  %v2451_v39 = vadd.f32 %v4085_v12, %v2450_v57 }
 0x1d5   : > { %v2506_v61 = vadd.f32 %v2482_v18, %v5295_v53  ;;  %v2485_v32 = vmul.f32 %v2459_v41, %v5242_v19 }
 0x1d6   : > { %v2500_v56 = vadd.f32 %v2476_v48, %v5267_v46  ;;  %v2479_v27 = vmul.f32 %v2451_v39, %v5230_v36 }
 0x1d7   : > { %v2530_v55 = vmax.f32 %v2506_v61, 0.0  ;;  %v2509_v21 = vadd.f32 %v2485_v32, %v5300_v63 }
 0x1d8   : > { %v2524_v40 = vmax.f32 %v2500_v56, 0.0  ;;  %v2503_v2 = vadd.f32 %v2479_v27, %v5271_v49 }
 0x1d9   : > { %v5567_v54 = vmax.f32 %v5471_v35, %v2530_v55  ;;  %v2533_v11 = vmax.f32 %v2509_v21, 0.0 }
 0x1da   : > { %v5570_v12 = vmax.f32 %v5480_v28, %v2524_v40  ;;  %v2527_v15 = vmax.f32 %v2503_v2, 0.0 }
 0x1db   : > { %v5573_v59 = vmax.f32 %v5488_v13, %v2533_v11 }
 0x1dc   : > { %v5576_v17 = vmax.f32 %v5496_v33, %v2527_v15 }
 0x1e7   : > { %v2293_v43 = vpop.f32.mrb[40].mxu0 }
 0x1e8   : > { %v2462_v62 = vmul.f32 %v2293_v43, %v5799_v45  ;;  %v2295_v60 = vpop.f32.mrb[41].mxu0 }
 0x1e9   : > { %v2463_v5 = vmul.f32 %v2295_v60, %v5799_v45  ;;  %v2297_v58 = vpop.f32.mrb[42].mxu0 }
 0x1ea   : > { %v2486_v35 = vadd.f32 %v2462_v62, %v5247_v26  ;;  %v2465_v18 = vmul.f32 %v2297_v58, %v5800_v9  ;;  %v2299_v28 = vpop.f32.mrb[43].mxu0 }
 0x1eb   : > { %v2487_v41 = vadd.f32 %v2463_v5, %v5247_v26  ;;  %v2466_v13 = vmul.f32 %v2299_v28, %v5800_v9 }
 0x1ec   : > { %v2510_v57 = vmax.f32 %v2486_v35, 0.0  ;;  %v2489_v33 = vadd.f32 %v2465_v18, %v5251_v10 }
 0x1ed   : > { %v2511_v48 = vmax.f32 %v2487_v41, 0.0  ;;  %v2490_v39 = vadd.f32 %v2466_v13, %v5251_v10 }
 0x1ee   : > { %v5587_v61 = vmax.f32 %v5411_v6, %v2510_v57  ;;  %v2513_v32 = vmax.f32 %v2489_v33, 0.0 }
 0x1ef   : > { %v5590_v56 = vmax.f32 %v5414_v23, %v2511_v48  ;;  %v2514_v27 = vmax.f32 %v2490_v39, 0.0  ;;  %v2303_v55 = vpop.f32.mrb[44].mxu0 }
 0x1f0   : > { %v5593_v21 = vmax.f32 %v5420_v8, %v2513_v32  ;;  %v2468_v40 = vmul.f32 %v2303_v55, %v5200_v14  ;;  %v2305_v2 = vpop.f32.mrb[45].mxu0 }
 0x1f1   : > { %v5597_v11 = vmax.f32 %v5427_v44, %v2514_v27  ;;  %v2469_v15 = vmul.f32 %v2305_v2, %v5200_v14  ;;  %v2307_v43 = vpop.f32.mrb[46].mxu0 }
 0x1f2   : > { %v2492_v6 = vadd.f32 %v2468_v40, %v5255_v29  ;;  %v2471_v62 = vmul.f32 %v2307_v43, %v5217_v22  ;;  %v2309_v23 = vpop.f32.mrb[47].mxu0 }
 0x1f3   : > { %v2493_v60 = vadd.f32 %v2469_v15, %v5255_v29  ;;  %v2472_v5 = vmul.f32 %v2309_v23, %v5217_v22 }
 0x1f4   : > { %v2516_v8 = vmax.f32 %v2492_v6, 0.0  ;;  %v2495_v58 = vadd.f32 %v2471_v62, %v5259_v34 }
 0x1f5   : > { %v2517_v35 = vmax.f32 %v2493_v60, 0.0  ;;  %v2496_v18 = vadd.f32 %v2472_v5, %v5259_v34 }
 0x1f6   : > { %v5607_v44 = vmax.f32 %v5454_v30, %v2516_v8  ;;  %v2519_v28 = vmax.f32 %v2495_v58, 0.0 }
 0x1f7   : > { %v5610_v41 = vmax.f32 %v5460_v3, %v2517_v35  ;;  %v2520_v13 = vmax.f32 %v2496_v18, 0.0  ;;  %v2313_v57 = vpop.f32.mrb[48].mxu0 }
 0x1f8   : > { %v5613_v33 = vmax.f32 %v5465_v16, %v2519_v28  ;;  %v2474_v48 = vmul.f32 %v2313_v57, %v5226_v0  ;;  %v2315_v39 = vpop.f32.mrb[49].mxu0 }
 0x1f9   : > { %v5617_v32 = vmax.f32 %v5475_v51, %v2520_v13  ;;  %v2475_v27 = vmul.f32 %v2315_v39, %v5226_v0  ;;  %v2317_v55 = vpop.f32.mrb[50].mxu0 }
 0x1fa   : > { %v2498_v30 = vadd.f32 %v2474_v48, %v5267_v46  ;;  %v2477_v40 = vmul.f32 %v2317_v55, %v5230_v36  ;;  %v2319_v3 = vpop.f32.mrb[51].mxu0 }
 0x1fb   : > { %v2499_v2 = vadd.f32 %v2475_v27, %v5267_v46  ;;  %v2478_v15 = vmul.f32 %v2319_v3, %v5230_v36 }
 0x1fc   : > { %v2522_v16 = vmax.f32 %v2498_v30, 0.0  ;;  %v2501_v43 = vadd.f32 %v2477_v40, %v5271_v49 }
 0x1fd   : > { %v2523_v6 = vmax.f32 %v2499_v2, 0.0  ;;  %v2502_v62 = vadd.f32 %v2478_v15, %v5271_v49 }
 0x1fe   : > { %v5627_v51 = vmax.f32 %v5508_v37, %v2522_v16  ;;  %v2525_v23 = vmax.f32 %v2501_v43, 0.0 }
 0x1ff   : > { %v5630_v60 = vmax.f32 %v5512_v4, %v2523_v6  ;;  %v2526_v5 = vmax.f32 %v2502_v62, 0.0  ;;  %v2323_v8 = vpop.f32.mrb[52].mxu0 }
 0x200   : > { %v5633_v58 = vmax.f32 %v5515_v20, %v2525_v23  ;;  %v2480_v35 = vmul.f32 %v2323_v8, %v5238_v50  ;;  %v2325_v18 = vpop.f32.mrb[53].mxu0 }
 0x201   : > { %v5637_v28 = vmax.f32 %v5519_v7, %v2526_v5  ;;  %v2481_v13 = vmul.f32 %v2325_v18, %v5238_v50  ;;  %v2327_v57 = vpop.f32.mrb[54].mxu0 }
 0x202   : > { %v2504_v37 = vadd.f32 %v2480_v35, %v5295_v53  ;;  %v2483_v48 = vmul.f32 %v2327_v57, %v5242_v19  ;;  %v2329_v4 = vpop.f32.mrb[55].mxu0 }
 0x203   : > { %v2505_v39 = vadd.f32 %v2481_v13, %v5295_v53  ;;  %v2484_v27 = vmul.f32 %v2329_v4, %v5242_v19 }
 0x204   : > { %v2528_v20 = vmax.f32 %v2504_v37, 0.0  ;;  %v2507_v55 = vadd.f32 %v2483_v48, %v5300_v63 }
 0x205   : > { %v2529_v30 = vmax.f32 %v2505_v39, 0.0  ;;  %v2508_v40 = vadd.f32 %v2484_v27, %v5300_v63 }
 0x206   : > { %v5647_v7 = vmax.f32 %v5530_v1, %v2528_v20  ;;  %v2531_v3 = vmax.f32 %v2507_v55, 0.0 }
 0x207   : > { %v5650_v2 = vmax.f32 %v5532_v24, %v2529_v30  ;;  %v2532_v15 = vmax.f32 %v2508_v40, 0.0  ;;  %v4114_v16 = vpop.f32.mrb[56].mxu0 }
 0x208   : > { %v5653_v43 = vmax.f32 %v5534_v25, %v2531_v3  ;;  %v4115_v6 = vpop.f32.mrb[57].mxu0 }
 0x209   : > { %v5656_v62 = vmax.f32 %v5536_v38, %v2532_v15  ;;  %v4116_v23 = vadd.f32 %v4115_v6, %v4114_v16  ;;  %v4117_v5 = vpop.f32.mrb[58].mxu0 }
 0x20a   : > { %v4118_v8 = vpop.f32.mrb[59].mxu0 }
 0x20b   : > { %v4119_v35 = vadd.f32 %v4118_v8, %v4117_v5 }
 0x20f   : > { %v4120_v18 = vpop.f32.mrb[60].mxu0 }
 0x210   : > { %v4121_v1 = vpop.f32.mrb[61].mxu0 }
 0x211   : > { %v4122_v13 = vadd.f32 %v4121_v1, %v4120_v18  ;;  %v4123_v57 = vpop.f32.mrb[62].mxu0 }
 0x212   : > { %v4124_v37 = vpop.f32.mrb[63].mxu0 }
 0x213   : > { %v4125_v24 = vadd.f32 %v4124_v37, %v4123_v57 }
 0x217   : > { %v4126_v48 = vpop.f32.mrb[64].mxu0 }
 0x218   : > { %v4127_v4 = vpop.f32.mrb[65].mxu0 }
 0x219   : > { %v5658_v39 = vadd.f32 %v4127_v4, %v4126_v48  ;;  %v4129_v25 = vpop.f32.mrb[66].mxu0 }
 0x21a   : > { %v4130_v27 = vpop.f32.mrb[67].mxu0 }
 0x21b   : > { %v5660_v20 = vadd.f32 %v4130_v27, %v4129_v25 }
 0x21f   : > { %v4132_v38 = vpop.f32.mrb[68].mxu0 }
 0x220   : > { %v4133_v55 = vpop.f32.mrb[69].mxu0 }
 0x221   : > { %v5662_v30 = vadd.f32 %v4133_v55, %v4132_v38  ;;  %v4135_v40 = vpop.f32.mrb[70].mxu0 }
 0x222   : > { %v4136_v3 = vpop.f32.mrb[71].mxu0 }
 0x223   : > { %v5664_v15 = vadd.f32 %v4136_v3, %v4135_v40 }
 0x227   : > { %v4186_v16 = vpop.f32.mrb[72].mxu0 }
 0x228   : > { %v3026_v6 = vpop.f32.mrb[64].mxu1  ;;  %v3173_v5 = vadd.f32 %v4186_v16, %v4122_v13  ;;  %v3164_v8 = vpop.f32.mrb[73].mxu0 }
 0x229   : > { %v3195_v18 = vmul.f32 %v3026_v6, %v5799_v45  ;;  %v3028_v1 = vpop.f32.mrb[65].mxu1  ;;  %v3165_v57 = vadd.f32 %v4116_v23, %v3164_v8  ;;  %v4187_v37 = vpop.f32.mrb[74].mxu0 }
 0x22a   : > { %v3196_v48 = vmul.f32 %v3028_v1, %v5799_v45  ;;  %v3203_v4 = vmul.f32 %v3173_v5, %v5200_v14  ;;  %v3030_v25 = vpop.f32.mrb[66].mxu1  ;;  %v3176_v27 = vadd.f32 %v4187_v37, %v4125_v24  ;;  %v3167_v38 = vpop.f32.mrb[75].mxu0 }
 0x22b   : > { %v3219_v55 = vadd.f32 %v3195_v18, %v5247_v26  ;;  %v3198_v40 = vmul.f32 %v3030_v25, %v5800_v9  ;;  %v3197_v13 = vmul.f32 %v3165_v57, %v5799_v45  ;;  %v3032_v3 = vpop.f32.mrb[67].mxu1  ;;  %v3168_v16 = vadd.f32 %v4119_v35, %v3167_v38 }
 0x22c   : > { %v3220_v23 = vadd.f32 %v3196_v48, %v5247_v26  ;;  %v3227_v6 = vadd.f32 %v3203_v4, %v5255_v29  ;;  %v3199_v8 = vmul.f32 %v3032_v3, %v5800_v9  ;;  %v3206_v5 = vmul.f32 %v3176_v27, %v5217_v22 }
 0x22d   : > { %v3243_v1 = vmax.f32 %v3219_v55, 0.0  ;;  %v3222_v24 = vadd.f32 %v3198_v40, %v5251_v10  ;;  %v3221_v18 = vadd.f32 %v3197_v13, %v5247_v26  ;;  %v3200_v37 = vmul.f32 %v3168_v16, %v5800_v9 }
 0x22e   : > { %v3244_v25 = vmax.f32 %v3220_v23, 0.0  ;;  %v3251_v45 = vmax.f32 %v3227_v6, 0.0  ;;  %v3223_v35 = vadd.f32 %v3199_v8, %v5251_v10  ;;  %v3230_v57 = vadd.f32 %v3206_v5, %v5259_v34 }
 0x22f   : > { %v3267_v48 = vmax.f32 %v5587_v61, %v3243_v1  ;;  %v3246_v4 = vmax.f32 %v3222_v24, 0.0  ;;  %v3245_v38 = vmax.f32 %v3221_v18, 0.0  ;;  %v3224_v27 = vadd.f32 %v3200_v37, %v5251_v10  ;;  %v4190_v55 = vpop.f32.mrb[76].mxu0 }
 0x230   : > { %v3268_v3 = vmax.f32 %v5590_v56, %v3244_v25  ;;  %v3275_v40 = vmax.f32 %v5547_v52, %v3251_v45  ;;  %v3247_v26 = vmax.f32 %v3223_v35, 0.0  ;;  %v3254_v13 = vmax.f32 %v3230_v57, 0.0  ;;  %v3036_v9 = vpop.f32.mrb[68].mxu1  ;;  %v3180_v16 = vpop.f32.mrb[77].mxu0 }
 0x231   : > { %v3270_v61 = vmax.f32 %v5593_v21, %v3246_v4  ;;  %v3269_v23 = vmax.f32 %v5550_v31, %v3245_v38  ;;  %v3248_v10 = vmax.f32 %v3224_v27, 0.0  ;;  %v3201_v56 = vmul.f32 %v3036_v9, %v5200_v14  ;;  %v3038_v6 = vpop.f32.mrb[69].mxu1  ;;  %v4191_v52 = vpop.f32.mrb[78].mxu0 }
 0x232   : > { %v3944_v8 = vpack.c.bf16 %v3268_v3, %v3267_v48  ;;  %v3949_v5 = vpack.c.bf16 %v3275_v40, %v3275_v40  ;;  %v3271_v1 = vmax.f32 %v5597_v11, %v3247_v26  ;;  %v3278_v24 = vmax.f32 %v5553_v47, %v3254_v13  ;;  %v3040_v18 = vpop.f32.mrb[70].mxu1  ;;  %v3183_v37 = vpop.f32.mrb[79].mxu0 }
 0x233   : > { %v3945_v25 = vpack.c.bf16 %v3269_v23, %v3269_v23  ;;  %v3272_v31 = vmax.f32 %v5557_v42, %v3248_v10  ;;  %v3225_v21 = vadd.f32 %v3201_v56, %v5255_v29  ;;  %v3202_v45 = vmul.f32 %v3038_v6, %v5200_v14  ;;  %v3042_v35 = vpop.f32.mrb[71].mxu1 }
 0x234   : > { %3371 = vst [vmem:[%s5689_s7] sm:$0xff] %v3944_v8  ;;  %3377 = vst.msk [vmem:[%s5689_s7 + $0x20] sm:$0xf] %vm3372_vm1, %v3949_v5  ;;  %v3946_v57 = vpack.c.bf16 %v3271_v1, %v3270_v61  ;;  %v3951_v11 = vpack.c.bf16 %v3278_v24, %v3278_v24  ;;  %v3189_v47 = vadd.f32 %v4190_v55, %v5662_v30 }
 0x235   : > { %v3204_v48 = vmul.f32 %v3040_v18, %v5217_v22  ;;  %3373 = vst.msk [vmem:[%s5689_s7 + $0x8] sm:$0xf] %vm3372_vm1, %v3945_v25  ;;  %v3947_v4 = vpack.c.bf16 %v3272_v31, %v3272_v31  ;;  %v3249_v42 = vmax.f32 %v3225_v21, 0.0  ;;  %v3226_v38 = vadd.f32 %v3202_v45, %v5255_v29 }
 0x236   : > { %v3181_v27 = vadd.f32 %v5658_v39, %v3180_v16  ;;  %3374 = vst [vmem:[%s5689_s7 + $0xc] sm:$0xff] %v3946_v57  ;;  %3379 = vst.msk [vmem:[%s5689_s7 + $0x2c] sm:$0xf] %vm3372_vm1, %v3951_v11  ;;  %v3215_v14 = vmul.f32 %v3189_v47, %v5238_v50  ;;  %v3205_v40 = vmul.f32 %v3042_v35, %v5217_v22 }
 0x237   : > { %v3228_v3 = vadd.f32 %v3204_v48, %v5259_v34  ;;  %v3192_v30 = vadd.f32 %v4191_v52, %v5664_v15  ;;  %3375 = vst.msk [vmem:[%s5689_s7 + $0x14] sm:$0xf] %vm3372_vm1, %v3947_v4  ;;  %v3273_v55 = vmax.f32 %v5607_v44, %v3249_v42  ;;  %v3250_v26 = vmax.f32 %v3226_v38, 0.0 }
 0x238   : > { %v3209_v29 = vmul.f32 %v3181_v27, %v5226_v0  ;;  %v3184_v39 = vadd.f32 %v5660_v20, %v3183_v37  ;;  %v3239_v13 = vadd.f32 %v3215_v14, %v5295_v53  ;;  %v3229_v16 = vadd.f32 %v3205_v40, %v5259_v34  ;;  %v3046_v23 = vpop.f32.mrb[72].mxu1 }
 0x239   : > { %v3252_v9 = vmax.f32 %v3228_v3, 0.0  ;;  %v3218_v61 = vmul.f32 %v3192_v30, %v5242_v19  ;;  %v3274_v22 = vmax.f32 %v5610_v41, %v3250_v26  ;;  %v3207_v44 = vmul.f32 %v3046_v23, %v5226_v0  ;;  %v3048_v56 = vpop.f32.mrb[73].mxu1 }
 0x23a   : > { %v3233_v15 = vadd.f32 %v3209_v29, %v5267_v46  ;;  %v3212_v10 = vmul.f32 %v3184_v39, %v5230_v36  ;;  %v3263_v6 = vmax.f32 %v3239_v13, 0.0  ;;  %v3253_v52 = vmax.f32 %v3229_v16, 0.0  ;;  %v3050_v34 = vpop.f32.mrb[74].mxu1 }
 0x23b   : > { %v3276_v20 = vmax.f32 %v5613_v33, %v3252_v9  ;;  %v3242_v8 = vadd.f32 %v3218_v61, %v5300_v63  ;;  %v3948_v5 = vpack.c.bf16 %v3274_v22, %v3273_v55  ;;  %v3231_v41 = vadd.f32 %v3207_v44, %v5267_v46  ;;  %v3052_v18 = vpop.f32.mrb[75].mxu1 }
 0x23c   : > { %v3257_v1 = vmax.f32 %v3233_v15, 0.0  ;;  %v3236_v24 = vadd.f32 %v3212_v10, %v5271_v49  ;;  %v3287_v37 = vmax.f32 %v5567_v54, %v3263_v6  ;;  %v3277_v25 = vmax.f32 %v5617_v32, %v3253_v52 }
 0x23d   : > { %v3266_v31 = vmax.f32 %v3242_v8, 0.0  ;;  %v3208_v33 = vmul.f32 %v3048_v56, %v5226_v0  ;;  %3376 = vst [vmem:[%s5689_s7 + $0x18] sm:$0xff] %v3948_v5  ;;  %v3255_v35 = vmax.f32 %v3231_v41, 0.0  ;;  %v3210_v57 = vmul.f32 %v3050_v34, %v5230_v36 }
 0x23e   : > { %v3281_v21 = vmax.f32 %v5570_v12, %v3257_v1  ;;  %v3260_v45 = vmax.f32 %v3236_v24, 0.0  ;;  %v3957_v11 = vpack.c.bf16 %v3287_v37, %v3287_v37  ;;  %v3950_v47 = vpack.c.bf16 %v3277_v25, %v3276_v20 }
 0x23f   : > { %v3290_v48 = vmax.f32 %v5573_v59, %v3266_v31  ;;  %v3232_v54 = vadd.f32 %v3208_v33, %v5267_v46  ;;  %v3279_v0 = vmax.f32 %v5627_v51, %v3255_v35  ;;  %v3234_v42 = vadd.f32 %v3210_v57, %v5271_v49 }
 0x240   : > { %v3953_v32 = vpack.c.bf16 %v3281_v21, %v3281_v21  ;;  %v3284_v4 = vmax.f32 %v5576_v17, %v3260_v45  ;;  %3385 = vst.msk [vmem:[%s5689_s7 + $0x50] sm:$0xf] %vm3372_vm1, %v3957_v11  ;;  %3378 = vst [vmem:[%s5689_s7 + $0x24] sm:$0xff] %v3950_v47  ;;  %v3211_v27 = vmul.f32 %v3052_v18, %v5230_v36  ;;  %v3056_v14 = vpop.f32.mrb[76].mxu1 }
 0x241   : > { %v3959_v12 = vpack.c.bf16 %v3290_v48, %v3290_v48  ;;  %v3256_v38 = vmax.f32 %v3232_v54, 0.0  ;;  %v3258_v59 = vmax.f32 %v3234_v42, 0.0  ;;  %v3213_v3 = vmul.f32 %v3056_v14, %v5238_v50  ;;  %v3058_v17 = vpop.f32.mrb[77].mxu1 }
 0x242   : > { %3381 = vst.msk [vmem:[%s5689_s7 + $0x38] sm:$0xf] %vm3372_vm1, %v3953_v32  ;;  %v3955_v46 = vpack.c.bf16 %v3284_v4, %v3284_v4  ;;  %v3235_v40 = vadd.f32 %v3211_v27, %v5271_v49  ;;  %v3214_v30 = vmul.f32 %v3058_v17, %v5238_v50  ;;  %v3060_v55 = vpop.f32.mrb[78].mxu1 }
 0x243   : > { %3387 = vst.msk [vmem:[%s5689_s7 + $0x5c] sm:$0xf] %vm3372_vm1, %v3959_v12  ;;  %v3280_v51 = vmax.f32 %v5630_v60, %v3256_v38  ;;  %v3282_v36 = vmax.f32 %v5633_v58, %v3258_v59  ;;  %v3237_v26 = vadd.f32 %v3213_v3, %v5295_v53  ;;  %v3216_v29 = vmul.f32 %v3060_v55, %v5242_v19  ;;  %v3062_v39 = vpop.f32.mrb[79].mxu1 }
 0x244   : > { %3383 = vst.msk [vmem:[%s5689_s7 + $0x44] sm:$0xf] %vm3372_vm1, %v3955_v46  ;;  %v3259_v9 = vmax.f32 %v3235_v40, 0.0  ;;  %v3238_v16 = vadd.f32 %v3214_v30, %v5295_v53  ;;  %v3217_v60 = vmul.f32 %v3062_v39, %v5242_v19 }
 0x245   : > { %v3952_v13 = vpack.c.bf16 %v3280_v51, %v3279_v0  ;;  %v3261_v49 = vmax.f32 %v3237_v26, 0.0  ;;  %v3240_v50 = vadd.f32 %v3216_v29, %v5300_v63 }
 0x246   : > { %v3283_v58 = vmax.f32 %v5637_v28, %v3259_v9  ;;  %v3262_v61 = vmax.f32 %v3238_v16, 0.0  ;;  %v3241_v23 = vadd.f32 %v3217_v60, %v5300_v63 }
 0x247   : > { %3380 = vst [vmem:[%s5689_s7 + $0x30] sm:$0xff] %v3952_v13  ;;  %v3285_v22 = vmax.f32 %v5647_v7, %v3261_v49  ;;  %v3264_v15 = vmax.f32 %v3240_v50, 0.0 }
 0x248   : > { %v3954_v10 = vpack.c.bf16 %v3283_v58, %v3282_v36  ;;  %v3286_v44 = vmax.f32 %v5650_v2, %v3262_v61  ;;  %v3265_v53 = vmax.f32 %v3241_v23, 0.0 }
 0x249   : > { %v3288_v19 = vmax.f32 %v5653_v43, %v3264_v15 }
 0x24a   : > { %3382 = vst [vmem:[%s5689_s7 + $0x3c] sm:$0xff] %v3954_v10  ;;  %v3956_v56 = vpack.c.bf16 %v3286_v44, %v3285_v22  ;;  %v3289_v6 = vmax.f32 %v5656_v62, %v3265_v53 }
 0x24c   : > { %3384 = vst [vmem:[%s5689_s7 + $0x48] sm:$0xff] %v3956_v56  ;;  %v3958_v20 = vpack.c.bf16 %v3289_v6, %v3288_v19 }
 0x24e   : > { %3386 = vst [vmem:[%s5689_s7 + $0x54] sm:$0xff] %v3958_v20 }
 0x24f PF: > { %s14_s15 = sadd.s32 1, %s4591_s15  }
 0x250   : > { %p11_p4 = scmp.ge.s32.totalorder %s14_s15, 10  }
 0x252   :  { %13 = sbr.rel (!%p11_p4) target bundleno = 1 (0x1), region = 69 }

// kernel: forward.8
= control target key start
LH: loop header
LB: loop body
LE: loop exit
PB: predicated region body
PF: predicated region fallthrough
CT: control target
= control target key end

     0   :  { %s421_s9 = smov 0   ;;  %s463_s0 = inlined_call_operand.vmem [shape: f32[4,2,128], index: 0, kind: input, shape index: {}]   ;;  %s464_s1 = inlined_call_operand.vmem [shape: f32[32,128], index: 1, kind: input, shape index: {}]   ;;  %s465_s2 = inlined_call_operand.vmem [shape: bf16[4,2,32], index: 2, kind: output, shape index: {}]  }
   0x1 LB: > { %s333_s10 = sadd.s32 4294967295, %s396_s9   ;;  %p337_p0 = scmp.ge.s32.totalorder %s396_s9, 1  ;;  %s396_s9 = sphi %s421_s9, %s12_s9  }
   0x2   : > { %p111_p1 = scmp.lt.s32.totalorder %s396_s9, 5 }
   0x4   : > { %p112_p2 = pnand %p337_p0, %p111_p1 }
   0x5   : > { %p130_p3 = scmp.lt.s32.totalorder (!%p112_p2), %s333_s10, 3  ;;  %p339_p4 = scmp.ne.s32.totalorder (!%p112_p2), %s333_s10, 0 }
   0x6   : > { %115 = sbr.rel (%p112_p2) target bundleno = 740 (0x2e4), region = 28 }
   0xd   : > { %s429_s11 = scalar_select %p130_p3, %s333_s10, 3 }
   0xe   : > { %140 = sbr.rel (%p339_p4) target bundleno = 21 (0x15), region = 32  ;;  %vm141_vm0 = vcmask (!%p339_p4), 254976   ;;  %v398_v0 = vmov (!%p339_p4), 0.0  }
   0xf   : > { %s338_s12 = sshll.u32 %s429_s11, 1  ;;  %s136_s15 = scalar_lea.vmem %s465_s2, %s429_s11  ;;  %142 = vst.msk [vmem:[#allocation2] sm:$0x3] (!%p339_p4), %vm141_vm0, %v398_v0  ;;  %143 = vst.msk [vmem:[#allocation3] sm:$0x3] (!%p339_p4), %vm141_vm0, %v398_v0 }
  0x10   : > { %s133_s18 = scalar_lea.vmem %s463_s0, %s338_s12 }
  0x15 PF: > { %v146_v1 = vld [vmem:[%s464_s1] sm:$0xff]  ;;  %v147_v2 = vld [vmem:[%s464_s1 + $0x8] sm:$0xff]  ;;  %v148_v3 = vld [vmem:[%s464_s1 + $0x10] sm:$0xff]  ;;  %v399_v4 = vmov 0.0|0.0   ;;  %vm400_vm1 = vmmov 0   ;;  %v401_v7 = vmov 0.0   ;;  %v270_v29 = vlaneseq }
  0x16   : > { %360 = vmatprep.subr.bf16.mxu0 %v399_v4  ;;  %v361_v5 = vpack.c.bf16 %v147_v2, %v146_v1  ;;  %v149_v6 = vld [vmem:[%s464_s1 + $0x18] sm:$0xff]  ;;  %357 = vmatprep.mubr.msk.f32.mxu0 %vm400_vm1, %v401_v7  ;;  %v145_v9 = vld [vmem:[#allocation2] sm:$0x3]  ;;  %vm150_vm2 = vcmask 261120   ;;  %s402_s27 = smov 64   ;;  %s403_s28 = smov 32  }
  0x17   : > { %v364_v8 = vpack.c.bf16 %v149_v6, %v148_v3  ;;  %v144_v10 = vld [vmem:[%s133_s18] sm:$0x3]  ;;  %v225_v15 = vld [vmem:[#allocation3] sm:$0x3]  ;;  %s404_s29 = smov 96   ;;  %v271_v31 = vshrl.u32 %v270_v29, 7 }
  0x18   : > { %362 = vmatpush3.bf16.msra.mxu0 %v361_v5  ;;  %v405_v27 = vmov 1966171168   ;;  %vm258_vm3 = vcmask 254976   ;;  %vm284_vm4 = vcmask 253952  }
  0x19   : > { %363 = vmatprep.subr.bf16.mxu0 %v399_v4  ;;  %v268_v28 = vunpack.c.l.s4 %v405_v27 }
  0x1b   : > { %v269_v30 = vunpack.c.0.s8 %v268_v28 }
  0x1c   : > { %365 = vmatpush3.bf16.msra.mxu0 %v364_v8 }
  0x1d   : > { %v272_v33 = vsub.s32 %v269_v30, %v271_v31 }
  0x1f   : > { %358 = vmatmul.mubr.msk.f32.vlgmr.msra.gmra.mrb[0].mxu0 %vm150_vm2, %v145_v9 }
  0xf2   : > { %v220_v11 = vpop.f32.mrb[0].mxu0 }
  0xf3   : > { %v224_v12 = vadd.f32 %v220_v11, %v144_v10  ;;  %v359_v13 = vpop.f32.mrb[1].mxu0 }
  0xf5   : > { %382 = vtanh.f32 %v224_v12  ;;  %v341_v16 = vmul.f32 -1.442695, %v224_v12 }
  0xf7   : > { %384 = vpow2.f32 %v341_v16 }
  0xff   : > { %v383_v14 = vpop.eup %382 }
 0x100   : > { %239 = vrot.lane.b32.xlu0 %v383_v14, %s402_s27 }
 0x101   : > { %v385_v17 = vpop.eup %384 }
 0x102   : > { %v229_v18 = vadd.f32 1.0, %v385_v17 }
 0x104   : > { %234 = vrot.lane.b32.xlu0 %v225_v15, %s403_s28  ;;  %386 = vrcp.f32 %v229_v18 }
 0x10e   : > { %v387_v19 = vpop.eup %386 }
 0x172   : > { %v240_v20 = vpop.permute.xlu0 %239 }
 0x173   : > { %v242_v21 = vmul.f32 %v387_v19, %v240_v20 }
 0x175   : > { %244 = vrot.lane.b32.xlu1 %v242_v21, %s403_s28 }
 0x176   : > { %v235_v22 = vpop.permute.xlu0 %234 }
 0x177   : > { %v237_v23 = vmul.f32 %v387_v19, %v235_v22 }
 0x1e7   : > { %v245_v24 = vpop.permute.xlu1 %244 }
 0x1e8   : > { %v247_v25 = vadd.f32 %v245_v24, %v237_v23 }
 0x1ea   : > { %388 = vtanh.f32 %v247_v25 }
 0x1f4   : > { %v389_v26 = vpop.eup %388 }
 0x1f5   : > { %250 = vrot.lane.b32.xlu1 %v389_v26, %s402_s27 }
 0x1f9   : > { %261 = vrot.lane.b32.xlu1 %v247_v25, %s404_s29 }
 0x267   : > { %v251_v32 = vpop.permute.xlu1 %250 }
 0x268   : > { %v253_v34 = vmul.f32 %v387_v19, %v251_v32 }
 0x26a   : > { %v265_v35 = vpack.c.bf16 %v253_v34, %v253_v34  ;;  %255 = vrot.lane.b32.xlu0 %v253_v34, %s403_s28 }
 0x26b   : > { %v262_v36 = vpop.permute.xlu1 %261 }
 0x26c   : > { %v273_v37 = vrot.slane %v265_v35, %v272_v33  ;;  %264 = vst.msk [vmem:[#allocation3] sm:$0x3] %vm258_vm3, %v262_v36 }
 0x26e   : > { %v280_v38 = vrot.slane %v273_v37, %v272_v33 }
 0x270   : > { %281 = vrot.lane.b32.xlu0 %v280_v38, %s403_s28 }
 0x2dc   : > { %v256_v39 = vpop.permute.xlu0 %255 }
 0x2dd   : > { %259 = vst.msk [vmem:[#allocation2] sm:$0x3] %vm258_vm3, %v256_v39 }
 0x2e2   : > { %v282_v40 = vpop.permute.xlu0 %281 }
 0x2e3   : > { %285 = vst.msk [vmem:[%s136_s15] sm:$0x1] %vm284_vm4, %v282_v40 }
 0x2e4 PF: > { %s12_s9 = sadd.s32 1, %s396_s9  }
 0x2e5   : > { %p9_p5 = scmp.ge.s32.totalorder %s12_s9, 6  }
 0x2e7   :  { %11 = sbr.rel (!%p9_p5) target bundleno = 1 (0x1), region = 62 }

// kernel: forward.7
= control target key start
LH: loop header
LB: loop body
LE: loop exit
PB: predicated region body
PF: predicated region fallthrough
CT: control target
= control target key end

     0   :  { %s3911_s12 = smov 0   ;;  %s3913_s13 = smov 0   ;;  %s4215_s0 = inlined_call_operand.vmem [shape: bf16[8,19200], index: 0, kind: input, shape index: {}]   ;;  %s4216_s1 = inlined_call_operand.vmem [shape: bf16[19200,128], index: 1, kind: input, shape index: {}]   ;;  %s4217_s2 = inlined_call_operand.vmem [shape: f32[1,128], index: 2, kind: input, shape index: {}]   ;;  %s4218_s3 = inlined_call_operand.vmem [shape: f32[8,128], index: 3, kind: output, shape index: {}]  }
   0x1   :  { %s3915_s14 = smov 0  }
   0x2 LB: > { %s22_s15 = sadd.s32 1, %s3884_s13  ;;  %p2962_p0 = scmp.ge.s32.totalorder %s3888_s14, 1  ;;  %s3888_s14 = sphi %s3915_s14, %s13_s14   ;;  %s3884_s13 = sphi %s3913_s13, %s4220_s13   ;;  %s3880_s12 = sphi %s3911_s12, %s4219_s12  }
   0x3   : > { %p23_p1 = scmp.ge.s32.totalorder %s22_s15, 5  ;;  %p167_p2 = scmp.lt.s32.totalorder %s3888_s14, 6 }
   0x5   : > { %s4222_s15 = smov (%p23_p1, %s22_s15), 0  ;;  %p168_p3 = pnand %p2962_p0, %p167_p2 }
   0x6   : > { %s199_s16 = smul.u32 (!%p168_p3), 30, %s3880_s12  ;;  %p2965_p6 = scmp.ne.s32.totalorder (!%p168_p3), %s3880_s12, 0 }
   0x7   : > { %171 = sbr.rel (%p168_p3) target bundleno = 512 (0x200), region = 32 }
   0x8   : > { %s209_s17 = smul.u32 (!%p168_p3), 480, %s3880_s12  ;;  %p202_p4 = scmp.lt.s32.totalorder (!%p168_p3), %s199_s16, 149 }
   0xa   : > { %p210_p5 = scmp.lt.s32.totalorder (!%p168_p3), %s209_s17, 2399 }
   0xe   : > { %s4224_s16 = smov (!%p202_p4, %s199_s16), 149  ;;  %s4226_s17 = smov (!%p210_p5, %s209_s17), 2399 }
   0xf   : > { %s2963_s18 = sshll.u32 %s4224_s16, 2  ;;  %s2964_s22 = sshll.u32 %s4226_s17, 2  ;;  %v3890_v0 = vmov (!%p2965_p6), 0.0  }
  0x10   : > { %s3936_s21 = scalar_lea.vmem %s4215_s0, %s2963_s18  ;;  %s3941_s25 = scalar_lea.vmem %s4216_s1, %s2964_s22  ;;  %224 = vst [vmem:[#allocation2] sm:$0xff] (!%p2965_p6), %v3890_v0 }
  0x11   : > { %223 = sbr.rel (%p2965_p6) target bundleno = 24 (0x18), region = 36 }
  0x18 PF: > { %v3596_v1 = vld [vmem:[%s3941_s25 + $0x40] sm:$0xff]   ;;  %v3600_v5 = vld [vmem:[%s3941_s25 + $0x48] sm:$0xff]   ;;  %v3604_v9 = vld [vmem:[%s3941_s25 + $0x50] sm:$0xff]   ;;  %p3236_p7 = scmp.ne.s32.totalorder %s3880_s12, 4 }
  0x19   : > { %v3597_v2 = vld [vmem:[%s3941_s25 + $0xc0] sm:$0xff]   ;;  %3241 = vmatprep.subr.bf16.mxu0 %v3596_v1  ;;  %v3601_v6 = vld [vmem:[%s3941_s25 + $0xc8] sm:$0xff]   ;;  %v3605_v10 = vld [vmem:[%s3941_s25 + $0xd0] sm:$0xff]  }
  0x1a   : > { %v3598_v3 = vld [vmem:[%s3941_s25] sm:$0xff]   ;;  %3263 = vmatprep.subr.bf16.mxu1 %v3597_v2  ;;  %v3602_v7 = vld [vmem:[%s3941_s25 + $0x8] sm:$0xff]   ;;  %v3606_v11 = vld [vmem:[%s3941_s25 + $0x10] sm:$0xff]  }
  0x1b   : > { %v3599_v4 = vld [vmem:[%s3941_s25 + $0x80] sm:$0xff]   ;;  %3242 = vmatpush3.bf16.msra.mxu0 %v3598_v3  ;;  %v3603_v8 = vld [vmem:[%s3941_s25 + $0x88] sm:$0xff]   ;;  %v3607_v12 = vld [vmem:[%s3941_s25 + $0x90] sm:$0xff]  }
  0x1c   : > { %3264 = vmatpush3.bf16.msra.mxu1 %v3599_v4  ;;  %3243 = vmatprep.subr.bf16.mxu0 %v3600_v5  ;;  %v3608_v13 = vld [vmem:[%s3941_s25 + $0x58] sm:$0xff]   ;;  %v3612_v17 = vld [vmem:[%s3941_s25 + $0x60] sm:$0xff]   ;;  %v3616_v21 = vld [vmem:[%s3941_s25 + $0x68] sm:$0xff]  }
  0x1d   : > { %3265 = vmatprep.subr.bf16.mxu1 %v3601_v6  ;;  %v3609_v14 = vld [vmem:[%s3941_s25 + $0xd8] sm:$0xff]   ;;  %v3613_v18 = vld [vmem:[%s3941_s25 + $0xe0] sm:$0xff]   ;;  %v3617_v22 = vld [vmem:[%s3941_s25 + $0xe8] sm:$0xff]  }
  0x1e   : > { %v3610_v15 = vld [vmem:[%s3941_s25 + $0x18] sm:$0xff]   ;;  %v3614_v19 = vld [vmem:[%s3941_s25 + $0x20] sm:$0xff]   ;;  %v3618_v23 = vld [vmem:[%s3941_s25 + $0x28] sm:$0xff]  }
  0x1f   : > { %3244 = vmatpush3.bf16.msra.mxu0 %v3602_v7  ;;  %v3611_v16 = vld [vmem:[%s3941_s25 + $0x98] sm:$0xff]   ;;  %v3615_v20 = vld [vmem:[%s3941_s25 + $0xa0] sm:$0xff]   ;;  %v3619_v24 = vld [vmem:[%s3941_s25 + $0xa8] sm:$0xff]  }
  0x20   : > { %3266 = vmatpush3.bf16.msra.mxu1 %v3603_v8  ;;  %3245 = vmatprep.subr.bf16.mxu0 %v3604_v9  ;;  %v3620_v25 = vld [vmem:[%s3941_s25 + $0x70] sm:$0xff]   ;;  %v3624_v29 = vld [vmem:[%s3941_s25 + $0x78] sm:$0xff]   ;;  %v226_v33 = vld [vmem:[%s3936_s21] sm:$0xff] }
  0x21   : > { %3267 = vmatprep.subr.bf16.mxu1 %v3605_v10  ;;  %v3621_v26 = vld [vmem:[%s3941_s25 + $0xf0] sm:$0xff]   ;;  %v3625_v30 = vld [vmem:[%s3941_s25 + $0xf8] sm:$0xff]   ;;  %v227_v34 = vld [vmem:[%s3936_s21 + $0x8] sm:$0xff]  ;;  %v2966_v35 = vcombine.low %v226_v33, %v226_v33  ;;  %v2967_v36 = vcombine.high %v226_v33, %v226_v33 }
  0x22   : > { %v3622_v27 = vld [vmem:[%s3941_s25 + $0x30] sm:$0xff]   ;;  %v3626_v31 = vld [vmem:[%s3941_s25 + $0x38] sm:$0xff]   ;;  %v2968_v37 = vcombine.low %v227_v34, %v227_v34  ;;  %v2969_v38 = vcombine.high %v227_v34, %v227_v34  ;;  %v3632_v39 = vld [vmem:[%s3941_s25 + $0x140] sm:$0xff]  }
  0x23   : > { %3246 = vmatpush3.bf16.msra.mxu0 %v3606_v11  ;;  %v3623_v28 = vld [vmem:[%s3941_s25 + $0xb0] sm:$0xff]   ;;  %v3627_v32 = vld [vmem:[%s3941_s25 + $0xb8] sm:$0xff]   ;;  %v3633_v40 = vld [vmem:[%s3941_s25 + $0x100] sm:$0xff]   ;;  %2298 = vmatprep.mubr.bf16.mxu0 %v2967_v36 }
  0x24   : > { %3268 = vmatpush3.bf16.msra.mxu1 %v3607_v12  ;;  %3247 = vmatprep.subr.bf16.mxu0 %v3608_v13  ;;  %v3634_v41 = vld [vmem:[%s3941_s25 + $0x1c0] sm:$0xff]   ;;  %v3636_v43 = vld [vmem:[%s3941_s25 + $0x148] sm:$0xff]   ;;  %v3640_v47 = vld [vmem:[%s3941_s25 + $0x150] sm:$0xff]  }
  0x25   : > { %3269 = vmatprep.subr.bf16.mxu1 %v3609_v14  ;;  %2338 = vmatprep.mubr.bf16.mxu1 %v2969_v38  ;;  %v3635_v42 = vld [vmem:[%s3941_s25 + $0x180] sm:$0xff]   ;;  %v3637_v44 = vld [vmem:[%s3941_s25 + $0x108] sm:$0xff]   ;;  %v3641_v48 = vld [vmem:[%s3941_s25 + $0x110] sm:$0xff]  }
  0x26   : > { %v3638_v45 = vld [vmem:[%s3941_s25 + $0x1c8] sm:$0xff]   ;;  %v3642_v49 = vld [vmem:[%s3941_s25 + $0x1d0] sm:$0xff]   ;;  %v3644_v51 = vld [vmem:[%s3941_s25 + $0x158] sm:$0xff]  }
  0x27   : > { %3248 = vmatpush3.bf16.msra.mxu0 %v3610_v15  ;;  %v3639_v46 = vld [vmem:[%s3941_s25 + $0x188] sm:$0xff]   ;;  %v3643_v50 = vld [vmem:[%s3941_s25 + $0x190] sm:$0xff]   ;;  %v3645_v52 = vld [vmem:[%s3941_s25 + $0x118] sm:$0xff]  }
  0x28   : > { %3270 = vmatpush3.bf16.msra.mxu1 %v3611_v16  ;;  %3249 = vmatprep.subr.bf16.mxu0 %v3612_v17  ;;  %v3646_v53 = vld [vmem:[%s3941_s25 + $0x1d8] sm:$0xff]   ;;  %v3648_v55 = vld [vmem:[%s3941_s25 + $0x160] sm:$0xff]   ;;  %v3652_v59 = vld [vmem:[%s3941_s25 + $0x168] sm:$0xff]  }
  0x29   : > { %3271 = vmatprep.subr.bf16.mxu1 %v3613_v18  ;;  %v3647_v54 = vld [vmem:[%s3941_s25 + $0x198] sm:$0xff]   ;;  %v3649_v56 = vld [vmem:[%s3941_s25 + $0x120] sm:$0xff]   ;;  %v3653_v60 = vld [vmem:[%s3941_s25 + $0x128] sm:$0xff]  }
  0x2a   : > { %v3650_v57 = vld [vmem:[%s3941_s25 + $0x1e0] sm:$0xff]   ;;  %v3654_v61 = vld [vmem:[%s3941_s25 + $0x1e8] sm:$0xff]   ;;  %v3656_v63 = vld [vmem:[%s3941_s25 + $0x170] sm:$0xff]  }
  0x2b   : > { %3250 = vmatpush3.bf16.msra.mxu0 %v3614_v19  ;;  %v3651_v58 = vld [vmem:[%s3941_s25 + $0x1a0] sm:$0xff]   ;;  %v3655_v62 = vld [vmem:[%s3941_s25 + $0x1a8] sm:$0xff]   ;;  %v3657_v0 = vld [vmem:[%s3941_s25 + $0x130] sm:$0xff]  }
  0x2c   : > { %3272 = vmatpush3.bf16.msra.mxu1 %v3615_v20  ;;  %3251 = vmatprep.subr.bf16.mxu0 %v3616_v21  ;;  %v3658_v1 = vld [vmem:[%s3941_s25 + $0x1f0] sm:$0xff]   ;;  %v3660_v3 = vld [vmem:[%s3941_s25 + $0x178] sm:$0xff]   ;;  %v3666_v10 = vld [vmem:[%s3941_s25 + $0x240] sm:$0xff]  }
  0x2d   : > { %3273 = vmatprep.subr.bf16.mxu1 %v3617_v22  ;;  %v3659_v2 = vld [vmem:[%s3941_s25 + $0x1b0] sm:$0xff]   ;;  %v3661_v4 = vld [vmem:[%s3941_s25 + $0x138] sm:$0xff]   ;;  %v3669_v14 = vld [vmem:[%s3941_s25 + $0x200] sm:$0xff]  }
  0x2e   : > { %v3662_v5 = vld [vmem:[%s3941_s25 + $0x1f8] sm:$0xff]   ;;  %v228_v6 = vld [vmem:[%s3936_s21 + $0x10] sm:$0xff]  ;;  %v3670_v15 = vld [vmem:[%s3941_s25 + $0x2c0] sm:$0xff]  }
  0x2f   : > { %3252 = vmatpush3.bf16.msra.mxu0 %v3618_v23  ;;  %v2971_v7 = vcombine.high %v228_v6, %v228_v6  ;;  %v3665_v8 = vld [vmem:[%s3941_s25 + $0x1b8] sm:$0xff]   ;;  %v2970_v9 = vcombine.low %v228_v6, %v228_v6  ;;  %v3671_v16 = vld [vmem:[%s3941_s25 + $0x280] sm:$0xff]   ;;  %v3672_v17 = vld [vmem:[%s3941_s25 + $0x248] sm:$0xff]  }
  0x30   : > { %3274 = vmatpush3.bf16.msra.mxu1 %v3619_v24  ;;  %3253 = vmatprep.subr.bf16.mxu0 %v3620_v25  ;;  %v229_v11 = vld [vmem:[%s3936_s21 + $0x18] sm:$0xff]  ;;  %v3673_v18 = vld [vmem:[%s3941_s25 + $0x208] sm:$0xff]   ;;  %v3676_v21 = vld [vmem:[%s3941_s25 + $0x250] sm:$0xff]  }
  0x31   : > { %3275 = vmatprep.subr.bf16.mxu1 %v3621_v26  ;;  %v2972_v12 = vcombine.low %v229_v11, %v229_v11  ;;  %v2973_v13 = vcombine.high %v229_v11, %v229_v11  ;;  %v3674_v19 = vld [vmem:[%s3941_s25 + $0x2c8] sm:$0xff]   ;;  %v3677_v22 = vld [vmem:[%s3941_s25 + $0x210] sm:$0xff]   ;;  %v3680_v25 = vld [vmem:[%s3941_s25 + $0x258] sm:$0xff]  }
  0x32   : > { %v3675_v20 = vld [vmem:[%s3941_s25 + $0x288] sm:$0xff]   ;;  %v3678_v23 = vld [vmem:[%s3941_s25 + $0x2d0] sm:$0xff]   ;;  %v3681_v26 = vld [vmem:[%s3941_s25 + $0x218] sm:$0xff]  }
  0x33   : > { %3254 = vmatpush3.bf16.msra.mxu0 %v3622_v27  ;;  %v3679_v24 = vld [vmem:[%s3941_s25 + $0x290] sm:$0xff]   ;;  %v3682_v27 = vld [vmem:[%s3941_s25 + $0x2d8] sm:$0xff]   ;;  %v3688_v33 = vld [vmem:[%s3941_s25 + $0x268] sm:$0xff]  }
  0x34   : > { %3276 = vmatpush3.bf16.msra.mxu1 %v3623_v28  ;;  %3255 = vmatprep.subr.bf16.mxu0 %v3624_v29  ;;  %v3683_v28 = vld [vmem:[%s3941_s25 + $0x298] sm:$0xff]   ;;  %v3684_v29 = vld [vmem:[%s3941_s25 + $0x260] sm:$0xff]   ;;  %v3689_v34 = vld [vmem:[%s3941_s25 + $0x228] sm:$0xff]  }
  0x35   : > { %3277 = vmatprep.subr.bf16.mxu1 %v3625_v30  ;;  %v3685_v30 = vld [vmem:[%s3941_s25 + $0x220] sm:$0xff]   ;;  %v3691_v36 = vld [vmem:[%s3941_s25 + $0x2a8] sm:$0xff]   ;;  %v3693_v38 = vld [vmem:[%s3941_s25 + $0x230] sm:$0xff]  }
  0x36   : > { %v3723_v6 = vld [vmem:[%s3941_s25 + $0x3a0] sm:$0xff]   ;;  %v3728_v11 = vld [vmem:[%s3941_s25 + $0x370] sm:$0xff]  }
  0x37   : > { %3256 = vmatpush3.bf16.msra.mxu0 %v3626_v31  ;;  %v3686_v31 = vld [vmem:[%s3941_s25 + $0x2e0] sm:$0xff]  }
  0x38   : > { %3278 = vmatpush3.bf16.msra.mxu1 %v3627_v32  ;;  %3285 = vmatprep.subr.bf16.mxu0 %v3632_v39  ;;  %v3687_v32 = vld [vmem:[%s3941_s25 + $0x2a0] sm:$0xff]   ;;  %v3694_v39 = vld [vmem:[%s3941_s25 + $0x2f0] sm:$0xff]  }
  0x39   : > { %3307 = vmatprep.subr.bf16.mxu1 %v3634_v41  ;;  %v3696_v41 = vld [vmem:[%s3941_s25 + $0x278] sm:$0xff]  }
  0x3a   : > { %2299 = vmatmul.mubr.bf16.vlgmr.msra.gmra.mrb[0].mxu0 %v2966_v35  ;;  %v3690_v35 = vld [vmem:[%s3941_s25 + $0x2e8] sm:$0xff]  }
  0x3b   : > { %2339 = vmatmul.mubr.bf16.vlgmr.msra.gmra.mrb[0].mxu1 %v2968_v37  ;;  %3286 = vmatpush3.bf16.msra.mxu0 %v3633_v40  ;;  %v3692_v37 = vld [vmem:[%s3941_s25 + $0x270] sm:$0xff]  }
  0x3c   : > { %3308 = vmatpush3.bf16.msra.mxu1 %v3635_v42  ;;  %3287 = vmatprep.subr.bf16.mxu0 %v3636_v43  ;;  %v3695_v40 = vld [vmem:[%s3941_s25 + $0x2b0] sm:$0xff]   ;;  %v3697_v42 = vld [vmem:[%s3941_s25 + $0x238] sm:$0xff]  }
  0x3d   : > { %3309 = vmatprep.subr.bf16.mxu1 %v3638_v45  ;;  %2378 = vmatprep.mubr.bf16.mxu0 %v2971_v7  ;;  %v3698_v43 = vld [vmem:[%s3941_s25 + $0x2f8] sm:$0xff]   ;;  %v3724_v7 = vld [vmem:[%s3941_s25 + $0x368] sm:$0xff]  }
  0x3e   : > { %2418 = vmatprep.mubr.bf16.mxu1 %v2973_v13  ;;  %v3730_v13 = vld [vmem:[%s3941_s25 + $0x3f0] sm:$0xff]  }
  0x3f   : > { %3288 = vmatpush3.bf16.msra.mxu0 %v3637_v44  ;;  %v230_v44 = vld [vmem:[%s3936_s21 + $0x20] sm:$0xff] }
  0x40   : > { %3310 = vmatpush3.bf16.msra.mxu1 %v3639_v46  ;;  %3289 = vmatprep.subr.bf16.mxu0 %v3640_v47  ;;  %v2974_v45 = vcombine.low %v230_v44, %v230_v44  ;;  %v2975_v46 = vcombine.high %v230_v44, %v230_v44  ;;  %v3701_v47 = vld [vmem:[%s3941_s25 + $0x2b8] sm:$0xff]   ;;  %v3759_v44 = vld [vmem:[%s3941_s25 + $0x4a0] sm:$0xff]  }
  0x41   : > { %3311 = vmatprep.subr.bf16.mxu1 %v3642_v49  ;;  %v231_v49 = vld [vmem:[%s3936_s21 + $0x28] sm:$0xff] }
  0x43   : > { %3290 = vmatpush3.bf16.msra.mxu0 %v3641_v48  ;;  %v3702_v48 = vld [vmem:[%s3941_s25 + $0x340] sm:$0xff]  }
  0x44   : > { %3312 = vmatpush3.bf16.msra.mxu1 %v3643_v50  ;;  %3291 = vmatprep.subr.bf16.mxu0 %v3644_v51  ;;  %v2976_v50 = vcombine.low %v231_v49, %v231_v49  ;;  %v2977_v51 = vcombine.high %v231_v49, %v231_v49  ;;  %v3764_v49 = vld [vmem:[%s3941_s25 + $0x470] sm:$0xff]  }
  0x45   : > { %3313 = vmatprep.subr.bf16.mxu1 %v3646_v53  ;;  %v3706_v53 = vld [vmem:[%s3941_s25 + $0x3c0] sm:$0xff]  }
  0x47   : > { %3292 = vmatpush3.bf16.msra.mxu0 %v3645_v52  ;;  %v3705_v52 = vld [vmem:[%s3941_s25 + $0x300] sm:$0xff]  }
  0x48   : > { %3314 = vmatpush3.bf16.msra.mxu1 %v3647_v54  ;;  %3293 = vmatprep.subr.bf16.mxu0 %v3648_v55  ;;  %v3707_v54 = vld [vmem:[%s3941_s25 + $0x380] sm:$0xff]   ;;  %v3708_v55 = vld [vmem:[%s3941_s25 + $0x348] sm:$0xff]  }
  0x49   : > { %3315 = vmatprep.subr.bf16.mxu1 %v3650_v57  ;;  %v3710_v57 = vld [vmem:[%s3941_s25 + $0x3c8] sm:$0xff]  }
  0x4b   : > { %3294 = vmatpush3.bf16.msra.mxu0 %v3649_v56  ;;  %v3709_v56 = vld [vmem:[%s3941_s25 + $0x308] sm:$0xff]  }
  0x4c   : > { %3316 = vmatpush3.bf16.msra.mxu1 %v3651_v58  ;;  %3295 = vmatprep.subr.bf16.mxu0 %v3652_v59  ;;  %v3711_v58 = vld [vmem:[%s3941_s25 + $0x388] sm:$0xff]   ;;  %v3712_v59 = vld [vmem:[%s3941_s25 + $0x350] sm:$0xff]  }
  0x4d   : > { %3317 = vmatprep.subr.bf16.mxu1 %v3654_v61  ;;  %v3714_v61 = vld [vmem:[%s3941_s25 + $0x3d0] sm:$0xff]  }
  0x4f   : > { %3296 = vmatpush3.bf16.msra.mxu0 %v3653_v60  ;;  %v3713_v60 = vld [vmem:[%s3941_s25 + $0x310] sm:$0xff]  }
  0x50   : > { %3318 = vmatpush3.bf16.msra.mxu1 %v3655_v62  ;;  %3297 = vmatprep.subr.bf16.mxu0 %v3656_v63  ;;  %v3715_v62 = vld [vmem:[%s3941_s25 + $0x390] sm:$0xff]   ;;  %v3716_v63 = vld [vmem:[%s3941_s25 + $0x358] sm:$0xff]  }
  0x51   : > { %3319 = vmatprep.subr.bf16.mxu1 %v3658_v1  ;;  %v3718_v1 = vld [vmem:[%s3941_s25 + $0x3d8] sm:$0xff]  }
  0x53   : > { %3298 = vmatpush3.bf16.msra.mxu0 %v3657_v0  ;;  %v3717_v0 = vld [vmem:[%s3941_s25 + $0x318] sm:$0xff]  }
  0x54   : > { %3320 = vmatpush3.bf16.msra.mxu1 %v3659_v2  ;;  %3299 = vmatprep.subr.bf16.mxu0 %v3660_v3  ;;  %v3719_v2 = vld [vmem:[%s3941_s25 + $0x398] sm:$0xff]   ;;  %v3720_v3 = vld [vmem:[%s3941_s25 + $0x360] sm:$0xff]  }
  0x55   : > { %3321 = vmatprep.subr.bf16.mxu1 %v3662_v5  ;;  %v3722_v5 = vld [vmem:[%s3941_s25 + $0x3e0] sm:$0xff]  }
  0x57   : > { %3300 = vmatpush3.bf16.msra.mxu0 %v3661_v4  ;;  %v3721_v4 = vld [vmem:[%s3941_s25 + $0x320] sm:$0xff]  }
  0x58   : > { %3322 = vmatpush3.bf16.msra.mxu1 %v3665_v8  ;;  %3329 = vmatprep.subr.bf16.mxu0 %v3666_v10  ;;  %v3725_v8 = vld [vmem:[%s3941_s25 + $0x328] sm:$0xff]  }
  0x59   : > { %3351 = vmatprep.subr.bf16.mxu1 %v3670_v15  ;;  %v3727_v10 = vld [vmem:[%s3941_s25 + $0x3a8] sm:$0xff]   ;;  %v3732_v15 = vld [vmem:[%s3941_s25 + $0x378] sm:$0xff]  }
  0x5a   : > { %2379 = vmatmul.mubr.bf16.vlgmr.msra.gmra.mrb[4].mxu0 %v2970_v9  ;;  %v3726_v9 = vld [vmem:[%s3941_s25 + $0x3e8] sm:$0xff]  }
  0x5b   : > { %3330 = vmatpush3.bf16.msra.mxu0 %v3669_v14  ;;  %2419 = vmatmul.mubr.bf16.vlgmr.msra.gmra.mrb[4].mxu1 %v2972_v12  ;;  %v3729_v12 = vld [vmem:[%s3941_s25 + $0x330] sm:$0xff]  }
  0x5c   : > { %3352 = vmatpush3.bf16.msra.mxu1 %v3671_v16  ;;  %3331 = vmatprep.subr.bf16.mxu0 %v3672_v17  ;;  %v3731_v14 = vld [vmem:[%s3941_s25 + $0x3b0] sm:$0xff]   ;;  %v3733_v16 = vld [vmem:[%s3941_s25 + $0x338] sm:$0xff]  }
  0x5d   : > { %3353 = vmatprep.subr.bf16.mxu1 %v3674_v19  ;;  %2458 = vmatprep.mubr.bf16.mxu0 %v2975_v46  ;;  %v3734_v17 = vld [vmem:[%s3941_s25 + $0x3f8] sm:$0xff]   ;;  %v3761_v46 = vld [vmem:[%s3941_s25 + $0x428] sm:$0xff]  }
  0x5e   : > { %2498 = vmatprep.mubr.bf16.mxu1 %v2977_v51  ;;  %v3766_v51 = vld [vmem:[%s3941_s25 + $0x4f0] sm:$0xff]  }
  0x5f   : > { %3332 = vmatpush3.bf16.msra.mxu0 %v3673_v18  ;;  %v232_v18 = vld [vmem:[%s3936_s21 + $0x30] sm:$0xff] }
  0x60   : > { %3354 = vmatpush3.bf16.msra.mxu1 %v3675_v20  ;;  %3333 = vmatprep.subr.bf16.mxu0 %v3676_v21  ;;  %v2978_v19 = vcombine.low %v232_v18, %v232_v18  ;;  %v2979_v20 = vcombine.high %v232_v18, %v232_v18  ;;  %v3737_v21 = vld [vmem:[%s3941_s25 + $0x3b8] sm:$0xff]   ;;  %v3795_v18 = vld [vmem:[%s3941_s25 + $0x5a0] sm:$0xff]  }
  0x61   : > { %3355 = vmatprep.subr.bf16.mxu1 %v3678_v23  ;;  %v233_v23 = vld [vmem:[%s3936_s21 + $0x38] sm:$0xff] }
  0x63   : > { %3334 = vmatpush3.bf16.msra.mxu0 %v3677_v22  ;;  %v3738_v22 = vld [vmem:[%s3941_s25 + $0x440] sm:$0xff]  }
  0x64   : > { %3356 = vmatpush3.bf16.msra.mxu1 %v3679_v24  ;;  %3335 = vmatprep.subr.bf16.mxu0 %v3680_v25  ;;  %v2980_v24 = vcombine.low %v233_v23, %v233_v23  ;;  %v2981_v25 = vcombine.high %v233_v23, %v233_v23  ;;  %v3800_v23 = vld [vmem:[%s3941_s25 + $0x570] sm:$0xff]  }
  0x65   : > { %3357 = vmatprep.subr.bf16.mxu1 %v3682_v27  ;;  %v3742_v27 = vld [vmem:[%s3941_s25 + $0x4c0] sm:$0xff]  }
  0x67   : > { %3336 = vmatpush3.bf16.msra.mxu0 %v3681_v26  ;;  %v3741_v26 = vld [vmem:[%s3941_s25 + $0x400] sm:$0xff]  }
  0x68   : > { %3358 = vmatpush3.bf16.msra.mxu1 %v3683_v28  ;;  %3337 = vmatprep.subr.bf16.mxu0 %v3684_v29  ;;  %v3743_v28 = vld [vmem:[%s3941_s25 + $0x480] sm:$0xff]   ;;  %v3744_v29 = vld [vmem:[%s3941_s25 + $0x448] sm:$0xff]  }
  0x69   : > { %3359 = vmatprep.subr.bf16.mxu1 %v3686_v31  ;;  %v3746_v31 = vld [vmem:[%s3941_s25 + $0x4c8] sm:$0xff]  }
  0x6b   : > { %3338 = vmatpush3.bf16.msra.mxu0 %v3685_v30  ;;  %v3745_v30 = vld [vmem:[%s3941_s25 + $0x408] sm:$0xff]  }
  0x6c   : > { %3360 = vmatpush3.bf16.msra.mxu1 %v3687_v32  ;;  %3339 = vmatprep.subr.bf16.mxu0 %v3688_v33  ;;  %v3747_v32 = vld [vmem:[%s3941_s25 + $0x488] sm:$0xff]   ;;  %v3748_v33 = vld [vmem:[%s3941_s25 + $0x450] sm:$0xff]  }
  0x6d   : > { %3361 = vmatprep.subr.bf16.mxu1 %v3690_v35  ;;  %v3750_v35 = vld [vmem:[%s3941_s25 + $0x4d0] sm:$0xff]  }
  0x6f   : > { %3340 = vmatpush3.bf16.msra.mxu0 %v3689_v34  ;;  %v3749_v34 = vld [vmem:[%s3941_s25 + $0x410] sm:$0xff]  }
  0x70   : > { %3362 = vmatpush3.bf16.msra.mxu1 %v3691_v36  ;;  %3341 = vmatprep.subr.bf16.mxu0 %v3692_v37  ;;  %v3751_v36 = vld [vmem:[%s3941_s25 + $0x490] sm:$0xff]   ;;  %v3752_v37 = vld [vmem:[%s3941_s25 + $0x458] sm:$0xff]  }
  0x71   : > { %3363 = vmatprep.subr.bf16.mxu1 %v3694_v39  ;;  %v3754_v39 = vld [vmem:[%s3941_s25 + $0x4d8] sm:$0xff]  }
  0x73   : > { %3342 = vmatpush3.bf16.msra.mxu0 %v3693_v38  ;;  %v3753_v38 = vld [vmem:[%s3941_s25 + $0x418] sm:$0xff]  }
  0x74   : > { %3364 = vmatpush3.bf16.msra.mxu1 %v3695_v40  ;;  %3343 = vmatprep.subr.bf16.mxu0 %v3696_v41  ;;  %v3755_v40 = vld [vmem:[%s3941_s25 + $0x498] sm:$0xff]   ;;  %v3756_v41 = vld [vmem:[%s3941_s25 + $0x460] sm:$0xff]  }
  0x75   : > { %3365 = vmatprep.subr.bf16.mxu1 %v3698_v43  ;;  %v3758_v43 = vld [vmem:[%s3941_s25 + $0x4e0] sm:$0xff]  }
  0x77   : > { %3344 = vmatpush3.bf16.msra.mxu0 %v3697_v42  ;;  %v3757_v42 = vld [vmem:[%s3941_s25 + $0x420] sm:$0xff]  }
  0x78   : > { %3366 = vmatpush3.bf16.msra.mxu1 %v3701_v47  ;;  %3373 = vmatprep.subr.bf16.mxu0 %v3702_v48  ;;  %v3762_v47 = vld [vmem:[%s3941_s25 + $0x4e8] sm:$0xff]  }
  0x79   : > { %3395 = vmatprep.subr.bf16.mxu1 %v3706_v53  ;;  %v3763_v48 = vld [vmem:[%s3941_s25 + $0x4a8] sm:$0xff]   ;;  %v3768_v53 = vld [vmem:[%s3941_s25 + $0x478] sm:$0xff]  }
  0x7a   : > { %2459 = vmatmul.mubr.bf16.vlgmr.msra.gmra.mrb[8].mxu0 %v2974_v45  ;;  %v3760_v45 = vld [vmem:[%s3941_s25 + $0x468] sm:$0xff]  }
  0x7b   : > { %3374 = vmatpush3.bf16.msra.mxu0 %v3705_v52  ;;  %2499 = vmatmul.mubr.bf16.vlgmr.msra.gmra.mrb[8].mxu1 %v2976_v50  ;;  %v3765_v50 = vld [vmem:[%s3941_s25 + $0x430] sm:$0xff]  }
  0x7c   : > { %3396 = vmatpush3.bf16.msra.mxu1 %v3707_v54  ;;  %3375 = vmatprep.subr.bf16.mxu0 %v3708_v55  ;;  %v3767_v52 = vld [vmem:[%s3941_s25 + $0x4b0] sm:$0xff]   ;;  %v3769_v54 = vld [vmem:[%s3941_s25 + $0x438] sm:$0xff]  }
  0x7d   : > { %3397 = vmatprep.subr.bf16.mxu1 %v3710_v57  ;;  %2538 = vmatprep.mubr.bf16.mxu0 %v2979_v20  ;;  %v3770_v55 = vld [vmem:[%s3941_s25 + $0x4f8] sm:$0xff]   ;;  %v3797_v20 = vld [vmem:[%s3941_s25 + $0x528] sm:$0xff]  }
  0x7e   : > { %2578 = vmatprep.mubr.bf16.mxu1 %v2981_v25  ;;  %v3802_v25 = vld [vmem:[%s3941_s25 + $0x5f0] sm:$0xff]  }
  0x7f   : > { %3376 = vmatpush3.bf16.msra.mxu0 %v3709_v56  ;;  %v234_v56 = vld [vmem:[%s3936_s21 + $0x40] sm:$0xff] }
  0x80   : > { %3398 = vmatpush3.bf16.msra.mxu1 %v3711_v58  ;;  %3377 = vmatprep.subr.bf16.mxu0 %v3712_v59  ;;  %v2982_v57 = vcombine.low %v234_v56, %v234_v56  ;;  %v2983_v58 = vcombine.high %v234_v56, %v234_v56  ;;  %v3773_v59 = vld [vmem:[%s3941_s25 + $0x4b8] sm:$0xff]   ;;  %v3831_v56 = vld [vmem:[%s3941_s25 + $0x6a0] sm:$0xff]  }
  0x81   : > { %3399 = vmatprep.subr.bf16.mxu1 %v3714_v61  ;;  %v235_v61 = vld [vmem:[%s3936_s21 + $0x48] sm:$0xff] }
  0x83   : > { %3378 = vmatpush3.bf16.msra.mxu0 %v3713_v60  ;;  %v3774_v60 = vld [vmem:[%s3941_s25 + $0x540] sm:$0xff]  }
  0x84   : > { %3400 = vmatpush3.bf16.msra.mxu1 %v3715_v62  ;;  %3379 = vmatprep.subr.bf16.mxu0 %v3716_v63  ;;  %v2984_v62 = vcombine.low %v235_v61, %v235_v61  ;;  %v2985_v63 = vcombine.high %v235_v61, %v235_v61  ;;  %v3836_v61 = vld [vmem:[%s3941_s25 + $0x670] sm:$0xff]  }
  0x85   : > { %3401 = vmatprep.subr.bf16.mxu1 %v3718_v1  ;;  %v3778_v1 = vld [vmem:[%s3941_s25 + $0x5c0] sm:$0xff]  }
  0x87   : > { %3380 = vmatpush3.bf16.msra.mxu0 %v3717_v0  ;;  %v3777_v0 = vld [vmem:[%s3941_s25 + $0x500] sm:$0xff]  }
  0x88   : > { %3402 = vmatpush3.bf16.msra.mxu1 %v3719_v2  ;;  %3381 = vmatprep.subr.bf16.mxu0 %v3720_v3  ;;  %v3779_v2 = vld [vmem:[%s3941_s25 + $0x580] sm:$0xff]   ;;  %v3780_v3 = vld [vmem:[%s3941_s25 + $0x548] sm:$0xff]  }
  0x89   : > { %3403 = vmatprep.subr.bf16.mxu1 %v3722_v5  ;;  %v3782_v5 = vld [vmem:[%s3941_s25 + $0x5c8] sm:$0xff]  }
  0x8b   : > { %3382 = vmatpush3.bf16.msra.mxu0 %v3721_v4  ;;  %v3781_v4 = vld [vmem:[%s3941_s25 + $0x508] sm:$0xff]  }
  0x8c   : > { %3404 = vmatpush3.bf16.msra.mxu1 %v3723_v6  ;;  %3383 = vmatprep.subr.bf16.mxu0 %v3724_v7  ;;  %v3783_v6 = vld [vmem:[%s3941_s25 + $0x588] sm:$0xff]   ;;  %v3784_v7 = vld [vmem:[%s3941_s25 + $0x550] sm:$0xff]  }
  0x8d   : > { %3405 = vmatprep.subr.bf16.mxu1 %v3726_v9  ;;  %v3786_v9 = vld [vmem:[%s3941_s25 + $0x5d0] sm:$0xff]  }
  0x8f   : > { %3384 = vmatpush3.bf16.msra.mxu0 %v3725_v8  ;;  %v3785_v8 = vld [vmem:[%s3941_s25 + $0x510] sm:$0xff]  }
  0x90   : > { %3406 = vmatpush3.bf16.msra.mxu1 %v3727_v10  ;;  %3385 = vmatprep.subr.bf16.mxu0 %v3728_v11  ;;  %v3787_v10 = vld [vmem:[%s3941_s25 + $0x590] sm:$0xff]   ;;  %v3788_v11 = vld [vmem:[%s3941_s25 + $0x558] sm:$0xff]  }
  0x91   : > { %3407 = vmatprep.subr.bf16.mxu1 %v3730_v13  ;;  %v3790_v13 = vld [vmem:[%s3941_s25 + $0x5d8] sm:$0xff]  }
  0x93   : > { %3386 = vmatpush3.bf16.msra.mxu0 %v3729_v12  ;;  %v3789_v12 = vld [vmem:[%s3941_s25 + $0x518] sm:$0xff]  }
  0x94   : > { %3408 = vmatpush3.bf16.msra.mxu1 %v3731_v14  ;;  %3387 = vmatprep.subr.bf16.mxu0 %v3732_v15  ;;  %v3791_v14 = vld [vmem:[%s3941_s25 + $0x598] sm:$0xff]   ;;  %v3792_v15 = vld [vmem:[%s3941_s25 + $0x560] sm:$0xff]  }
  0x95   : > { %3409 = vmatprep.subr.bf16.mxu1 %v3734_v17  ;;  %v3794_v17 = vld [vmem:[%s3941_s25 + $0x5e0] sm:$0xff]  }
  0x97   : > { %3388 = vmatpush3.bf16.msra.mxu0 %v3733_v16  ;;  %v3793_v16 = vld [vmem:[%s3941_s25 + $0x520] sm:$0xff]  }
  0x98   : > { %3410 = vmatpush3.bf16.msra.mxu1 %v3737_v21  ;;  %3417 = vmatprep.subr.bf16.mxu0 %v3738_v22  ;;  %v3798_v21 = vld [vmem:[%s3941_s25 + $0x5e8] sm:$0xff]  }
  0x99   : > { %3439 = vmatprep.subr.bf16.mxu1 %v3742_v27  ;;  %v3799_v22 = vld [vmem:[%s3941_s25 + $0x5a8] sm:$0xff]   ;;  %v3804_v27 = vld [vmem:[%s3941_s25 + $0x578] sm:$0xff]  }
  0x9a   : > { %2539 = vmatmul.mubr.bf16.vlgmr.msra.gmra.mrb[12].mxu0 %v2978_v19  ;;  %v3796_v19 = vld [vmem:[%s3941_s25 + $0x568] sm:$0xff]  }
  0x9b   : > { %3418 = vmatpush3.bf16.msra.mxu0 %v3741_v26  ;;  %2579 = vmatmul.mubr.bf16.vlgmr.msra.gmra.mrb[12].mxu1 %v2980_v24  ;;  %v3801_v24 = vld [vmem:[%s3941_s25 + $0x530] sm:$0xff]  }
  0x9c   : > { %3440 = vmatpush3.bf16.msra.mxu1 %v3743_v28  ;;  %3419 = vmatprep.subr.bf16.mxu0 %v3744_v29  ;;  %v3803_v26 = vld [vmem:[%s3941_s25 + $0x5b0] sm:$0xff]   ;;  %v3805_v28 = vld [vmem:[%s3941_s25 + $0x538] sm:$0xff]  }
  0x9d   : > { %3441 = vmatprep.subr.bf16.mxu1 %v3746_v31  ;;  %2618 = vmatprep.mubr.bf16.mxu0 %v2983_v58  ;;  %v3806_v29 = vld [vmem:[%s3941_s25 + $0x5f8] sm:$0xff]   ;;  %v3833_v58 = vld [vmem:[%s3941_s25 + $0x628] sm:$0xff]  }
  0x9e   : > { %2658 = vmatprep.mubr.bf16.mxu1 %v2985_v63  ;;  %v3838_v63 = vld [vmem:[%s3941_s25 + $0x6f0] sm:$0xff]  }
  0x9f   : > { %3420 = vmatpush3.bf16.msra.mxu0 %v3745_v30  ;;  %v236_v30 = vld [vmem:[%s3936_s21 + $0x50] sm:$0xff] }
  0xa0   : > { %3442 = vmatpush3.bf16.msra.mxu1 %v3747_v32  ;;  %3421 = vmatprep.subr.bf16.mxu0 %v3748_v33  ;;  %v2986_v31 = vcombine.low %v236_v30, %v236_v30  ;;  %v2987_v32 = vcombine.high %v236_v30, %v236_v30  ;;  %v3809_v33 = vld [vmem:[%s3941_s25 + $0x5b8] sm:$0xff]  }
  0xa1   : > { %3443 = vmatprep.subr.bf16.mxu1 %v3750_v35  ;;  %v237_v35 = vld [vmem:[%s3936_s21 + $0x58] sm:$0xff] }
  0xa3   : > { %3422 = vmatpush3.bf16.msra.mxu0 %v3749_v34  ;;  %v3810_v34 = vld [vmem:[%s3941_s25 + $0x640] sm:$0xff]  }
  0xa4   : > { %3444 = vmatpush3.bf16.msra.mxu1 %v3751_v36  ;;  %3423 = vmatprep.subr.bf16.mxu0 %v3752_v37  ;;  %v2988_v36 = vcombine.low %v237_v35, %v237_v35  ;;  %v2989_v37 = vcombine.high %v237_v35, %v237_v35 }
  0xa5   : > { %3445 = vmatprep.subr.bf16.mxu1 %v3754_v39  ;;  %v3814_v39 = vld [vmem:[%s3941_s25 + $0x6c0] sm:$0xff]  }
  0xa7   : > { %3424 = vmatpush3.bf16.msra.mxu0 %v3753_v38  ;;  %v3813_v38 = vld [vmem:[%s3941_s25 + $0x600] sm:$0xff]  }
  0xa8   : > { %3446 = vmatpush3.bf16.msra.mxu1 %v3755_v40  ;;  %3425 = vmatprep.subr.bf16.mxu0 %v3756_v41  ;;  %v3815_v40 = vld [vmem:[%s3941_s25 + $0x680] sm:$0xff]   ;;  %v3816_v41 = vld [vmem:[%s3941_s25 + $0x648] sm:$0xff]  }
  0xa9   : > { %3447 = vmatprep.subr.bf16.mxu1 %v3758_v43  ;;  %v3818_v43 = vld [vmem:[%s3941_s25 + $0x6c8] sm:$0xff]  }
  0xab   : > { %3426 = vmatpush3.bf16.msra.mxu0 %v3757_v42  ;;  %v3817_v42 = vld [vmem:[%s3941_s25 + $0x608] sm:$0xff]  }
  0xac   : > { %3448 = vmatpush3.bf16.msra.mxu1 %v3759_v44  ;;  %3427 = vmatprep.subr.bf16.mxu0 %v3760_v45  ;;  %v3819_v44 = vld [vmem:[%s3941_s25 + $0x688] sm:$0xff]   ;;  %v3820_v45 = vld [vmem:[%s3941_s25 + $0x650] sm:$0xff]  }
  0xad   : > { %3449 = vmatprep.subr.bf16.mxu1 %v3762_v47  ;;  %v3822_v47 = vld [vmem:[%s3941_s25 + $0x6d0] sm:$0xff]  }
  0xaf   : > { %3428 = vmatpush3.bf16.msra.mxu0 %v3761_v46  ;;  %v3821_v46 = vld [vmem:[%s3941_s25 + $0x610] sm:$0xff]  }
  0xb0   : > { %3450 = vmatpush3.bf16.msra.mxu1 %v3763_v48  ;;  %3429 = vmatprep.subr.bf16.mxu0 %v3764_v49  ;;  %v3823_v48 = vld [vmem:[%s3941_s25 + $0x690] sm:$0xff]   ;;  %v3824_v49 = vld [vmem:[%s3941_s25 + $0x658] sm:$0xff]  }
  0xb1   : > { %3451 = vmatprep.subr.bf16.mxu1 %v3766_v51  ;;  %v3826_v51 = vld [vmem:[%s3941_s25 + $0x6d8] sm:$0xff]  }
  0xb3   : > { %3430 = vmatpush3.bf16.msra.mxu0 %v3765_v50  ;;  %v3825_v50 = vld [vmem:[%s3941_s25 + $0x618] sm:$0xff]  }
  0xb4   : > { %3452 = vmatpush3.bf16.msra.mxu1 %v3767_v52  ;;  %3431 = vmatprep.subr.bf16.mxu0 %v3768_v53  ;;  %v3827_v52 = vld [vmem:[%s3941_s25 + $0x698] sm:$0xff]   ;;  %v3828_v53 = vld [vmem:[%s3941_s25 + $0x660] sm:$0xff]  }
  0xb5   : > { %3453 = vmatprep.subr.bf16.mxu1 %v3770_v55  ;;  %v3830_v55 = vld [vmem:[%s3941_s25 + $0x6e0] sm:$0xff]  }
  0xb7   : > { %3432 = vmatpush3.bf16.msra.mxu0 %v3769_v54  ;;  %v3829_v54 = vld [vmem:[%s3941_s25 + $0x620] sm:$0xff]  }
  0xb8   : > { %3454 = vmatpush3.bf16.msra.mxu1 %v3773_v59  ;;  %3461 = vmatprep.subr.bf16.mxu0 %v3774_v60  ;;  %v3834_v59 = vld [vmem:[%s3941_s25 + $0x6e8] sm:$0xff]  }
  0xb9   : > { %3483 = vmatprep.subr.bf16.mxu1 %v3778_v1  ;;  %v3835_v60 = vld [vmem:[%s3941_s25 + $0x6a8] sm:$0xff]   ;;  %v3840_v1 = vld [vmem:[%s3941_s25 + $0x678] sm:$0xff]  }
  0xba   : > { %2619 = vmatmul.mubr.bf16.vlgmr.msra.gmra.mrb[16].mxu0 %v2982_v57  ;;  %v3832_v57 = vld [vmem:[%s3941_s25 + $0x668] sm:$0xff]  }
  0xbb   : > { %3462 = vmatpush3.bf16.msra.mxu0 %v3777_v0  ;;  %2659 = vmatmul.mubr.bf16.vlgmr.msra.gmra.mrb[16].mxu1 %v2984_v62  ;;  %v3837_v62 = vld [vmem:[%s3941_s25 + $0x630] sm:$0xff]  }
  0xbc   : > { %3484 = vmatpush3.bf16.msra.mxu1 %v3779_v2  ;;  %3463 = vmatprep.subr.bf16.mxu0 %v3780_v3  ;;  %v3839_v0 = vld [vmem:[%s3941_s25 + $0x6b0] sm:$0xff]   ;;  %v3841_v2 = vld [vmem:[%s3941_s25 + $0x638] sm:$0xff]  }
  0xbd   : > { %3485 = vmatprep.subr.bf16.mxu1 %v3782_v5  ;;  %2698 = vmatprep.mubr.bf16.mxu0 %v2987_v32  ;;  %v3842_v3 = vld [vmem:[%s3941_s25 + $0x6f8] sm:$0xff]   ;;  %v3860_v32 = vld [vmem:[%s3941_s25 + $0x770] sm:$0xff]  }
  0xbe   : > { %2738 = vmatprep.mubr.bf16.mxu1 %v2989_v37  ;;  %v3861_v37 = vld [vmem:[%s3941_s25 + $0x730] sm:$0xff]  }
  0xbf   : > { %3464 = vmatpush3.bf16.msra.mxu0 %v3781_v4  ;;  %v238_v4 = vld [vmem:[%s3936_s21 + $0x60] sm:$0xff] }
  0xc0   : > { %3486 = vmatpush3.bf16.msra.mxu1 %v3783_v6  ;;  %3465 = vmatprep.subr.bf16.mxu0 %v3784_v7  ;;  %v2990_v5 = vcombine.low %v238_v4, %v238_v4  ;;  %v2991_v6 = vcombine.high %v238_v4, %v238_v4  ;;  %v3845_v7 = vld [vmem:[%s3941_s25 + $0x6b8] sm:$0xff]  }
  0xc1   : > { %3487 = vmatprep.subr.bf16.mxu1 %v3786_v9  ;;  %v239_v9 = vld [vmem:[%s3936_s21 + $0x68] sm:$0xff] }
  0xc3   : > { %3466 = vmatpush3.bf16.msra.mxu0 %v3785_v8  ;;  %v3846_v8 = vld [vmem:[%s3941_s25 + $0x740] sm:$0xff]  }
  0xc4   : > { %3488 = vmatpush3.bf16.msra.mxu1 %v3787_v10  ;;  %3467 = vmatprep.subr.bf16.mxu0 %v3788_v11  ;;  %v2992_v10 = vcombine.low %v239_v9, %v239_v9  ;;  %v2993_v11 = vcombine.high %v239_v9, %v239_v9 }
  0xc5   : > { %3489 = vmatprep.subr.bf16.mxu1 %v3790_v13  ;;  %v3850_v13 = vld [vmem:[%s3941_s25 + $0x748] sm:$0xff]  }
  0xc7   : > { %3468 = vmatpush3.bf16.msra.mxu0 %v3789_v12  ;;  %v3849_v12 = vld [vmem:[%s3941_s25 + $0x700] sm:$0xff]  }
  0xc8   : > { %3490 = vmatpush3.bf16.msra.mxu1 %v3791_v14  ;;  %3469 = vmatprep.subr.bf16.mxu0 %v3792_v15  ;;  %v3851_v14 = vld [vmem:[%s3941_s25 + $0x708] sm:$0xff]   ;;  %v3852_v15 = vld [vmem:[%s3941_s25 + $0x750] sm:$0xff]  }
  0xc9   : > { %3491 = vmatprep.subr.bf16.mxu1 %v3794_v17  ;;  %v3854_v17 = vld [vmem:[%s3941_s25 + $0x758] sm:$0xff]  }
  0xcb   : > { %3470 = vmatpush3.bf16.msra.mxu0 %v3793_v16  ;;  %v3853_v16 = vld [vmem:[%s3941_s25 + $0x710] sm:$0xff]  }
  0xcc   : > { %3492 = vmatpush3.bf16.msra.mxu1 %v3795_v18  ;;  %3471 = vmatprep.subr.bf16.mxu0 %v3796_v19  ;;  %v3855_v18 = vld [vmem:[%s3941_s25 + $0x718] sm:$0xff]   ;;  %v3856_v19 = vld [vmem:[%s3941_s25 + $0x760] sm:$0xff]  }
  0xcd   : > { %3493 = vmatprep.subr.bf16.mxu1 %v3798_v21  ;;  %v240_v21 = vld [vmem:[%s3936_s21 + $0x70] sm:$0xff] }
  0xcf   : > { %3472 = vmatpush3.bf16.msra.mxu0 %v3797_v20  ;;  %v3857_v20 = vld [vmem:[%s3941_s25 + $0x720] sm:$0xff]  }
  0xd0   : > { %3494 = vmatpush3.bf16.msra.mxu1 %v3799_v22  ;;  %3473 = vmatprep.subr.bf16.mxu0 %v3800_v23  ;;  %v3858_v22 = vld [vmem:[%s3941_s25 + $0x768] sm:$0xff]   ;;  %v2995_v23 = vcombine.high %v240_v21, %v240_v21 }
  0xd1   : > { %3495 = vmatprep.subr.bf16.mxu1 %v3802_v25 }
  0xd3   : > { %3474 = vmatpush3.bf16.msra.mxu0 %v3801_v24 }
  0xd4   : > { %3496 = vmatpush3.bf16.msra.mxu1 %v3803_v26  ;;  %3475 = vmatprep.subr.bf16.mxu0 %v3804_v27 }
  0xd5   : > { %3497 = vmatprep.subr.bf16.mxu1 %v3806_v29 }
  0xd7   : > { %3476 = vmatpush3.bf16.msra.mxu0 %v3805_v28  ;;  %v3859_v28 = vld [vmem:[%s3941_s25 + $0x728] sm:$0xff]  }
  0xd8   : > { %3498 = vmatpush3.bf16.msra.mxu1 %v3809_v33  ;;  %3505 = vmatprep.subr.bf16.mxu0 %v3810_v34 }
  0xd9   : > { %3527 = vmatprep.subr.bf16.mxu1 %v3814_v39  ;;  %v3863_v39 = vld [vmem:[%s3941_s25 + $0x738] sm:$0xff]  }
  0xda   : > { %2699 = vmatmul.mubr.bf16.vlgmr.msra.gmra.mrb[20].mxu0 %v2986_v31 }
  0xdb   : > { %3506 = vmatpush3.bf16.msra.mxu0 %v3813_v38  ;;  %2739 = vmatmul.mubr.bf16.vlgmr.msra.gmra.mrb[20].mxu1 %v2988_v36  ;;  %v3862_v38 = vld [vmem:[%s3941_s25 + $0x778] sm:$0xff]  }
  0xdc   : > { %3528 = vmatpush3.bf16.msra.mxu1 %v3815_v40  ;;  %3507 = vmatprep.subr.bf16.mxu0 %v3816_v41  ;;  %v2994_v40 = vcombine.low %v240_v21, %v240_v21 }
  0xdd   : > { %3529 = vmatprep.subr.bf16.mxu1 %v3818_v43  ;;  %2778 = vmatprep.mubr.bf16.mxu0 %v2991_v6 }
  0xde   : > { %2818 = vmatprep.mubr.bf16.mxu1 %v2993_v11 }
  0xdf   : > { %3508 = vmatpush3.bf16.msra.mxu0 %v3817_v42 }
  0xe0   : > { %3530 = vmatpush3.bf16.msra.mxu1 %v3819_v44  ;;  %3509 = vmatprep.subr.bf16.mxu0 %v3820_v45 }
  0xe1   : > { %3531 = vmatprep.subr.bf16.mxu1 %v3822_v47 }
  0xe3   : > { %3510 = vmatpush3.bf16.msra.mxu0 %v3821_v46 }
  0xe4   : > { %3532 = vmatpush3.bf16.msra.mxu1 %v3823_v48  ;;  %3511 = vmatprep.subr.bf16.mxu0 %v3824_v49 }
  0xe5   : > { %3533 = vmatprep.subr.bf16.mxu1 %v3826_v51 }
  0xe7   : > { %3512 = vmatpush3.bf16.msra.mxu0 %v3825_v50 }
  0xe8   : > { %3534 = vmatpush3.bf16.msra.mxu1 %v3827_v52  ;;  %3513 = vmatprep.subr.bf16.mxu0 %v3828_v53 }
  0xe9   : > { %3535 = vmatprep.subr.bf16.mxu1 %v3830_v55 }
  0xeb   : > { %3514 = vmatpush3.bf16.msra.mxu0 %v3829_v54 }
  0xec   : > { %3536 = vmatpush3.bf16.msra.mxu1 %v3831_v56  ;;  %3515 = vmatprep.subr.bf16.mxu0 %v3832_v57 }
  0xed   : > { %3537 = vmatprep.subr.bf16.mxu1 %v3834_v59 }
  0xef   : > { %3516 = vmatpush3.bf16.msra.mxu0 %v3833_v58 }
  0xf0   : > { %3538 = vmatpush3.bf16.msra.mxu1 %v3835_v60  ;;  %3517 = vmatprep.subr.bf16.mxu0 %v3836_v61 }
  0xf1   : > { %3539 = vmatprep.subr.bf16.mxu1 %v3838_v63 }
  0xf3   : > { %3518 = vmatpush3.bf16.msra.mxu0 %v3837_v62 }
  0xf4   : > { %3540 = vmatpush3.bf16.msra.mxu1 %v3839_v0  ;;  %3519 = vmatprep.subr.bf16.mxu0 %v3840_v1 }
  0xf5   : > { %3541 = vmatprep.subr.bf16.mxu1 %v3842_v3 }
  0xf7   : > { %3520 = vmatpush3.bf16.msra.mxu0 %v3841_v2 }
  0xf8   : > { %3542 = vmatpush3.bf16.msra.mxu1 %v3845_v7  ;;  %3549 = vmatprep.subr.bf16.mxu0 %v3846_v8 }
  0xfa   : > { %2779 = vmatmul.mubr.bf16.vlgmr.msra.gmra.mrb[24].mxu0 %v2990_v5 }
  0xfb   : > { %3550 = vmatpush3.bf16.msra.mxu0 %v3849_v12  ;;  %2819 = vmatmul.mubr.bf16.vlgmr.msra.gmra.mrb[24].mxu1 %v2992_v10 }
  0xfc   : > { %3551 = vmatprep.subr.bf16.mxu0 %v3850_v13  ;;  %2858 = vmatprep.mubr.bf16.mxu0 %v2995_v23 }
  0xff   : > { %3552 = vmatpush3.bf16.msra.mxu0 %v3851_v14 }
 0x100   : > { %3553 = vmatprep.subr.bf16.mxu0 %v3852_v15 }
 0x103   : > { %3554 = vmatpush3.bf16.msra.mxu0 %v3853_v16 }
 0x104   : > { %3555 = vmatprep.subr.bf16.mxu0 %v3854_v17 }
 0x107   : > { %3556 = vmatpush3.bf16.msra.mxu0 %v3855_v18 }
 0x108   : > { %3557 = vmatprep.subr.bf16.mxu0 %v3856_v19 }
 0x10b   : > { %3558 = vmatpush3.bf16.msra.mxu0 %v3857_v20 }
 0x10c   : > { %3559 = vmatprep.subr.bf16.mxu0 %v3858_v22 }
 0x10d   : > { %v3257_v24 = vpop.f32.mrb[0].mxu0 }
 0x10e   : > { %v3279_v25 = vpop.f32.mrb[0].mxu1  ;;  %v3258_v26 = vpop.f32.mrb[1].mxu0 }
 0x10f   : > { %v3280_v27 = vpop.f32.mrb[1].mxu1  ;;  %v3259_v29 = vadd.f32 %v3258_v26, %v3257_v24  ;;  %v3260_v31 = vpop.f32.mrb[2].mxu0  ;;  %3560 = vmatpush3.bf16.msra.mxu0 %v3859_v28 }
 0x110   : > { %v3281_v30 = vadd.f32 %v3280_v27, %v3279_v25  ;;  %v3282_v33 = vpop.f32.mrb[2].mxu1  ;;  %v3261_v34 = vpop.f32.mrb[3].mxu0  ;;  %3561 = vmatprep.subr.bf16.mxu0 %v3860_v32 }
 0x111   : > { %v3283_v35 = vpop.f32.mrb[3].mxu1 }
 0x112   : > { %v2341_v36 = vadd.f32 %v3281_v30, %v3259_v29 }
 0x113   : > { %3562 = vmatpush3.bf16.msra.mxu0 %v3861_v37 }
 0x114   : > { %3563 = vmatprep.subr.bf16.mxu0 %v3862_v38 }
 0x117   : > { %3564 = vmatpush3.bf16.msra.mxu0 %v3863_v39 }
 0x11a   : > { %2859 = vmatmul.mubr.bf16.vlgmr.msra.gmra.mrb[28].mxu0 %v2994_v40 }
 0x12d   : > { %v3301_v41 = vpop.f32.mrb[4].mxu0 }
 0x12e   : > { %v3302_v42 = vpop.f32.mrb[5].mxu0  ;;  %v3323_v43 = vpop.f32.mrb[4].mxu1 }
 0x12f   : > { %v3303_v44 = vadd.f32 %v3302_v42, %v3301_v41  ;;  %v3304_v45 = vpop.f32.mrb[6].mxu0  ;;  %v3324_v46 = vpop.f32.mrb[5].mxu1 }
 0x130   : > { %v3305_v47 = vpop.f32.mrb[7].mxu0  ;;  %v3325_v48 = vadd.f32 %v3324_v46, %v3323_v43  ;;  %v3326_v49 = vpop.f32.mrb[6].mxu1 }
 0x131   : > { %v2381_v50 = vadd.f32 %v3303_v44, %v2341_v36  ;;  %v3327_v51 = vpop.f32.mrb[7].mxu1 }
 0x133   : > { %v2421_v52 = vadd.f32 %v3325_v48, %v2381_v50 }
 0x14d   : > { %v3345_v53 = vpop.f32.mrb[8].mxu0 }
 0x14e   : > { %v3346_v54 = vpop.f32.mrb[9].mxu0  ;;  %v3367_v57 = vpop.f32.mrb[8].mxu1 }
 0x14f   : > { %v3347_v55 = vadd.f32 %v3346_v54, %v3345_v53  ;;  %v3348_v56 = vpop.f32.mrb[10].mxu0  ;;  %v3368_v59 = vpop.f32.mrb[9].mxu1  ;;  %v225_v53 = vld [vmem:[#allocation2] sm:$0xff] }
 0x150   : > { %v3349_v58 = vpop.f32.mrb[11].mxu0  ;;  %v3369_v61 = vadd.f32 %v3368_v59, %v3367_v57  ;;  %v3370_v62 = vpop.f32.mrb[10].mxu1 }
 0x151   : > { %v2461_v60 = vadd.f32 %v3347_v55, %v2421_v52  ;;  %v3371_v63 = vpop.f32.mrb[11].mxu1  ;;  %v3237_v58 = vld [vmem:[%s4217_s2] ss:$0 sm:$0xff] (!%p3236_p7) }
 0x153   : > { %v2501_v0 = vadd.f32 %v3369_v61, %v2461_v60 }
 0x16d   : > { %v3389_v1 = vpop.f32.mrb[12].mxu0 }
 0x16e   : > { %v3390_v2 = vpop.f32.mrb[13].mxu0  ;;  %v3411_v5 = vpop.f32.mrb[12].mxu1 }
 0x16f   : > { %v3391_v3 = vadd.f32 %v3390_v2, %v3389_v1  ;;  %v3392_v4 = vpop.f32.mrb[14].mxu0  ;;  %v3412_v7 = vpop.f32.mrb[13].mxu1 }
 0x170   : > { %v3393_v6 = vpop.f32.mrb[15].mxu0  ;;  %v3413_v9 = vadd.f32 %v3412_v7, %v3411_v5  ;;  %v3414_v10 = vpop.f32.mrb[14].mxu1 }
 0x171   : > { %v2541_v8 = vadd.f32 %v3391_v3, %v2501_v0  ;;  %v3415_v11 = vpop.f32.mrb[15].mxu1 }
 0x173   : > { %v2581_v12 = vadd.f32 %v3413_v9, %v2541_v8 }
 0x18d   : > { %v3433_v13 = vpop.f32.mrb[16].mxu0 }
 0x18e   : > { %v3434_v14 = vpop.f32.mrb[17].mxu0  ;;  %v3455_v17 = vpop.f32.mrb[16].mxu1 }
 0x18f   : > { %v3435_v15 = vadd.f32 %v3434_v14, %v3433_v13  ;;  %v3436_v16 = vpop.f32.mrb[18].mxu0  ;;  %v3456_v20 = vpop.f32.mrb[17].mxu1 }
 0x190   : > { %v3437_v18 = vpop.f32.mrb[19].mxu0  ;;  %v3457_v21 = vadd.f32 %v3456_v20, %v3455_v17  ;;  %v3458_v22 = vpop.f32.mrb[18].mxu1 }
 0x191   : > { %v2621_v19 = vadd.f32 %v3435_v15, %v2581_v12  ;;  %v3459_v23 = vpop.f32.mrb[19].mxu1 }
 0x193   : > { %v2661_v24 = vadd.f32 %v3457_v21, %v2621_v19 }
 0x1ad   : > { %v3477_v25 = vpop.f32.mrb[20].mxu0 }
 0x1ae   : > { %v3478_v26 = vpop.f32.mrb[21].mxu0  ;;  %v3499_v29 = vpop.f32.mrb[20].mxu1 }
 0x1af   : > { %v3479_v27 = vadd.f32 %v3478_v26, %v3477_v25  ;;  %v3480_v28 = vpop.f32.mrb[22].mxu0  ;;  %v3500_v31 = vpop.f32.mrb[21].mxu1 }
 0x1b0   : > { %v3481_v30 = vpop.f32.mrb[23].mxu0  ;;  %v3501_v33 = vadd.f32 %v3500_v31, %v3499_v29  ;;  %v3502_v34 = vpop.f32.mrb[22].mxu1 }
 0x1b1   : > { %v2701_v32 = vadd.f32 %v3479_v27, %v2661_v24  ;;  %v3503_v35 = vpop.f32.mrb[23].mxu1 }
 0x1b3   : > { %v2741_v36 = vadd.f32 %v3501_v33, %v2701_v32 }
 0x1cd   : > { %v3521_v37 = vpop.f32.mrb[24].mxu0 }
 0x1ce   : > { %v3522_v38 = vpop.f32.mrb[25].mxu0  ;;  %v3543_v41 = vpop.f32.mrb[24].mxu1 }
 0x1cf   : > { %v3523_v39 = vadd.f32 %v3522_v38, %v3521_v37  ;;  %v3524_v40 = vpop.f32.mrb[26].mxu0  ;;  %v3544_v43 = vpop.f32.mrb[25].mxu1 }
 0x1d0   : > { %v3525_v42 = vpop.f32.mrb[27].mxu0  ;;  %v3545_v45 = vadd.f32 %v3544_v43, %v3543_v41  ;;  %v3546_v46 = vpop.f32.mrb[26].mxu1 }
 0x1d1   : > { %v2781_v44 = vadd.f32 %v3523_v39, %v2741_v36  ;;  %v3547_v47 = vpop.f32.mrb[27].mxu1 }
 0x1d3   : > { %v2821_v48 = vadd.f32 %v3545_v45, %v2781_v44 }
 0x1ed   : > { %v3565_v49 = vpop.f32.mrb[28].mxu0 }
 0x1ee   : > { %v3566_v50 = vpop.f32.mrb[29].mxu0 }
 0x1ef   : > { %v3567_v51 = vadd.f32 %v3566_v50, %v3565_v49  ;;  %v3568_v52 = vpop.f32.mrb[30].mxu0  ;;  %2871 = sbr.rel (%p3236_p7) target bundleno = 512 (0x200), region = 40 }
 0x1f0   : > { %v3569_v54 = vpop.f32.mrb[31].mxu0 }
 0x1f1   : > { %v2861_v55 = vadd.f32 %v3567_v51, %v2821_v48 }
 0x1f3   : > { %v2866_v56 = vadd.f32 %v2861_v55, %v225_v53 }
 0x1f5   : > { %2867 = vst [vmem:[#allocation2] sm:$0xff] %v2866_v56 }
 0x1fc   : > { %v2872_v57 = vld [vmem:[#allocation2] sm:$0xff] }
 0x1fd   : > { %v2880_v59 = vadd.f32 %v3237_v58, %v2872_v57 }
 0x1ff   : > { %2881 = vst [vmem:[%s4218_s3] sm:$0xff] %v2880_v59 }
 0x200 PF: > { %s13_s14 = sadd.s32 1, %s3888_s14   ;;  %s4219_s12 = smov %s3884_s13 }
 0x201   : > { %p10_p8 = scmp.ge.s32.totalorder %s13_s14, 7   ;;  %s4220_s13 = smov %s4222_s15 }
 0x203   :  { %12 = sbr.rel (!%p10_p8) target bundleno = 2 (0x2), region = 73 }

// kernel: forward.9
= control target key start
LH: loop header
LB: loop body
LE: loop exit
PB: predicated region body
PF: predicated region fallthrough
CT: control target
= control target key end

     0   :  { %11 = vsyncpa [#allocation5], 0  ;;  %s751_s21 = smov 0   ;;  %s841_s0 = inlined_call_operand.vmem [shape: bf16[4,2,32], index: 0, kind: input, shape index: {}]   ;;  %s842_s1 = inlined_call_operand.vmem [shape: bf16[32,128], index: 1, kind: input, shape index: {}]   ;;  %s843_s2 = inlined_call_operand.vmem [shape: f32[32,128], index: 2, kind: input, shape index: {}]   ;;  %s844_s3 = inlined_call_operand.vmem [shape: f32[1,128], index: 3, kind: input, shape index: {}]   ;;  %s845_s4 = inlined_call_operand.vmem [shape: f32[32,5], index: 4, kind: input, shape index: {}]   ;;  %s846_s5 = inlined_call_operand.vmem [shape: f32[1,5], index: 5, kind: input, shape index: {}]   ;;  %s847_s6 = inlined_call_operand.hbm [shape: f32[2,5], index: 6, kind: output, shape index: {}]  }
   0x1 LB: > { %s757_s22 = sadd.s32 4294967295, %s703_s21   ;;  %p562_p0 = scmp.ge.s32.totalorder %s703_s21, 1  ;;  %s703_s21 = sphi %s751_s21, %s17_s21  }
   0x2   : > { %p206_p1 = scmp.lt.s32.totalorder %s703_s21, 5 }
   0x4   : > { %p207_p2 = pnand %p562_p0, %p206_p1 }
   0x5   : > { %p229_p3 = scmp.lt.s32.totalorder (!%p207_p2), %s757_s22, 3  ;;  %p563_p4 = scmp.ne.s32.totalorder (!%p207_p2), %s757_s22, 0 }
   0x6   : > { %210 = sbr.rel (%p207_p2) target bundleno = 975 (0x3cf), region = 44 }
   0xd   : > { %s763_s23 = scalar_select %p229_p3, %s757_s22, 3 }
   0xe   : > { %236 = sbr.rel (%p563_p4) target bundleno = 21 (0x15), region = 48  ;;  %vm237_vm0 = vcmask (!%p563_p4), 254976   ;;  %v705_v0 = vmov (!%p563_p4), 0.0  }
   0xf   : > { %s231_s26 = scalar_lea.vmem %s841_s0, %s763_s23  ;;  %238 = vst.msk [vmem:[#allocation2] sm:$0x3] (!%p563_p4), %vm237_vm0, %v705_v0  ;;  %239 = vst.msk [vmem:[#allocation3] sm:$0x3] (!%p563_p4), %vm237_vm0, %v705_v0 }
  0x15 PF: > { %v246_v1 = vld [vmem:[%s843_s2] sm:$0xff]  ;;  %v247_v2 = vld [vmem:[%s843_s2 + $0x8] sm:$0xff]  ;;  %v706_v3 = vmov 0.0|0.0   ;;  %v707_v4 = vmov 0.0   ;;  %v248_v7 = vld [vmem:[%s843_s2 + $0x10] sm:$0xff]  ;;  %vm708_vm1 = vmmov 0  }
  0x16   : > { %620 = vmatprep.subr.bf16.mxu0 %v706_v3  ;;  %601 = vmatprep.subr.bf16.mxu1 %v707_v4  ;;  %v621_v5 = vpack.c.bf16 %v247_v2, %v246_v1  ;;  %v657_v6 = vld [vmem:[%s842_s1] sm:$0xff]   ;;  %v249_v8 = vld [vmem:[%s843_s2 + $0x18] sm:$0xff]  ;;  %v658_v10 = vld [vmem:[%s842_s1 + $0x8] sm:$0xff]   ;;  %vm250_vm2 = vcmask 261120   ;;  %s709_s19 = smov 64   ;;  %s710_s20 = smov 32  }
  0x17   : > { %598 = vmatprep.mubr.msk.f32.mxu0 %vm708_vm1, %v707_v4  ;;  %605 = vmatprep.mubr.msk.bf16.mxu1 %vm708_vm1, %v707_v4  ;;  %v624_v9 = vpack.c.bf16 %v249_v8, %v248_v7  ;;  %v245_v11 = vld [vmem:[#allocation2] sm:$0x3]  ;;  %v387_v23 = vld [vmem:[#allocation3] sm:$0x3]  ;;  %s711_s23 = smov 96   ;;  %vm420_vm3 = vcmask 254976  }
  0x18   : > { %622 = vmatpush3.bf16.msra.mxu0 %v621_v5  ;;  %602 = vmatpush3.bf16.msra.mxu1 %v657_v6  ;;  %v240_v12 = vld [vmem:[%s231_s26] sm:$0x1]  ;;  %p570_p5 = scmp.ne.s32.totalorder %s757_s22, 3 }
  0x19   : > { %623 = vmatprep.subr.bf16.mxu0 %v706_v3  ;;  %603 = vmatprep.subr.bf16.mxu1 %v707_v4  ;;  %v568_v15 = vld [vmem:[%s844_s3] ss:$0 sm:$0xff]  ;;  %v432_v40 = vld [vmem:[%s845_s4 + $0x8] sm:$0xff] (!%p570_p5)  ;;  %v433_v41 = vld [vmem:[%s845_s4 + $0x10] sm:$0xff] (!%p570_p5)  ;;  %v712_v42 = vmov (!%p570_p5), 0.0|0.0   ;;  %vm713_vm4 = vmmov (!%p570_p5), 0  }
  0x1a   : > { %v431_v39 = vld [vmem:[%s845_s4] sm:$0xff] (!%p570_p5)  ;;  %v434_v44 = vld [vmem:[%s845_s4 + $0x18] sm:$0xff] (!%p570_p5)  ;;  %v714_v45 = vmov (!%p570_p5), 0.0   ;;  %vm514_vm5 = vcmask (!%p570_p5), 33792  }
  0x1b   : > { %v627_v43 = vpack.c.bf16 (!%p570_p5), %v432_v40, %v431_v39  ;;  %v630_v46 = vpack.c.bf16 (!%p570_p5), %v434_v44, %v433_v41  ;;  %v571_v47 = vld [vmem:[%s846_s5] ss:$0 sm:$0xff] (!%p570_p5) }
  0x1c   : > { %625 = vmatpush3.bf16.msra.mxu0 %v624_v9  ;;  %604 = vmatpush3.bf16.msra.mxu1 %v658_v10 }
  0x1d   : > { %626 = vmatprep.subr.bf16.mxu0 (!%p570_p5), %v712_v42 }
  0x1f   : > { %599 = vmatmul.mubr.msk.f32.vlgmr.msra.gmra.mrb[0].mxu0 %vm250_vm2, %v245_v11  ;;  %606 = vmatmul.mubr.msk.bf16.vlgmr.msra.gmra.mrb[0].mxu1 %vm250_vm2, %v240_v12 }
  0x20   : > { %617 = vmatprep.mubr.msk.f32.mxu0 (!%p570_p5), %vm713_vm4, %v714_v45  ;;  %628 = vmatpush3.bf16.msra.mxu0 (!%p570_p5), %v627_v43 }
  0x21   : > { %629 = vmatprep.subr.bf16.mxu0 (!%p570_p5), %v712_v42 }
  0x24   : > { %631 = vmatpush3.bf16.msra.mxu0 (!%p570_p5), %v630_v46 }
  0xf2   : > { %v320_v13 = vpop.f32.mrb[0].mxu0  ;;  %v373_v14 = vpop.f32.mrb[0].mxu1 }
  0xf3   : > { %v374_v16 = vadd.f32 %v373_v14, %v320_v13  ;;  %v600_v17 = vpop.f32.mrb[1].mxu0  ;;  %v607_v18 = vpop.f32.mrb[1].mxu1 }
  0xf4   : > { %v376_v19 = vpop.f32.mrb[2].mxu1 }
  0xf5   : > { %v386_v20 = vadd.f32 %v568_v15, %v374_v16  ;;  %v608_v21 = vpop.f32.mrb[3].mxu1 }
  0xf7   : > { %659 = vtanh.f32 %v386_v20  ;;  %v569_v24 = vmul.f32 -1.442695, %v386_v20 }
  0xf9   : > { %661 = vpow2.f32 %v569_v24 }
 0x101   : > { %v660_v22 = vpop.eup %659 }
 0x102   : > { %401 = vrot.lane.b32.xlu0 %v660_v22, %s709_s19 }
 0x103   : > { %v662_v25 = vpop.eup %661 }
 0x104   : > { %v391_v26 = vadd.f32 1.0, %v662_v25 }
 0x106   : > { %396 = vrot.lane.b32.xlu0 %v387_v23, %s710_s20  ;;  %663 = vrcp.f32 %v391_v26 }
 0x110   : > { %v664_v27 = vpop.eup %663 }
 0x174   : > { %v402_v28 = vpop.permute.xlu0 %401 }
 0x175   : > { %v404_v29 = vmul.f32 %v664_v27, %v402_v28 }
 0x177   : > { %406 = vrot.lane.b32.xlu1 %v404_v29, %s710_s20 }
 0x178   : > { %v397_v30 = vpop.permute.xlu0 %396 }
 0x179   : > { %v399_v31 = vmul.f32 %v664_v27, %v397_v30 }
 0x1e9   : > { %v407_v32 = vpop.permute.xlu1 %406 }
 0x1ea   : > { %v409_v33 = vadd.f32 %v407_v32, %v399_v31 }
 0x1ec   : > { %665 = vtanh.f32 %v409_v33 }
 0x1f6   : > { %v666_v34 = vpop.eup %665 }
 0x1f7   : > { %412 = vrot.lane.b32.xlu1 %v666_v34, %s709_s19 }
 0x1fb   : > { %423 = vrot.lane.b32.xlu1 %v409_v33, %s711_s23 }
 0x269   : > { %v413_v35 = vpop.permute.xlu1 %412 }
 0x26a   : > { %v415_v36 = vmul.f32 %v664_v27, %v413_v35 }
 0x26c   : > { %417 = vrot.lane.b32.xlu0 %v415_v36, %s710_s20 }
 0x26d   : > { %v424_v37 = vpop.permute.xlu1 %423 }
 0x26e   : > { %426 = vst.msk [vmem:[#allocation3] sm:$0x3] %vm420_vm3, %v424_v37 }
 0x2d9   : > { %430 = sbr.rel (%p570_p5) target bundleno = 950 (0x3b6), region = 52 }
 0x2de   : > { %v418_v38 = vpop.permute.xlu0 %417 }
 0x2df   : > { %421 = vst.msk [vmem:[#allocation2] sm:$0x3] %vm420_vm3, %v418_v38  ;;  %618 = vmatmul.mubr.msk.f32.vlgmr.msra.gmra.mrb[0].mxu0 (!%p570_p5), %vm250_vm2, %v418_v38 }
 0x3b2   : > { %v510_v48 = vpop.f32.mrb[0].mxu0 }
 0x3b3   : > { %v511_v49 = vadd.f32 %v571_v47, %v510_v48  ;;  %v619_v50 = vpop.f32.mrb[1].mxu0 }
 0x3b5   : > { %515 = vst.msk [vmem:[#allocation4] sm:$0x3] %vm514_vm5, %v511_v49 }
 0x3b6 PF: > { %p636_p6 = scmp.eq.s32.totalorder %s757_s22, 3  ;;  %s715_s10 = smov [#allocation4]  }
 0x3b7   : > { %s523_s11 = sshll.u32 %s715_s10, 4  ;;  %s524_s11 = int_to_ptr.vmem [resolvable:$true] %s523_s11 }
 0x3b8   : > { %s667_s12 = scalar_lea.vmem %s524_s11, 32  ;;  %p674_p10 = scmp.lt.s32.totalorder %s524_s11, %s524_s11 }
 0x3b9   : > { %p668_p7 = scmp.ne.s32.totalorder %s524_s11, %s667_s12  ;;  %p675_p11 = scmp.lt.s32.totalorder %s667_s12, %s667_s12 }
 0x3bb   : > { %p669_p8 = pnand %p668_p7, %p636_p6  ;;  %p676_p12 = por %p675_p11, %p674_p10 }
 0x3bd   : > { %p670_p9 = pneg %p669_p8 }
 0x3bf   : > { %p677_p13 = pnand %p676_p12, %p670_p9 }
 0x3c1   : > { %680 = shalt.err (!%p677_p13)
}
 0x3c2   : > { %s681_s15 = scalar_lea.hbm %s847_s6, 32 }
 0x3c3   : > { %p682_p0 = scmp.ne.s32.totalorder %s847_s6, %s681_s15  ;;  %p687_p3 = scmp.lt.u32.totalorder %s681_s15, %s847_s6 }
 0x3c5   : > { %p683_p1 = pnand %p682_p0, %p636_p6 }
 0x3c7   : > { %p684_p2 = pneg %p683_p1 }
 0x3c9   : > { %p689_p4 = pnand %p687_p3, %p684_p2 }
 0x3cb   : > { %692 = shalt.err (!%p689_p4)
}
 0x3cc   : > { %633 = dma.vmem_to_hbm [thread:$0]  (%p636_p6), %s524_s11, 32, %s847_s6, [#allocation5]  }
 0x3cd   : > { %698 = dma.done.wait (%p636_p6), [#allocation5], 32  }
 0x3ce   : > { %700 = vsyncadd (%p636_p6), [#allocation5], 4294967264 }
 0x3cf PF: > { %s17_s21 = sadd.s32 1, %s703_s21  }
 0x3d0   : > { %p14_p5 = scmp.ge.s32.totalorder %s17_s21, 6  }
 0x3d2   :  { %16 = sbr.rel (!%p14_p5) target bundleno = 1 (0x1), region = 79 }
 0x3d9   :  { %536 = vsyncpa [#allocation5], 1 }
 0x3da   :  { %538 = vsyncpa [#allocation5 + $0x1], 1 }

</bundles_post_ra>
